<compile_context>
chip_gen: v7x
topology: tpu7x:2x2x1
jax: 0.10.0
libtpu: 0.0.40
codegen_flags: <defaults>
</compile_context>

<pallas_src>
import math
from functools import partial

import numpy as np
import jax
import jax.numpy as jnp
from jax.experimental import pallas as pl
from jax.experimental.pallas import tpu as pltpu

NEG_INF = -1e30


def _round_up(v, m):
    return ((v + m - 1) // m) * m


def _full_spec(shape):
    nd = len(shape)
    return pl.BlockSpec(shape, lambda *_args, _nd=nd: (0,) * _nd)


def _choose_k_block(K, max_block=1024):
    best = K
    t = 128
    while t <= min(K, max_block):
        if K % t == 0:
            best = t
        t += 128
    return best


# ----------------------------------------------------------------------------
# Kernel 1: multi-head attention, one node block per grid step.
#   query  xq : [bn*L, D]   node-major rows (row = n*L + l)
#   memory mem: [bn*Mp, D]  node-major rows (row = n*Mp + m), zero padded to Mp
# ----------------------------------------------------------------------------
def mha_kernel(xq_ref, mem_ref, wq_ref, wk_ref, wv_ref, wo_ref,
               bq_ref, bk_ref, bv_ref, bo_ref, o_ref,
               *, num_heads, L, Mp, M_valid, node_dim):
    D = node_dim
    dh = D // num_heads
    scale = 1.0 / math.sqrt(dh)
    bn = xq_ref.shape[0] // L

    xq = xq_ref[...].astype(jnp.bfloat16)
    mem = mem_ref[...].astype(jnp.bfloat16)

    # Head-batched projections: one wide matmul each (bf16 in, f32 accumulate).
    q = jnp.dot(xq, wq_ref[...], preferred_element_type=jnp.float32) + bq_ref[...]
    kk = jnp.dot(mem, wk_ref[...], preferred_element_type=jnp.float32) + bk_ref[...]
    vv = jnp.dot(mem, wv_ref[...], preferred_element_type=jnp.float32) + bv_ref[...]

    # Tile-aligned leading splits (L and Mp are multiples of 8).
    q3 = q.reshape(bn, L, D)
    k3 = kk.reshape(bn, Mp, D)
    v3 = vv.reshape(bn, Mp, D)

    # Mask for zero-padded memory rows (m >= M_valid), hoisted out of the loop.
    if M_valid < Mp:
        m_idx = jax.lax.broadcasted_iota(jnp.int32, (bn, L, Mp), 2)
        valid = m_idx < M_valid
    else:
        valid = None

    # The MXU-heavy work is the projections above; the per-head score / AV
    # contractions below are small and batched over all nodes in the block.
    head_outs = []
    for h in range(num_heads):
        sl = slice(h * dh, (h + 1) * dh)
        s = jnp.einsum('nld,nmd->nlm', q3[..., sl], k3[..., sl],
                       preferred_element_type=jnp.float32) * scale
        if valid is not None:
            s = jnp.where(valid, s, NEG_INF)
        s = s - jnp.max(s, axis=-1, keepdims=True)
        p = jnp.exp(s)
        p = p * pl.reciprocal(jnp.sum(p, axis=-1, keepdims=True), approx=True)
        oh = jnp.einsum('nlm,nmd->nld', p, v3[..., sl],
                        preferred_element_type=jnp.float32)
        head_outs.append(oh.reshape(bn * L, dh))
    attn = jnp.concatenate(head_outs, axis=-1)                        # [bn*L, D]
    proj = jnp.dot(attn.astype(jnp.bfloat16), wo_ref[...],
                   preferred_element_type=jnp.float32) + bo_ref[...]
    o_ref[...] = proj.astype(o_ref.dtype)


def multihead_attention(xq, mem, params, *, num_heads, L, Mp, M_valid,
                        node_dim, node_block):
    NpL, D = xq.shape
    Np = NpL // L
    grid = (Np // node_block,)
    return pl.pallas_call(
        partial(mha_kernel, num_heads=num_heads, L=L, Mp=Mp, M_valid=M_valid,
                node_dim=node_dim),
        out_shape=jax.ShapeDtypeStruct((Np * L, D), jnp.bfloat16),
        grid=grid,
        in_specs=[
            pl.BlockSpec((node_block * L, D), lambda i: (i, 0)),
            pl.BlockSpec((node_block * Mp, D), lambda i: (i, 0)),
            _full_spec((D, D)), _full_spec((D, D)),
            _full_spec((D, D)), _full_spec((D, D)),
            _full_spec((1, D)), _full_spec((1, D)),
            _full_spec((1, D)), _full_spec((1, D)),
        ],
        out_specs=pl.BlockSpec((node_block * L, D), lambda i: (i, 0)),
        compiler_params=pltpu.CompilerParams(
            dimension_semantics=("parallel",)),      # node blocks independent
    )(xq, mem,
      params["Wq"].astype(jnp.bfloat16), params["Wk"].astype(jnp.bfloat16),
      params["Wv"].astype(jnp.bfloat16), params["Wo"].astype(jnp.bfloat16),
      params["bq"], params["bk"], params["bv"], params["bo"])


# ----------------------------------------------------------------------------
# Kernel 2: dense GATConv (heads=4, concat=True, negative_slope=0.2,
# add_self_loops=True, eval mode).  Grid = K-reduction blocks of W_gat.
# ----------------------------------------------------------------------------
def gat_kernel(att_ref, wgat_ref, adj_ref, asrc_ref, adst_ref, bgat_ref,
               o_ref, acc_ref, *, gat_heads, node_dim, neg_slope):
    kstep = pl.program_id(0)

    @pl.when(kstep == 0)
    def _init():
        acc_ref[...] = jnp.zeros_like(acc_ref)

    # K-tiled feature transform: acc += att_flat[:, k_blk] @ W_gat[k_blk, :]
    acc_ref[...] += jnp.dot(att_ref[...], wgat_ref[...],
                            preferred_element_type=jnp.float32)

    @pl.when(kstep == pl.num_programs(0) - 1)
    def _finalize():
        D = node_dim
        h_feat = acc_ref[...]                        # [Np, H*D]  f32
        adj = adj_ref[...]                           # [Np, Np]
        # Per-head attention logits for all heads via two block-diag matmuls.
        alpha_dst = jnp.dot(h_feat, adst_ref[...],
                            preferred_element_type=jnp.float32)         # [Np, H]
        alpha_src_t = jax.lax.dot_general(
            asrc_ref[...], h_feat, (((1,), (1,)), ((), ())),
            preferred_element_type=jnp.float32)                         # [H, Np]
        outs = []
        for hh in range(gat_heads):
            e = alpha_dst[:, hh:hh + 1] + alpha_src_t[hh:hh + 1, :]     # e[i, j]
            e = jnp.where(e > 0, e, neg_slope * e)                      # leaky relu
            e = jnp.where(adj > 0, e, NEG_INF)                          # non-edges
            e = e - jnp.max(e, axis=-1, keepdims=True)
            p = jnp.exp(e)
            p = p * pl.reciprocal(jnp.sum(p, axis=-1, keepdims=True), approx=True)
            outs.append(jnp.dot(p, h_feat[:, hh * D:(hh + 1) * D],
                                preferred_element_type=jnp.float32))
        o_ref[...] = jnp.concatenate(outs, axis=-1) + bgat_ref[...]


def gat_conv(att_flat, wgat, adj, asrc_hmat, adst_mat, bgat, *,
             gat_heads, node_dim, k_block):
    Np, K = att_flat.shape
    HD = gat_heads * node_dim
    nk = K // k_block
    return pl.pallas_call(
        partial(gat_kernel, gat_heads=gat_heads, node_dim=node_dim,
                neg_slope=0.2),
        out_shape=jax.ShapeDtypeStruct((Np, HD), jnp.float32),
        grid=(nk,),
        in_specs=[
            pl.BlockSpec((Np, k_block), lambda k: (0, k)),     # activation slab
            pl.BlockSpec((k_block, HD), lambda k: (k, 0)),     # W_gat slab
            _full_spec((Np, Np)),
            _full_spec((gat_heads, HD)),
            _full_spec((HD, gat_heads)),
            _full_spec((1, HD)),
        ],
        out_specs=_full_spec((Np, HD)),
        scratch_shapes=[pltpu.VMEM((Np, HD), jnp.float32)],
        compiler_params=pltpu.CompilerParams(
            dimension_semantics=("arbitrary",)),               # reduction axis
    )(att_flat, wgat, adj, asrc_hmat, adst_mat, bgat)


# ----------------------------------------------------------------------------
# Parameters, host-side glue (expand_to_node_batch, adjacency), full forward
# ----------------------------------------------------------------------------
def init_params(key, D, L=16, heads=4):
    ks = jax.random.split(key, 12)
    s = 1.0 / math.sqrt(D)
    sg = 1.0 / math.sqrt(L * D)
    return dict(
        Wq=jax.random.uniform(ks[0], (D, D), jnp.float32, -s, s),
        Wk=jax.random.uniform(ks[1], (D, D), jnp.float32, -s, s),
        Wv=jax.random.uniform(ks[2], (D, D), jnp.float32, -s, s),
        Wo=jax.random.uniform(ks[3], (D, D), jnp.float32, -s, s),
        bq=jax.random.uniform(ks[4], (1, D), jnp.float32, -s, s),
        bk=jax.random.uniform(ks[5], (1, D), jnp.float32, -s, s),
        bv=jax.random.uniform(ks[6], (1, D), jnp.float32, -s, s),
        bo=jax.random.uniform(ks[7], (1, D), jnp.float32, -s, s),
        W_gat=jax.random.uniform(ks[8], (L * D, heads * D), jnp.float32, -sg, sg),
        a_src=jax.random.normal(ks[9], (heads, D), jnp.float32) * 0.1,
        a_dst=jax.random.normal(ks[10], (heads, D), jnp.float32) * 0.1,
        b_gat=jax.random.normal(ks[11], (1, heads * D), jnp.float32) * 0.01,
    )


def expand_to_node_batch(node_batch_np, c):
    # Host-side replication of the Python bookkeeping in the PyTorch module.
    uniq = list(dict.fromkeys(node_batch_np.tolist()))
    batch_len = [int((node_batch_np == b).sum()) for b in uniq]
    m = jnp.concatenate(
        [jnp.broadcast_to(c[i], (batch_len[i],) + c.shape[1:])
         for i in range(len(uniq))], axis=0)
    return m, len(uniq), batch_len


def build_adj(edge_index_np, Np):
    adj = np.zeros((Np, Np), np.float32)
    adj[edge_index_np[1], edge_index_np[0]] = 1.0    # message j -> i
    adj[np.arange(Np), np.arange(Np)] = 1.0          # add_self_loops (all rows)
    return jnp.asarray(adj)


def gatnet_forward(params, x, edge_index_np, edge_attr, c, node_batch_np,
                   node_dim, heads=4, L=16, gat_k_block=None,
                   mha_node_block=None):
    del edge_attr                                    # unused by the reference forward
    D = node_dim
    HD = heads * D
    K = L * D

    m, batch_size, batch_list = expand_to_node_batch(node_batch_np, c)  # [N, M, D]
    N, M, _ = m.shape

    # Pad node / memory axes to sublane multiples (8); padding is masked.
    Np = _round_up(N, 8)
    Mp = _round_up(M, 8)
    x3 = jnp.pad(x.reshape(N, L, D), ((0, Np - N), (0, 0), (0, 0)))
    xq = x3.reshape(Np * L, D)                                           # [Np*L, D]
    mem = jnp.pad(m, ((0, Np - N), (0, Mp - M), (0, 0))).reshape(Np * Mp, D)
    adj = build_adj(edge_index_np, Np)

    if mha_node_block is None:
        mha_node_block = Np if Np <= 32 else 32
    while Np % mha_node_block:
        mha_node_block -= 1

    att = multihead_attention(
        xq, mem, params, num_heads=heads, L=L, Mp=Mp, M_valid=M,
        node_dim=D, node_block=mha_node_block)                           # [Np*L, D] bf16

    # Contiguous row-major flatten, same order as torch transpose+reshape.
    att_flat = att.reshape(Np, K)

    # Block-diagonal per-head attention vectors -> one matmul per side.
    eye = jnp.eye(heads, dtype=jnp.float32)
    asrc_hmat = (eye[:, :, None] * params["a_src"][None, :, :]).reshape(heads, HD)
    adst_mat = (eye[:, :, None] * params["a_dst"][None, :, :]).reshape(heads, HD).T

    if gat_k_block is None:
        gat_k_block = _choose_k_block(K)
    assert K % gat_k_block == 0

    out_p = gat_conv(att_flat, params["W_gat"].astype(jnp.bfloat16), adj,
                     asrc_hmat, adst_mat, params["b_gat"],
                     gat_heads=heads, node_dim=D, k_block=gat_k_block)

    return out_p[:N], batch_size, batch_list


if __name__ == "__main__":
    D = 32          # node_dim (768 in the original docstring; small demo here)
    L = 16          # fixed by the module (reshape ... 16 * node_dim)
    M = 5           # memory sequence length of c
    heads = 4

    node_batch = np.array([0, 0, 0, 1, 1, 1, 1], np.int32)   # 2 graphs, 7 nodes
    N = node_batch.shape[0]

    key = jax.random.PRNGKey(0)
    kx, kc, kp = jax.random.split(key, 3)
    x = jax.random.normal(kx, (N, L * D), jnp.float32)
    c = jax.random.normal(kc, (2, M, D), jnp.float32)
    edge_index = np.array(
        [[0, 1, 1, 2, 3, 4, 4, 5, 6, 3],
         [1, 0, 2, 1, 4, 3, 5, 6, 3, 6]], np.int32)
    edge_attr = jnp.ones((edge_index.shape[1], 4), jnp.float32)  # unused

    params = init_params(kp, D, L=L, heads=heads)

    out, batch_size, batch_list = gatnet_forward(
        params, x, edge_index, edge_attr, c, node_batch, node_dim=D,
        heads=heads, L=L, gat_k_block=256)   # 256 -> 2-step reduction grid
    out = jax.block_until_ready(out)
    assert out.shape == (N, heads * D), out.shape
    assert batch_size == 2 and batch_list == [3, 4]
    assert bool(jnp.all(jnp.isfinite(out)))
    print("KERNEL_OK")
</pallas_src>

<mosaic_0001>
module attributes {stable_mosaic.version = 11 : i64} {
  func.func @mha_kernel(%arg0: i32, %arg1: memref<128x32xf32, #tpu.memory_space<vmem>>, %arg2: memref<64x32xf32, #tpu.memory_space<vmem>>, %arg3: memref<32x32xbf16, #tpu.memory_space<vmem>>, %arg4: memref<32x32xbf16, #tpu.memory_space<vmem>>, %arg5: memref<32x32xbf16, #tpu.memory_space<vmem>>, %arg6: memref<32x32xbf16, #tpu.memory_space<vmem>>, %arg7: memref<1x32xf32, #tpu.memory_space<vmem>>, %arg8: memref<1x32xf32, #tpu.memory_space<vmem>>, %arg9: memref<1x32xf32, #tpu.memory_space<vmem>>, %arg10: memref<1x32xf32, #tpu.memory_space<vmem>>, %arg11: memref<128x32xbf16, #tpu.memory_space<vmem>>) attributes {dimension_semantics = [#tpu.dimension_semantics<parallel>], iteration_bounds = array<i64: 1>, scalar_prefetch = 0 : i64, scratch_operands = 0 : i64, tpu.core_type = #tpu.core_type<tc>, window_params = [{transform_indices = @transform_0, window_bounds = array<i64: 128, 32>}, {transform_indices = @transform_1, window_bounds = array<i64: 64, 32>}, {pipeline_mode = #tpu.pipeline_mode<synchronous>, transform_indices = @transform_2, window_bounds = array<i64: 32, 32>}, {pipeline_mode = #tpu.pipeline_mode<synchronous>, transform_indices = @transform_3, window_bounds = array<i64: 32, 32>}, {pipeline_mode = #tpu.pipeline_mode<synchronous>, transform_indices = @transform_4, window_bounds = array<i64: 32, 32>}, {pipeline_mode = #tpu.pipeline_mode<synchronous>, transform_indices = @transform_5, window_bounds = array<i64: 32, 32>}, {pipeline_mode = #tpu.pipeline_mode<synchronous>, transform_indices = @transform_6, window_bounds = array<i64: 1, 32>}, {pipeline_mode = #tpu.pipeline_mode<synchronous>, transform_indices = @transform_7, window_bounds = array<i64: 1, 32>}, {pipeline_mode = #tpu.pipeline_mode<synchronous>, transform_indices = @transform_8, window_bounds = array<i64: 1, 32>}, {pipeline_mode = #tpu.pipeline_mode<synchronous>, transform_indices = @transform_9, window_bounds = array<i64: 1, 32>}, {transform_indices = @transform_10, window_bounds = array<i64: 128, 32>}]} {
    %c0 = arith.constant 0 : index
    %c0_0 = arith.constant 0 : index
    %0 = vector.load %arg1[%c0, %c0_0] : memref<128x32xf32, #tpu.memory_space<vmem>>, vector<128x32xf32>
    %1 = arith.truncf %0 : vector<128x32xf32> to vector<128x32xbf16>
    %c0_1 = arith.constant 0 : index
    %c0_2 = arith.constant 0 : index
    %2 = vector.load %arg2[%c0_1, %c0_2] : memref<64x32xf32, #tpu.memory_space<vmem>>, vector<64x32xf32>
    %3 = arith.truncf %2 : vector<64x32xf32> to vector<64x32xbf16>
    %c0_3 = arith.constant 0 : index
    %c0_4 = arith.constant 0 : index
    %4 = vector.load %arg3[%c0_3, %c0_4] : memref<32x32xbf16, #tpu.memory_space<vmem>>, vector<32x32xbf16>
    %cst = arith.constant dense<0.000000e+00> : vector<128x32xf32>
    %5 = tpu.matmul %1, %4, %cst {dimension_numbers = #tpu.dot_dimension_numbers<[1], [0], [0], [1], [0, 0, 1, 1], [], []>} : vector<128x32xbf16>, vector<32x32xbf16>, vector<128x32xf32> -> vector<128x32xf32>
    %c0_5 = arith.constant 0 : index
    %c0_6 = arith.constant 0 : index
    %6 = vector.load %arg7[%c0_5, %c0_6] : memref<1x32xf32, #tpu.memory_space<vmem>>, vector<1x32xf32>
    %7 = vector.broadcast %6 : vector<1x32xf32> to vector<128x32xf32>
    %8 = arith.addf %5, %7 : vector<128x32xf32>
    %c0_7 = arith.constant 0 : index
    %c0_8 = arith.constant 0 : index
    %9 = vector.load %arg4[%c0_7, %c0_8] : memref<32x32xbf16, #tpu.memory_space<vmem>>, vector<32x32xbf16>
    %cst_9 = arith.constant dense<0.000000e+00> : vector<64x32xf32>
    %10 = tpu.matmul %3, %9, %cst_9 {dimension_numbers = #tpu.dot_dimension_numbers<[1], [0], [0], [1], [0, 0, 1, 1], [], []>} : vector<64x32xbf16>, vector<32x32xbf16>, vector<64x32xf32> -> vector<64x32xf32>
    %c0_10 = arith.constant 0 : index
    %c0_11 = arith.constant 0 : index
    %11 = vector.load %arg8[%c0_10, %c0_11] : memref<1x32xf32, #tpu.memory_space<vmem>>, vector<1x32xf32>
    %12 = vector.broadcast %11 : vector<1x32xf32> to vector<64x32xf32>
    %13 = arith.addf %10, %12 : vector<64x32xf32>
    %c0_12 = arith.constant 0 : index
    %c0_13 = arith.constant 0 : index
    %14 = vector.load %arg5[%c0_12, %c0_13] : memref<32x32xbf16, #tpu.memory_space<vmem>>, vector<32x32xbf16>
    %cst_14 = arith.constant dense<0.000000e+00> : vector<64x32xf32>
    %15 = tpu.matmul %3, %14, %cst_14 {dimension_numbers = #tpu.dot_dimension_numbers<[1], [0], [0], [1], [0, 0, 1, 1], [], []>} : vector<64x32xbf16>, vector<32x32xbf16>, vector<64x32xf32> -> vector<64x32xf32>
    %c0_15 = arith.constant 0 : index
    %c0_16 = arith.constant 0 : index
    %16 = vector.load %arg9[%c0_15, %c0_16] : memref<1x32xf32, #tpu.memory_space<vmem>>, vector<1x32xf32>
    %17 = vector.broadcast %16 : vector<1x32xf32> to vector<64x32xf32>
    %18 = arith.addf %15, %17 : vector<64x32xf32>
    %19 = vector.shape_cast %8 : vector<128x32xf32> to vector<8x16x32xf32>
    %20 = vector.shape_cast %13 : vector<64x32xf32> to vector<8x8x32xf32>
    %21 = vector.shape_cast %18 : vector<64x32xf32> to vector<8x8x32xf32>
    %22 = tpu.iota {dimensions = array<i32: 2>} : vector<8x16x8xi32>
    %c5_i32 = arith.constant 5 : i32
    %23 = vector.broadcast %c5_i32 : i32 to vector<8x16x8xi32>
    %24 = arith.cmpi slt, %22, %23 : vector<8x16x8xi32>
    %25 = vector.extract_strided_slice %19 {offsets = [0, 0, 0], sizes = [8, 16, 8], strides = [1, 1, 1]} : vector<8x16x32xf32> to vector<8x16x8xf32>
    %26 = vector.extract_strided_slice %20 {offsets = [0, 0, 0], sizes = [8, 8, 8], strides = [1, 1, 1]} : vector<8x8x32xf32> to vector<8x8x8xf32>
    "tpu.trace_start"() <{level = 10 : i32, message = "nld,nmd->nlm"}> : () -> ()
    %cst_17 = arith.constant dense<0.000000e+00> : vector<8x16x8xf32>
    %27 = tpu.matmul %25, %26, %cst_17 {dimension_numbers = #tpu.dot_dimension_numbers<[2], [2], [1], [1], [0, 0, 0, 1, 1, 1], [0], [0]>} : vector<8x16x8xf32>, vector<8x8x8xf32>, vector<8x16x8xf32> -> vector<8x16x8xf32>
    "tpu.trace_stop"() : () -> ()
    %cst_18 = arith.constant 0.353553385 : f32
    %28 = vector.broadcast %cst_18 : f32 to vector<8x16x8xf32>
    %29 = arith.mulf %27, %28 : vector<8x16x8xf32>
    %cst_19 = arith.constant -1.000000e+30 : f32
    %30 = vector.broadcast %cst_19 : f32 to vector<8x16x8xf32>
    %31 = arith.select %24, %29, %30 : vector<8x16x8xi1>, vector<8x16x8xf32>
    %cst_20 = arith.constant dense<0xFF800000> : vector<8x16xf32>
    %32 = vector.multi_reduction <maximumf>, %31, %cst_20 [2] : vector<8x16x8xf32> to vector<8x16xf32>
    %33 = vector.shape_cast %32 : vector<8x16xf32> to vector<8x16x1xf32>
    %34 = vector.broadcast %33 : vector<8x16x1xf32> to vector<8x16x8xf32>
    %35 = arith.subf %31, %34 : vector<8x16x8xf32>
    %36 = math.exp %35 : vector<8x16x8xf32>
    %cst_21 = arith.constant dense<0.000000e+00> : vector<8x16xf32>
    %37 = vector.multi_reduction <add>, %36, %cst_21 [2] : vector<8x16x8xf32> to vector<8x16xf32>
    %38 = vector.shape_cast %37 : vector<8x16xf32> to vector<8x16x1xf32>
    %39 = tpu.reciprocal %38 {approx = true} : vector<8x16x1xf32> -> vector<8x16x1xf32>
    %40 = vector.broadcast %39 : vector<8x16x1xf32> to vector<8x16x8xf32>
    %41 = arith.mulf %36, %40 : vector<8x16x8xf32>
    %42 = vector.extract_strided_slice %21 {offsets = [0, 0, 0], sizes = [8, 8, 8], strides = [1, 1, 1]} : vector<8x8x32xf32> to vector<8x8x8xf32>
    "tpu.trace_start"() <{level = 10 : i32, message = "nlm,nmd->nld"}> : () -> ()
    %cst_22 = arith.constant dense<0.000000e+00> : vector<8x16x8xf32>
    %43 = tpu.matmul %41, %42, %cst_22 {dimension_numbers = #tpu.dot_dimension_numbers<[2], [1], [1], [2], [0, 0, 0, 1, 1, 2], [0], [0]>} : vector<8x16x8xf32>, vector<8x8x8xf32>, vector<8x16x8xf32> -> vector<8x16x8xf32>
    "tpu.trace_stop"() : () -> ()
    %44 = vector.shape_cast %43 : vector<8x16x8xf32> to vector<128x8xf32>
    %45 = vector.extract_strided_slice %19 {offsets = [0, 0, 8], sizes = [8, 16, 8], strides = [1, 1, 1]} : vector<8x16x32xf32> to vector<8x16x8xf32>
    %46 = vector.extract_strided_slice %20 {offsets = [0, 0, 8], sizes = [8, 8, 8], strides = [1, 1, 1]} : vector<8x8x32xf32> to vector<8x8x8xf32>
    "tpu.trace_start"() <{level = 10 : i32, message = "nld,nmd->nlm"}> : () -> ()
    %cst_23 = arith.constant dense<0.000000e+00> : vector<8x16x8xf32>
    %47 = tpu.matmul %45, %46, %cst_23 {dimension_numbers = #tpu.dot_dimension_numbers<[2], [2], [1], [1], [0, 0, 0, 1, 1, 1], [0], [0]>} : vector<8x16x8xf32>, vector<8x8x8xf32>, vector<8x16x8xf32> -> vector<8x16x8xf32>
    "tpu.trace_stop"() : () -> ()
    %cst_24 = arith.constant 0.353553385 : f32
    %48 = vector.broadcast %cst_24 : f32 to vector<8x16x8xf32>
    %49 = arith.mulf %47, %48 : vector<8x16x8xf32>
    %cst_25 = arith.constant -1.000000e+30 : f32
    %50 = vector.broadcast %cst_25 : f32 to vector<8x16x8xf32>
    %51 = arith.select %24, %49, %50 : vector<8x16x8xi1>, vector<8x16x8xf32>
    %cst_26 = arith.constant dense<0xFF800000> : vector<8x16xf32>
    %52 = vector.multi_reduction <maximumf>, %51, %cst_26 [2] : vector<8x16x8xf32> to vector<8x16xf32>
    %53 = vector.shape_cast %52 : vector<8x16xf32> to vector<8x16x1xf32>
    %54 = vector.broadcast %53 : vector<8x16x1xf32> to vector<8x16x8xf32>
    %55 = arith.subf %51, %54 : vector<8x16x8xf32>
    %56 = math.exp %55 : vector<8x16x8xf32>
    %cst_27 = arith.constant dense<0.000000e+00> : vector<8x16xf32>
    %57 = vector.multi_reduction <add>, %56, %cst_27 [2] : vector<8x16x8xf32> to vector<8x16xf32>
    %58 = vector.shape_cast %57 : vector<8x16xf32> to vector<8x16x1xf32>
    %59 = tpu.reciprocal %58 {approx = true} : vector<8x16x1xf32> -> vector<8x16x1xf32>
    %60 = vector.broadcast %59 : vector<8x16x1xf32> to vector<8x16x8xf32>
    %61 = arith.mulf %56, %60 : vector<8x16x8xf32>
    %62 = vector.extract_strided_slice %21 {offsets = [0, 0, 8], sizes = [8, 8, 8], strides = [1, 1, 1]} : vector<8x8x32xf32> to vector<8x8x8xf32>
    "tpu.trace_start"() <{level = 10 : i32, message = "nlm,nmd->nld"}> : () -> ()
    %cst_28 = arith.constant dense<0.000000e+00> : vector<8x16x8xf32>
    %63 = tpu.matmul %61, %62, %cst_28 {dimension_numbers = #tpu.dot_dimension_numbers<[2], [1], [1], [2], [0, 0, 0, 1, 1, 2], [0], [0]>} : vector<8x16x8xf32>, vector<8x8x8xf32>, vector<8x16x8xf32> -> vector<8x16x8xf32>
    "tpu.trace_stop"() : () -> ()
    %64 = vector.shape_cast %63 : vector<8x16x8xf32> to vector<128x8xf32>
    %65 = vector.extract_strided_slice %19 {offsets = [0, 0, 16], sizes = [8, 16, 8], strides = [1, 1, 1]} : vector<8x16x32xf32> to vector<8x16x8xf32>
    %66 = vector.extract_strided_slice %20 {offsets = [0, 0, 16], sizes = [8, 8, 8], strides = [1, 1, 1]} : vector<8x8x32xf32> to vector<8x8x8xf32>
    "tpu.trace_start"() <{level = 10 : i32, message = "nld,nmd->nlm"}> : () -> ()
    %cst_29 = arith.constant dense<0.000000e+00> : vector<8x16x8xf32>
    %67 = tpu.matmul %65, %66, %cst_29 {dimension_numbers = #tpu.dot_dimension_numbers<[2], [2], [1], [1], [0, 0, 0, 1, 1, 1], [0], [0]>} : vector<8x16x8xf32>, vector<8x8x8xf32>, vector<8x16x8xf32> -> vector<8x16x8xf32>
    "tpu.trace_stop"() : () -> ()
    %cst_30 = arith.constant 0.353553385 : f32
    %68 = vector.broadcast %cst_30 : f32 to vector<8x16x8xf32>
    %69 = arith.mulf %67, %68 : vector<8x16x8xf32>
    %cst_31 = arith.constant -1.000000e+30 : f32
    %70 = vector.broadcast %cst_31 : f32 to vector<8x16x8xf32>
    %71 = arith.select %24, %69, %70 : vector<8x16x8xi1>, vector<8x16x8xf32>
    %cst_32 = arith.constant dense<0xFF800000> : vector<8x16xf32>
    %72 = vector.multi_reduction <maximumf>, %71, %cst_32 [2] : vector<8x16x8xf32> to vector<8x16xf32>
    %73 = vector.shape_cast %72 : vector<8x16xf32> to vector<8x16x1xf32>
    %74 = vector.broadcast %73 : vector<8x16x1xf32> to vector<8x16x8xf32>
    %75 = arith.subf %71, %74 : vector<8x16x8xf32>
    %76 = math.exp %75 : vector<8x16x8xf32>
    %cst_33 = arith.constant dense<0.000000e+00> : vector<8x16xf32>
    %77 = vector.multi_reduction <add>, %76, %cst_33 [2] : vector<8x16x8xf32> to vector<8x16xf32>
    %78 = vector.shape_cast %77 : vector<8x16xf32> to vector<8x16x1xf32>
    %79 = tpu.reciprocal %78 {approx = true} : vector<8x16x1xf32> -> vector<8x16x1xf32>
    %80 = vector.broadcast %79 : vector<8x16x1xf32> to vector<8x16x8xf32>
    %81 = arith.mulf %76, %80 : vector<8x16x8xf32>
    %82 = vector.extract_strided_slice %21 {offsets = [0, 0, 16], sizes = [8, 8, 8], strides = [1, 1, 1]} : vector<8x8x32xf32> to vector<8x8x8xf32>
    "tpu.trace_start"() <{level = 10 : i32, message = "nlm,nmd->nld"}> : () -> ()
    %cst_34 = arith.constant dense<0.000000e+00> : vector<8x16x8xf32>
    %83 = tpu.matmul %81, %82, %cst_34 {dimension_numbers = #tpu.dot_dimension_numbers<[2], [1], [1], [2], [0, 0, 0, 1, 1, 2], [0], [0]>} : vector<8x16x8xf32>, vector<8x8x8xf32>, vector<8x16x8xf32> -> vector<8x16x8xf32>
    "tpu.trace_stop"() : () -> ()
    %84 = vector.shape_cast %83 : vector<8x16x8xf32> to vector<128x8xf32>
    %85 = vector.extract_strided_slice %19 {offsets = [0, 0, 24], sizes = [8, 16, 8], strides = [1, 1, 1]} : vector<8x16x32xf32> to vector<8x16x8xf32>
    %86 = vector.extract_strided_slice %20 {offsets = [0, 0, 24], sizes = [8, 8, 8], strides = [1, 1, 1]} : vector<8x8x32xf32> to vector<8x8x8xf32>
    "tpu.trace_start"() <{level = 10 : i32, message = "nld,nmd->nlm"}> : () -> ()
    %cst_35 = arith.constant dense<0.000000e+00> : vector<8x16x8xf32>
    %87 = tpu.matmul %85, %86, %cst_35 {dimension_numbers = #tpu.dot_dimension_numbers<[2], [2], [1], [1], [0, 0, 0, 1, 1, 1], [0], [0]>} : vector<8x16x8xf32>, vector<8x8x8xf32>, vector<8x16x8xf32> -> vector<8x16x8xf32>
    "tpu.trace_stop"() : () -> ()
    %cst_36 = arith.constant 0.353553385 : f32
    %88 = vector.broadcast %cst_36 : f32 to vector<8x16x8xf32>
    %89 = arith.mulf %87, %88 : vector<8x16x8xf32>
    %cst_37 = arith.constant -1.000000e+30 : f32
    %90 = vector.broadcast %cst_37 : f32 to vector<8x16x8xf32>
    %91 = arith.select %24, %89, %90 : vector<8x16x8xi1>, vector<8x16x8xf32>
    %cst_38 = arith.constant dense<0xFF800000> : vector<8x16xf32>
    %92 = vector.multi_reduction <maximumf>, %91, %cst_38 [2] : vector<8x16x8xf32> to vector<8x16xf32>
    %93 = vector.shape_cast %92 : vector<8x16xf32> to vector<8x16x1xf32>
    %94 = vector.broadcast %93 : vector<8x16x1xf32> to vector<8x16x8xf32>
    %95 = arith.subf %91, %94 : vector<8x16x8xf32>
    %96 = math.exp %95 : vector<8x16x8xf32>
    %cst_39 = arith.constant dense<0.000000e+00> : vector<8x16xf32>
    %97 = vector.multi_reduction <add>, %96, %cst_39 [2] : vector<8x16x8xf32> to vector<8x16xf32>
    %98 = vector.shape_cast %97 : vector<8x16xf32> to vector<8x16x1xf32>
    %99 = tpu.reciprocal %98 {approx = true} : vector<8x16x1xf32> -> vector<8x16x1xf32>
    %100 = vector.broadcast %99 : vector<8x16x1xf32> to vector<8x16x8xf32>
    %101 = arith.mulf %96, %100 : vector<8x16x8xf32>
    %102 = vector.extract_strided_slice %21 {offsets = [0, 0, 24], sizes = [8, 8, 8], strides = [1, 1, 1]} : vector<8x8x32xf32> to vector<8x8x8xf32>
    "tpu.trace_start"() <{level = 10 : i32, message = "nlm,nmd->nld"}> : () -> ()
    %cst_40 = arith.constant dense<0.000000e+00> : vector<8x16x8xf32>
    %103 = tpu.matmul %101, %102, %cst_40 {dimension_numbers = #tpu.dot_dimension_numbers<[2], [1], [1], [2], [0, 0, 0, 1, 1, 2], [0], [0]>} : vector<8x16x8xf32>, vector<8x8x8xf32>, vector<8x16x8xf32> -> vector<8x16x8xf32>
    "tpu.trace_stop"() : () -> ()
    %104 = vector.shape_cast %103 : vector<8x16x8xf32> to vector<128x8xf32>
    %105 = tpu.concatenate %44, %64, %84, %104 in 1 : vector<128x8xf32>, vector<128x8xf32>, vector<128x8xf32>, vector<128x8xf32> -> vector<128x32xf32>
    %106 = arith.truncf %105 : vector<128x32xf32> to vector<128x32xbf16>
    %c0_41 = arith.constant 0 : index
    %c0_42 = arith.constant 0 : index
    %107 = vector.load %arg6[%c0_41, %c0_42] : memref<32x32xbf16, #tpu.memory_space<vmem>>, vector<32x32xbf16>
    %cst_43 = arith.constant dense<0.000000e+00> : vector<128x32xf32>
    %108 = tpu.matmul %106, %107, %cst_43 {dimension_numbers = #tpu.dot_dimension_numbers<[1], [0], [0], [1], [0, 0, 1, 1], [], []>} : vector<128x32xbf16>, vector<32x32xbf16>, vector<128x32xf32> -> vector<128x32xf32>
    %c0_44 = arith.constant 0 : index
    %c0_45 = arith.constant 0 : index
    %109 = vector.load %arg10[%c0_44, %c0_45] : memref<1x32xf32, #tpu.memory_space<vmem>>, vector<1x32xf32>
    %110 = vector.broadcast %109 : vector<1x32xf32> to vector<128x32xf32>
    %111 = arith.addf %108, %110 : vector<128x32xf32>
    %112 = arith.truncf %111 : vector<128x32xf32> to vector<128x32xbf16>
    %c0_46 = arith.constant 0 : index
    %c0_47 = arith.constant 0 : index
    %113 = vector.load %arg11[%c0_46, %c0_47] : memref<128x32xbf16, #tpu.memory_space<vmem>>, vector<128x32xbf16>
    tpu.vector_store %arg11[%c0_46, %c0_47], %112 {strides = array<i32>} : memref<128x32xbf16, #tpu.memory_space<vmem>>, vector<128x32xbf16>,
    return
  }
  func.func @transform_0(%arg0: i32) -> (i32, i32) {
    %c0_i32 = arith.constant 0 : i32
    %c0_i32_0 = arith.constant 0 : i32
    return %arg0, %c0_i32 : i32, i32
  }
  func.func @transform_1(%arg0: i32) -> (i32, i32) {
    %c0_i32 = arith.constant 0 : i32
    %c0_i32_0 = arith.constant 0 : i32
    return %arg0, %c0_i32 : i32, i32
  }
  func.func @transform_2(%arg0: i32) -> (i32, i32) {
    %c0_i32 = arith.constant 0 : i32
    %c0_i32_0 = arith.constant 0 : i32
    %c0_i32_1 = arith.constant 0 : i32
    return %c0_i32, %c0_i32_0 : i32, i32
  }
  func.func @transform_3(%arg0: i32) -> (i32, i32) {
    %c0_i32 = arith.constant 0 : i32
    %c0_i32_0 = arith.constant 0 : i32
    %c0_i32_1 = arith.constant 0 : i32
    return %c0_i32, %c0_i32_0 : i32, i32
  }
  func.func @transform_4(%arg0: i32) -> (i32, i32) {
    %c0_i32 = arith.constant 0 : i32
    %c0_i32_0 = arith.constant 0 : i32
    %c0_i32_1 = arith.constant 0 : i32
    return %c0_i32, %c0_i32_0 : i32, i32
  }
  func.func @transform_5(%arg0: i32) -> (i32, i32) {
    %c0_i32 = arith.constant 0 : i32
    %c0_i32_0 = arith.constant 0 : i32
    %c0_i32_1 = arith.constant 0 : i32
    return %c0_i32, %c0_i32_0 : i32, i32
  }
  func.func @transform_6(%arg0: i32) -> (i32, i32) {
    %c0_i32 = arith.constant 0 : i32
    %c0_i32_0 = arith.constant 0 : i32
    %c0_i32_1 = arith.constant 0 : i32
    return %c0_i32, %c0_i32_0 : i32, i32
  }
  func.func @transform_7(%arg0: i32) -> (i32, i32) {
    %c0_i32 = arith.constant 0 : i32
    %c0_i32_0 = arith.constant 0 : i32
    %c0_i32_1 = arith.constant 0 : i32
    return %c0_i32, %c0_i32_0 : i32, i32
  }
  func.func @transform_8(%arg0: i32) -> (i32, i32) {
    %c0_i32 = arith.constant 0 : i32
    %c0_i32_0 = arith.constant 0 : i32
    %c0_i32_1 = arith.constant 0 : i32
    return %c0_i32, %c0_i32_0 : i32, i32
  }
  func.func @transform_9(%arg0: i32) -> (i32, i32) {
    %c0_i32 = arith.constant 0 : i32
    %c0_i32_0 = arith.constant 0 : i32
    %c0_i32_1 = arith.constant 0 : i32
    return %c0_i32, %c0_i32_0 : i32, i32
  }
  func.func @transform_10(%arg0: i32) -> (i32, i32) {
    %c0_i32 = arith.constant 0 : i32
    %c0_i32_0 = arith.constant 0 : i32
    return %arg0, %c0_i32 : i32, i32
  }
}

</mosaic_0001>

<bundles_post_ra>
// kernel: tpu_custom_call.1
= control target key start
LH: loop header
LB: loop body
LE: loop exit
PB: predicated region body
PF: predicated region fallthrough
CT: control target
= control target key end

     0   :  { %vm95_vm0 = vcmask 261120   ;;  %vm408_vm1 = vcmask 64512   ;;  %s8384_s30 = smov 104   ;;  %s8385_s11 = smov 8   ;;  %vm6881_vm3 = vcmask 130048   ;;  %vm6898_vm4 = vcmask 195584   ;;  %s10398_s2 = inlined_call_operand.vmem [shape: bf16[32,32], index: 2, kind: input, shape index: {}]   ;;  %s10399_s0 = inlined_call_operand.vmem [shape: f32[128,32], index: 0, kind: input, shape index: {}]   ;;  %s10400_s3 = inlined_call_operand.vmem [shape: bf16[32,32], index: 3, kind: input, shape index: {}]   ;;  %s10401_s1 = inlined_call_operand.vmem [shape: f32[64,32], index: 1, kind: input, shape index: {}]   ;;  %s10402_s4 = inlined_call_operand.vmem [shape: bf16[32,32], index: 4, kind: input, shape index: {}]   ;;  %s10403_s6 = inlined_call_operand.vmem [shape: f32[1,32], index: 6, kind: input, shape index: {}]   ;;  %s10404_s7 = inlined_call_operand.vmem [shape: f32[1,32], index: 7, kind: input, shape index: {}]   ;;  %s10405_s8 = inlined_call_operand.vmem [shape: f32[1,32], index: 8, kind: input, shape index: {}]   ;;  %s10406_s5 = inlined_call_operand.vmem [shape: bf16[32,32], index: 5, kind: input, shape index: {}]   ;;  %s10407_s9 = inlined_call_operand.vmem [shape: f32[1,32], index: 9, kind: input, shape index: {}]   ;;  %s10408_s10 = inlined_call_operand.vmem [shape: bf16[128,32], index: 10, kind: output, shape index: {}]  }
   0x1   :  { %v8118_v0 = vld [vmem:[%s10398_s2] sm:$0xff]   ;;  %v8119_v1 = vld [vmem:[%s10398_s2 + $0x8] sm:$0xff]   ;;  %v46_v4 = vld [vmem:[%s10399_s0 + $0x50] sm:$0xff]  ;;  %s8386_s12 = smov 16   ;;  %s8387_s16 = smov 24   ;;  %vm7131_vm5 = vcmask 257024  }
   0x2   :  { %7988 = vmatprep.subr.bf16.mxu1 %v8118_v0  ;;  %7604 = vmatprep.subr.bf16.mxu0 %v8118_v0  ;;  %v44_v2 = vld [vmem:[%s10399_s0 + $0x40] sm:$0xff]  ;;  %v45_v3 = vld [vmem:[%s10399_s0 + $0x48] sm:$0xff]  ;;  %v47_v6 = vld [vmem:[%s10399_s0 + $0x58] sm:$0xff] }
   0x3   :  { %7990 = vmatpush3.bf16.msra.mxu1 %v8118_v0  ;;  %v56_v5 = vpack.c.bf16 %v45_v3, %v44_v2  ;;  %7605 = vmatpush3.bf16.msra.mxu0 %v8118_v0  ;;  %v36_v7 = vld [vmem:[%s10399_s0] sm:$0xff]  ;;  %v37_v8 = vld [vmem:[%s10399_s0 + $0x8] sm:$0xff]  ;;  %v38_v10 = vld [vmem:[%s10399_s0 + $0x10] sm:$0xff]  ;;  %v57_v14 = vpack.c.bf16 %v47_v6, %v46_v4 }
   0x4   :  { %7989 = vmatprep.subr.bf16.mxu1 %v8119_v1  ;;  %7606 = vmatprep.subr.bf16.mxu0 %v8119_v1  ;;  %v52_v9 = vpack.c.bf16 %v37_v8, %v36_v7  ;;  %v39_v11 = vld [vmem:[%s10399_s0 + $0x18] sm:$0xff]  ;;  %v48_v12 = vld [vmem:[%s10399_s0 + $0x60] sm:$0xff]  ;;  %v49_v13 = vld [vmem:[%s10399_s0 + $0x68] sm:$0xff] }
   0x5   :  { %7616 = vmatprep.mubr.msk.bf16.mxu1 %vm95_vm0, %v56_v5  ;;  %v53_v15 = vpack.c.bf16 %v39_v11, %v38_v10  ;;  %v8120_v16 = vld [vmem:[%s10400_s3] sm:$0xff]   ;;  %v58_v17 = vpack.c.bf16 %v49_v13, %v48_v12  ;;  %v8121_v18 = vld [vmem:[%s10400_s3 + $0x8] sm:$0xff]   ;;  %v50_v21 = vld [vmem:[%s10399_s0 + $0x70] sm:$0xff] }
   0x6   :  { %7608 = vmatprep.mubr.msk.bf16.mxu0 %vm95_vm0, %v52_v9  ;;  %v40_v19 = vld [vmem:[%s10399_s0 + $0x20] sm:$0xff]  ;;  %v41_v20 = vld [vmem:[%s10399_s0 + $0x28] sm:$0xff]  ;;  %v51_v23 = vld [vmem:[%s10399_s0 + $0x78] sm:$0xff] }
   0x7   :  { %7991 = vmatpush3.bf16.msra.mxu1 %v8119_v1  ;;  %7607 = vmatpush3.bf16.msra.mxu0 %v8119_v1  ;;  %v54_v22 = vpack.c.bf16 %v41_v20, %v40_v19  ;;  %v42_v24 = vld [vmem:[%s10399_s0 + $0x30] sm:$0xff]  ;;  %v43_v25 = vld [vmem:[%s10399_s0 + $0x38] sm:$0xff]  ;;  %v60_v26 = vld [vmem:[%s10401_s1] sm:$0xff]  ;;  %v59_v28 = vpack.c.bf16 %v51_v23, %v50_v21 }
   0x8   :  { %7624 = vmatprep.subr.bf16.mxu1 %v8120_v16  ;;  %v61_v27 = vld [vmem:[%s10401_s1 + $0x8] sm:$0xff]  ;;  %v55_v29 = vpack.c.bf16 %v43_v25, %v42_v24  ;;  %v62_v31 = vld [vmem:[%s10401_s1 + $0x10] sm:$0xff]  ;;  %v63_v32 = vld [vmem:[%s10401_s1 + $0x18] sm:$0xff] }
   0x9   :  { %v68_v30 = vpack.c.bf16 %v61_v27, %v60_v26  ;;  %v64_v33 = vld [vmem:[%s10401_s1 + $0x20] sm:$0xff]  ;;  %v65_v34 = vld [vmem:[%s10401_s1 + $0x28] sm:$0xff]  ;;  %v69_v35 = vpack.c.bf16 %v63_v32, %v62_v31  ;;  %v66_v37 = vld [vmem:[%s10401_s1 + $0x30] sm:$0xff] }
   0xa   :  { %7617 = vmatmul.mubr.msk.bf16.vlgmr.msra.gmra.mrb[0].mxu1 %vm95_vm0, %v57_v14  ;;  %7609 = vmatmul.mubr.msk.bf16.vlgmr.msra.gmra.mrb[0].mxu0 %vm95_vm0, %v53_v15  ;;  %v70_v36 = vpack.c.bf16 %v65_v34, %v64_v33  ;;  %v67_v38 = vld [vmem:[%s10401_s1 + $0x38] sm:$0xff]  ;;  %v8122_v40 = vld [vmem:[%s10402_s4] sm:$0xff]   ;;  %v8123_v41 = vld [vmem:[%s10402_s4 + $0x8] sm:$0xff]   ;;  %s8382_s4 = smov 120  }
   0xb   :  { %7620 = vmatprep.mubr.msk.bf16.mxu1 %vm95_vm0, %v58_v17  ;;  %7625 = vmatpush3.bf16.msra.mxu1 %v8120_v16  ;;  %v71_v39 = vpack.c.bf16 %v67_v38, %v66_v37  ;;  %v8552_v42 = vld [vmem:[%s10403_s6] ss:$0 sm:$0xff] }
   0xc   :  { %7626 = vmatprep.subr.bf16.mxu1 %v8121_v18  ;;  %7612 = vmatprep.mubr.msk.bf16.mxu0 %vm95_vm0, %v54_v22  ;;  %v7163_v63 = vld [vmem:[%s10404_s7] ss:$0 sm:$0xff] }
   0xf   :  { %7627 = vmatpush3.bf16.msra.mxu1 %v8121_v18 }
  0x10   :  { %7636 = vmatprep.subr.bf16.mxu1 %v8122_v40 }
  0x12   :  { %7621 = vmatmul.mubr.msk.bf16.gmra.mrb[4].mxu1 %vm95_vm0, %v59_v28  ;;  %7613 = vmatmul.mubr.msk.bf16.gmra.mrb[4].mxu0 %vm95_vm0, %v55_v29  ;;  %v7170_v28 = vld [vmem:[%s10405_s8] ss:$0 sm:$0xff]  ;;  %s8383_s8 = smov 112  }
  0x13   :  { %7628 = vmatprep.mubr.msk.bf16.mxu1 %vm95_vm0, %v68_v30 }
  0x1a   :  { %7629 = vmatmul.mubr.msk.bf16.vlgmr.msra.gmra.mrb[8].mxu1 %vm95_vm0, %v69_v35 }
  0x1b   :  { %7632 = vmatprep.mubr.msk.bf16.mxu1 %vm95_vm0, %v70_v36  ;;  %7637 = vmatpush3.bf16.msra.mxu1 %v8122_v40 }
  0x1c   :  { %7638 = vmatprep.subr.bf16.mxu1 %v8123_v41 }
  0x1f   :  { %7639 = vmatpush3.bf16.msra.mxu1 %v8123_v41 }
  0x22   :  { %7633 = vmatmul.mubr.msk.bf16.gmra.mrb[12].mxu1 %vm95_vm0, %v71_v39 }
  0x23   :  { %7640 = vmatprep.mubr.msk.bf16.mxu1 %vm95_vm0, %v68_v30 }
  0x2a   :  { %7641 = vmatmul.mubr.msk.bf16.vlgmr.msra.gmra.mrb[16].mxu1 %vm95_vm0, %v69_v35 }
  0x2b   :  { %7644 = vmatprep.mubr.msk.bf16.mxu1 %vm95_vm0, %v70_v36 }
  0x32   :  { %7645 = vmatmul.mubr.msk.bf16.gmra.mrb[20].mxu1 %vm95_vm0, %v71_v39 }
  0xdd   :  { %v8554_v43 = vpop.f32.mrb[0].mxu1  ;;  %v7610_v44 = vpop.f32.mrb[0].mxu0 }
  0xde   :  { %v186_v45 = vpop.f32.mrb[1].mxu1  ;;  %v8557_v46 = vadd.f32 %v7610_v44, %v8552_v42  ;;  %v154_v47 = vpop.f32.mrb[1].mxu0  ;;  %v8652_v19 = vadd.f32 %v8554_v43, %v8552_v42 }
  0xdf   :  { %v8559_v48 = vpop.f32.mrb[2].mxu1  ;;  %v8562_v49 = vadd.f32 %v8552_v42, %v154_v47  ;;  %v7611_v50 = vpop.f32.mrb[2].mxu0  ;;  %v8642_v17 = vadd.f32 %v8552_v42, %v186_v45  ;;  %v405_v45 = vlaneseq }
  0xe0   :  { %10442 = vst [vmem:[#allocation2_spill] sm:$0xff] %v8557_v46  ;;  %v189_v51 = vpop.f32.mrb[3].mxu1  ;;  %v8565_v52 = vadd.f32 %v7611_v50, %v8552_v42  ;;  %2024 = vrot.lane.b32.xlu0 %v8557_v46, %s8382_s4  ;;  %v157_v53 = vpop.f32.mrb[3].mxu0  ;;  %7655 = vmatprep.mubr.msk.f32.mxu1 %vm408_vm1, %v8557_v46  ;;  %v8682_v24 = vadd.f32 %v8559_v48, %v8552_v42 }
  0xe1   :  { %10443 = vst [vmem:[#allocation3_spill] sm:$0xff] %v8562_v49  ;;  %1937 = vrot.lane.b32.xlu1 %v8562_v49, %s8382_s4  ;;  %v8574_v54 = vadd.f32 %v8552_v42, %v157_v53  ;;  %7650 = vmatprep.mubr.msk.f32.mxu0 %vm408_vm1, %v8562_v49  ;;  %v8661_v21 = vadd.f32 %v8552_v42, %v189_v51  ;;  %v8738_v47 = vand.u32 127, %v405_v45 }
  0xe2   :  { %10444 = vst [vmem:[#allocation4_spill] sm:$0xff] %v8565_v52 }
  0xe3   :  { %10453 = vst [vmem:[#allocation13_spill] sm:$0xff] %v8738_v47  ;;  %vm407_vm2 = vcmp.lt.s32.totalorder %v8738_v47, 5 }
  0xe4   :  { %2026 = vrot.lane.b32.xlu0 %v8565_v52, %s8382_s4 }
  0xe5   :  { %v8580_v55 = vpop.f32.mrb[4].mxu1  ;;  %1939 = vrot.lane.b32.xlu1 %v8574_v54, %s8382_s4  ;;  %v7614_v56 = vpop.f32.mrb[4].mxu0 }
  0xe6   :  { %v202_v57 = vpop.f32.mrb[5].mxu1  ;;  %v170_v58 = vpop.f32.mrb[5].mxu0  ;;  %v8624_v11 = vadd.f32 %v7614_v56, %v8552_v42  ;;  %v8690_v25 = vadd.f32 %v8580_v55, %v8552_v42 }
  0xe7   :  { %v8584_v59 = vpop.f32.mrb[6].mxu1  ;;  %v7615_v60 = vpop.f32.mrb[6].mxu0  ;;  %v8606_v8 = vadd.f32 %v8552_v42, %v170_v58  ;;  %v8670_v23 = vadd.f32 %v8552_v42, %v202_v57 }
  0xe8   :  { %v205_v61 = vpop.f32.mrb[7].mxu1  ;;  %v173_v62 = vpop.f32.mrb[7].mxu0  ;;  %10449 = vst [vmem:[#allocation9_spill] sm:$0xff] %v8624_v11  ;;  %v8631_v13 = vadd.f32 %v7615_v60, %v8552_v42  ;;  %v8707_v27 = vadd.f32 %v8584_v59, %v8552_v42 }
  0xe9   :  { %10447 = vst [vmem:[#allocation7_spill] sm:$0xff] %v8606_v8  ;;  %v8621_v10 = vadd.f32 %v8552_v42, %v173_v62  ;;  %v8697_v26 = vadd.f32 %v8552_v42, %v205_v61 }
  0xea   :  { %10450 = vst [vmem:[#allocation10_spill] sm:$0xff] %v8631_v13 }
  0xeb   :  { %10448 = vst [vmem:[#allocation8_spill] sm:$0xff] %v8621_v10 }
  0xed   :  { %v7630_v0 = vpop.f32.mrb[8].mxu1 }
  0xee   :  { %v8589_v1 = vadd.f32 %v7630_v0, %v7163_v63  ;;  %v286_v2 = vpop.f32.mrb[9].mxu1 }
  0xef   :  { %v8591_v3 = vadd.f32 %v7163_v63, %v286_v2  ;;  %v7631_v4 = vpop.f32.mrb[10].mxu1 }
  0xf0   :  { %10445 = vst [vmem:[#allocation5_spill] sm:$0xff] %v8589_v1  ;;  %v289_v5 = vpop.f32.mrb[11].mxu1  ;;  %2115 = vrot.lane.b32.xlu1 %v8589_v1, %s8382_s4  ;;  %v8601_v7 = vadd.f32 %v7631_v4, %v7163_v63 }
  0xf1   :  { %v8595_v6 = vadd.f32 %v7163_v63, %v289_v5  ;;  %7648 = vmatprep.subr.msk.mxu0 %vm408_vm1, %v8591_v3  ;;  %1941 = vrot.lane.b32.xlu0 %v8591_v3, %s8382_s4 }
  0xf2   :  { %10446 = vst [vmem:[#allocation6_spill] sm:$0xff] %v8601_v7  ;;  %7649 = vmatpush3.xpose.msk.msra.mxu0 %vm408_vm1, %v8591_v3 }
  0xf3   :  { %7653 = vmatprep.subr.msk.mxu1 %vm408_vm1, %v8595_v6  ;;  %7658 = vmatprep.subr.msk.mxu0 %vm408_vm1, %v8589_v1 }
  0xf4   :  { %7654 = vmatpush3.xpose.msk.msra.mxu1 %vm408_vm1, %v8595_v6  ;;  %2202 = vrot.lane.b32.xlu1 %v8601_v7, %s8382_s4 }
  0xf5   :  { %v7634_v9 = vpop.f32.mrb[12].mxu1  ;;  %7651 = vmatmul.mubr.msk.f32.vlgmr.msra.gmra.mrb[8].mxu0 %vm408_vm1, %v8574_v54  ;;  %7663 = vmatprep.subr.msk.mxu1 %vm408_vm1, %v8601_v7 }
  0xf6   :  { %v302_v12 = vpop.f32.mrb[13].mxu1  ;;  %7659 = vmatpush3.xpose.msk.msra.mxu0 %vm408_vm1, %v8589_v1  ;;  %7660 = vmatprep.mubr.msk.f32.mxu0 %vm408_vm1, %v8606_v8  ;;  %v8654_v20 = vadd.f32 %v7634_v9, %v7163_v63 }
  0xf7   :  { %v8633_v14 = vadd.f32 %v7163_v63, %v302_v12  ;;  %v7635_v15 = vpop.f32.mrb[14].mxu1  ;;  %7656 = vmatmul.mubr.msk.f32.vlgmr.msra.gmra.mrb[24].mxu1 %vm408_vm1, %v8565_v52 }
  0xf8   :  { %v305_v16 = vpop.f32.mrb[15].mxu1  ;;  %7664 = vmatpush3.xpose.msk.msra.mxu1 %vm408_vm1, %v8601_v7  ;;  %2028 = vrot.lane.b32.xlu1 %v8595_v6, %s8382_s4  ;;  %v8663_v22 = vadd.f32 %v7635_v15, %v7163_v63 }
  0xf9   :  { %10451 = vst [vmem:[#allocation11_spill] sm:$0xff] %v8633_v14  ;;  %v8644_v18 = vadd.f32 %v7163_v63, %v305_v16  ;;  %7661 = vmatmul.mubr.msk.f32.vlgmr.msra.gmra.mrb[10].mxu0 %vm408_vm1, %v8621_v10  ;;  %7668 = vmatprep.subr.msk.mxu0 %vm408_vm1, %v8633_v14 }
  0xfa   :  { %7665 = vmatprep.mubr.msk.f32.mxu1 %vm408_vm1, %v8624_v11  ;;  %7669 = vmatpush3.xpose.msk.msra.mxu0 %vm408_vm1, %v8633_v14 }
  0xfb   :  { %10452 = vst [vmem:[#allocation12_spill] sm:$0xff] %v8644_v18  ;;  %7670 = vmatprep.mubr.msk.f32.mxu0 %vm408_vm1, %v8642_v17  ;;  %7666 = vmatmul.mubr.msk.f32.vlgmr.msra.gmra.mrb[26].mxu1 %vm408_vm1, %v8631_v13 }
  0xfc   :  { %7673 = vmatprep.subr.msk.mxu1 %vm408_vm1, %v8644_v18  ;;  %7675 = vmatprep.mubr.msk.f32.mxu1 %vm408_vm1, %v8652_v19 }
  0xfd   :  { %7674 = vmatpush3.xpose.msk.msra.mxu1 %vm408_vm1, %v8644_v18  ;;  %7671 = vmatmul.mubr.msk.f32.vlgmr.msra.gmra.mrb[12].mxu0 %vm408_vm1, %v8661_v21  ;;  %v7642_v29 = vpop.f32.mrb[16].mxu1 }
  0xfe   :  { %7678 = vmatprep.subr.msk.mxu0 %vm408_vm1, %v8654_v20  ;;  %7680 = vmatprep.mubr.msk.f32.mxu0 %vm408_vm1, %v8670_v23  ;;  %v374_v30 = vpop.f32.mrb[17].mxu1  ;;  %v8716_v31 = vadd.f32 %v7642_v29, %v7170_v28 }
  0xff   :  { %7679 = vmatpush3.xpose.msk.msra.mxu0 %vm408_vm1, %v8654_v20  ;;  %7683 = vmatprep.subr.msk.mxu1 %vm408_vm1, %v8663_v22  ;;  %v8718_v32 = vadd.f32 %v7170_v28, %v374_v30  ;;  %v7643_v33 = vpop.f32.mrb[18].mxu1 }
 0x100   :  { %7676 = vmatmul.mubr.msk.f32.vlgmr.msra.gmra.mrb[28].mxu1 %vm408_vm1, %v8682_v24  ;;  %v377_v34 = vpop.f32.mrb[19].mxu1  ;;  %v8720_v35 = vadd.f32 %v7643_v33, %v7170_v28 }
 0x101   :  { %7684 = vmatpush3.xpose.msk.msra.mxu1 %vm408_vm1, %v8663_v22  ;;  %7685 = vmatprep.mubr.msk.f32.mxu1 %vm408_vm1, %v8690_v25  ;;  %v8722_v36 = vadd.f32 %v7170_v28, %v377_v34 }
 0x102   :  { %7681 = vmatmul.mubr.msk.f32.vlgmr.msra.gmra.mrb[14].mxu0 %vm408_vm1, %v8697_v26  ;;  %7688 = vmatprep.subr.mxu0 %v8718_v32 }
 0x103   :  { %7689 = vmatpush3.msra.mxu0 %v8718_v32  ;;  %7693 = vmatprep.subr.mxu1 %v8722_v36 }
 0x104   :  { %7686 = vmatmul.mubr.msk.f32.vlgmr.msra.gmra.mrb[30].mxu1 %vm408_vm1, %v8707_v27  ;;  %7698 = vmatprep.subr.mxu0 %v8716_v31 }
 0x105   :  { %7694 = vmatpush3.msra.mxu1 %v8722_v36  ;;  %v7646_v37 = vpop.f32.mrb[20].mxu1 }
 0x106   :  { %7703 = vmatprep.subr.mxu1 %v8720_v35  ;;  %v8730_v38 = vadd.f32 %v7646_v37, %v7170_v28  ;;  %v390_v39 = vpop.f32.mrb[21].mxu1 }
 0x107   :  { %v8732_v40 = vadd.f32 %v7170_v28, %v390_v39  ;;  %v7647_v41 = vpop.f32.mrb[22].mxu1 }
 0x108   :  { %v8734_v42 = vadd.f32 %v7647_v41, %v7170_v28  ;;  %v393_v43 = vpop.f32.mrb[23].mxu1 }
 0x109   :  { %v8736_v44 = vadd.f32 %v7170_v28, %v393_v43 }
 0x1c8   :  { %v7652_v48 = vpop.f32.mrb[8].mxu0 }
 0x1c9   :  { %v1082_v50 = vmul.f32 0.35355338, %v7652_v48  ;;  %v484_v51 = vpop.f32.mrb[9].mxu0 }
 0x1ca   :  { %v7657_v53 = vpop.f32.mrb[24].mxu1  ;;  %v1081_v55 = vmul.f32 0.35355338, %v484_v51 }
 0x1cb   :  { %v1084_v56 = vmul.f32 0.35355338, %v7657_v53  ;;  %v8743_v57 = vsel %vm407_vm2, %v1082_v50, -1e+30  ;;  %v568_v58 = vpop.f32.mrb[25].mxu1 }
 0x1cc   :  { %v1116_v59 = vsel %vm408_vm1, %v8743_v57, -inf  ;;  %v1083_v60 = vmul.f32 0.35355338, %v568_v58  ;;  %v7662_v61 = vpop.f32.mrb[10].mxu0  ;;  %v8753_v0 = vsel %vm407_vm2, %v1081_v55, -1e+30 }
 0x1cd   :  { %1117 = vmax.xlane.f32.xlu0 %v1116_v59  ;;  %v8749_v62 = vsel %vm407_vm2, %v1084_v56, -1e+30  ;;  %v652_v63 = vpop.f32.mrb[11].mxu0  ;;  %v1086_v9 = vmul.f32 0.35355338, %v7662_v61  ;;  %v1113_v28 = vsel %vm408_vm1, %v8753_v0, -inf }
 0x1ce   :  { %v1122_v2 = vsel %vm408_vm1, %v8749_v62, -inf  ;;  %v1085_v4 = vmul.f32 0.35355338, %v652_v63  ;;  %v7667_v5 = vpop.f32.mrb[26].mxu1  ;;  %v8759_v15 = vsel %vm407_vm2, %v1083_v60, -1e+30 }
 0x1cf   :  { %1123 = vmax.xlane.f32.xlu1 %v1122_v2  ;;  %v736_v12 = vpop.f32.mrb[27].mxu1  ;;  %v1119_v34 = vsel %vm408_vm1, %v8759_v15, -inf  ;;  %v1088_v39 = vmul.f32 0.35355338, %v7667_v5  ;;  %v8773_v43 = vsel %vm407_vm2, %v1086_v9, -1e+30 }
 0x1d0   :  { %v7672_v16 = vpop.f32.mrb[12].mxu0  ;;  %v8765_v29 = vsel %vm407_vm2, %v1085_v4, -1e+30  ;;  %v1087_v30 = vmul.f32 0.35355338, %v736_v12  ;;  %v1128_v55 = vsel %vm408_vm1, %v8773_v43, -inf }
 0x1d1   :  { %1114 = vmax.xlane.f32.xlu0 %v1113_v28  ;;  %v820_v33 = vpop.f32.mrb[13].mxu0  ;;  %v1125_v37 = vsel %vm408_vm1, %v8765_v29, -inf  ;;  %v1090_v56 = vmul.f32 0.35355338, %v7672_v16  ;;  %v8783_v59 = vsel %vm407_vm2, %v1088_v39, -1e+30 }
 0x1d2   :  { %v1089_v48 = vmul.f32 0.35355338, %v820_v33  ;;  %v8777_v51 = vsel %vm407_vm2, %v1087_v30, -1e+30  ;;  %v1134_v4 = vsel %vm408_vm1, %v8783_v59, -inf }
 0x1d3   :  { %v7677_v41 = vpop.f32.mrb[28].mxu1  ;;  %1120 = vmax.xlane.f32.xlu1 %v1119_v34  ;;  %v1131_v61 = vsel %vm408_vm1, %v8777_v51, -inf  ;;  %v8795_v9 = vsel %vm407_vm2, %v1090_v56, -1e+30 }
 0x1d4   :  { %v904_v45 = vpop.f32.mrb[29].mxu1  ;;  %v8789_v2 = vsel %vm407_vm2, %v1089_v48, -1e+30  ;;  %v1092_v5 = vmul.f32 0.35355338, %v7677_v41  ;;  %v1140_v30 = vsel %vm408_vm1, %v8795_v9, -inf }
 0x1d5   :  { %v7682_v50 = vpop.f32.mrb[14].mxu0  ;;  %1126 = vmax.xlane.f32.xlu0 %v1125_v37  ;;  %v1091_v63 = vmul.f32 0.35355338, %v904_v45  ;;  %v1137_v12 = vsel %vm408_vm1, %v8789_v2, -inf }
 0x1d6   :  { %v988_v53 = vpop.f32.mrb[15].mxu0  ;;  %v1094_v33 = vmul.f32 0.35355338, %v7682_v50  ;;  %v8807_v34 = vsel %vm407_vm2, %v1092_v5, -1e+30  ;;  %v8853_v5 = vpop.permute.xlu0 %2024 }
 0x1d7   :  { %v7687_v58 = vpop.f32.mrb[30].mxu1  ;;  %1129 = vmax.xlane.f32.xlu1 %v1128_v55  ;;  %v1093_v16 = vmul.f32 0.35355338, %v988_v53  ;;  %v8801_v28 = vsel %vm407_vm2, %v1091_v63, -1e+30  ;;  %v1146_v45 = vsel %vm408_vm1, %v8807_v34, -inf  ;;  %v8849_v63 = vpop.permute.xlu1 %1937 }
 0x1d8   :  { %v1072_v60 = vpop.f32.mrb[31].mxu1  ;;  %v1143_v37 = vsel %vm408_vm1, %v8801_v28, -inf  ;;  %v1096_v48 = vmul.f32 0.35355338, %v7687_v58  ;;  %v8819_v50 = vsel %vm407_vm2, %v1094_v33, -1e+30 }
 0x1d9   :  { %1132 = vmax.xlane.f32.xlu0 %v1131_v61  ;;  %v1095_v39 = vmul.f32 0.35355338, %v1072_v60  ;;  %v8813_v41 = vsel %vm407_vm2, %v1093_v16, -1e+30  ;;  %v1152_v56 = vsel %vm408_vm1, %v8819_v50, -inf }
 0x1da   :  { %v1149_v53 = vsel %vm408_vm1, %v8813_v41, -inf  ;;  %v8831_v58 = vsel %vm407_vm2, %v1096_v48, -1e+30  ;;  %v8857_v16 = vpop.permute.xlu0 %2026 }
 0x1db   :  { %1135 = vmax.xlane.f32.xlu1 %v1134_v4  ;;  %v8825_v55 = vsel %vm407_vm2, %v1095_v39, -1e+30  ;;  %v1158_v61 = vsel %vm408_vm1, %v8831_v58, -inf  ;;  %v8851_v4 = vpop.permute.xlu1 %1939 }
 0x1dc   :  { %v1155_v60 = vsel %vm408_vm1, %v8825_v55, -inf }
 0x1dd   :  { %1138 = vmax.xlane.f32.xlu0 %v1137_v12 }
 0x1de   :  { %v8861_v33 = vpop.permute.xlu0 %1941 }
 0x1df   :  { %1141 = vmax.xlane.f32.xlu1 %v1140_v30  ;;  %v8855_v12 = vpop.permute.xlu1 %2115 }
 0x1e1   :  { %1144 = vmax.xlane.f32.xlu0 %v1143_v37 }
 0x1e3   :  { %1147 = vmax.xlane.f32.xlu1 %v1146_v45  ;;  %v8859_v30 = vpop.permute.xlu1 %2202 }
 0x1e5   :  { %1150 = vmax.xlane.f32.xlu0 %v1149_v53 }
 0x1e7   :  { %1153 = vmax.xlane.f32.xlu1 %v1152_v56  ;;  %v8863_v37 = vpop.permute.xlu1 %2028 }
 0x1e9   :  { %1156 = vmax.xlane.f32.xlu0 %v1155_v60 }
 0x1eb   :  { %1159 = vmax.xlane.f32.xlu1 %v1158_v61 }
 0x1fc   :  { %2113 = vrot.lane.b32.xlu1 %v8621_v10, %s8382_s4 }
 0x1ff   :  { %2111 = vrot.lane.b32.xlu0 %v8606_v8, %s8382_s4 }
 0x200   :  { %2289 = vrot.lane.b32.xlu1 %v8633_v14, %s8382_s4 }
 0x203   :  { %2198 = vrot.lane.b32.xlu0 %v8624_v11, %s8382_s4 }
 0x204   :  { %2376 = vrot.lane.b32.xlu1 %v8644_v18, %s8382_s4 }
 0x207   :  { %2200 = vrot.lane.b32.xlu0 %v8631_v13, %s8382_s4 }
 0x25a   :  { %v1118_v39 = vpop.xlane.xlu0 %1117 }
 0x25b   :  { %v1162_v45 = vsub.f32 %v8743_v57, %v1118_v39 }
 0x25c   :  { %v1124_v48 = vpop.xlane.xlu1 %1123 }
 0x25d   :  { %v1179_v53 = vmul.f32 1.442695, %v1162_v45  ;;  %v1164_v56 = vsub.f32 %v8749_v62, %v1124_v48 }
 0x25e   :  { %v1115_v60 = vpop.xlane.xlu0 %1114 }
 0x25f   :  { %8126 = vpow2.f32 %v1179_v53  ;;  %v1183_v61 = vmul.f32 1.442695, %v1164_v56  ;;  %v1161_v13 = vsub.f32 %v8753_v0, %v1115_v60 }
 0x260   :  { %v1121_v11 = vpop.xlane.xlu1 %1120 }
 0x261   :  { %8128 = vpow2.f32 %v1183_v61  ;;  %v1177_v8 = vmul.f32 1.442695, %v1161_v13  ;;  %v1163_v18 = vsub.f32 %v8759_v15, %v1121_v11 }
 0x262   :  { %v1127_v14 = vpop.xlane.xlu0 %1126 }
 0x263   :  { %8130 = vpow2.f32 %v1177_v8  ;;  %v1181_v10 = vmul.f32 1.442695, %v1163_v18  ;;  %v1165_v47 = vsub.f32 %v8765_v29, %v1127_v14 }
 0x264   :  { %v1130_v57 = vpop.xlane.xlu1 %1129 }
 0x265   :  { %8132 = vpow2.f32 %v1181_v10  ;;  %v1185_v39 = vmul.f32 1.442695, %v1165_v47  ;;  %v1166_v62 = vsub.f32 %v8773_v43, %v1130_v57 }
 0x266   :  { %v1133_v45 = vpop.xlane.xlu0 %1132 }
 0x267   :  { %v1187_v48 = vmul.f32 1.442695, %v1166_v62  ;;  %v1167_v53 = vsub.f32 %v8777_v51, %v1133_v45  ;;  %8134 = vpow2.f32 %v1185_v39 }
 0x268   :  { %v1136_v0 = vpop.xlane.xlu1 %1135 }
 0x269   :  { %v8872_v56 = vpop.eup %8126  ;;  %8136 = vpow2.f32 %v1187_v48  ;;  %v1189_v11 = vmul.f32 1.442695, %v1167_v53  ;;  %v1168_v8 = vsub.f32 %v8783_v59, %v1136_v0 }
 0x26a   :  { %v1139_v13 = vpop.xlane.xlu0 %1138  ;;  %v1212_v14 = vsel %vm408_vm1, %v8872_v56, 0.0 }
 0x26b   :  { %v8877_v10 = vpop.eup %8128  ;;  %v1191_v18 = vmul.f32 1.442695, %v1168_v8  ;;  %v1169_v47 = vsub.f32 %v8789_v2, %v1139_v13  ;;  %1213 = vadd.xlane.f32.xlu1 %v1212_v14  ;;  %8138 = vpow2.f32 %v1189_v11 }
 0x26c   :  { %v1142_v15 = vpop.xlane.xlu1 %1141  ;;  %v1218_v59 = vsel %vm408_vm1, %v8877_v10, 0.0 }
 0x26d   :  { %v8880_v29 = vpop.eup %8130  ;;  %8140 = vpow2.f32 %v1191_v18  ;;  %v1193_v43 = vmul.f32 1.442695, %v1169_v47  ;;  %v1170_v51 = vsub.f32 %v8795_v9, %v1142_v15 }
 0x26e   :  { %v1145_v60 = vpop.xlane.xlu0 %1144  ;;  %v1209_v61 = vsel %vm408_vm1, %v8880_v29, 0.0 }
 0x26f   :  { %v8887_v57 = vpop.eup %8132  ;;  %v1195_v39 = vmul.f32 1.442695, %v1170_v51  ;;  %v1171_v2 = vsub.f32 %v8801_v28, %v1145_v60  ;;  %1219 = vadd.xlane.f32.xlu1 %v1218_v59  ;;  %1210 = vadd.xlane.f32.xlu0 %v1209_v61  ;;  %8142 = vpow2.f32 %v1193_v43 }
 0x270   :  { %v1148_v62 = vpop.xlane.xlu1 %1147  ;;  %v1215_v0 = vsel %vm408_vm1, %v8887_v57, 0.0 }
 0x271   :  { %8144 = vpow2.f32 %v1195_v39  ;;  %v1197_v45 = vmul.f32 1.442695, %v1171_v2  ;;  %v1172_v9 = vsub.f32 %v8807_v34, %v1148_v62  ;;  %v8891_v48 = vpop.eup %8134 }
 0x272   :  { %v1151_v53 = vpop.xlane.xlu0 %1150  ;;  %v1221_v43 = vsel %vm408_vm1, %v8891_v48, 0.0 }
 0x273   :  { %v8895_v11 = vpop.eup %8136  ;;  %v1199_v8 = vmul.f32 1.442695, %v1172_v9  ;;  %v1173_v13 = vsub.f32 %v8813_v41, %v1151_v53  ;;  %1216 = vadd.xlane.f32.xlu0 %v1215_v0  ;;  %8146 = vpow2.f32 %v1197_v45 }
 0x274   :  { %v1154_v28 = vpop.xlane.xlu1 %1153  ;;  %v1224_v14 = vsel %vm408_vm1, %v8895_v11, 0.0 }
 0x275   :  { %8148 = vpow2.f32 %v1199_v8  ;;  %v1201_v18 = vmul.f32 1.442695, %v1173_v13  ;;  %v1174_v34 = vsub.f32 %v8819_v50, %v1154_v28  ;;  %1225 = vadd.xlane.f32.xlu1 %v1224_v14  ;;  %v8901_v47 = vpop.eup %8138 }
 0x276   :  { %v1157_v15 = vpop.xlane.xlu0 %1156  ;;  %v1227_v62 = vsel %vm408_vm1, %v8901_v47, 0.0 }
 0x277   :  { %v8905_v51 = vpop.eup %8140  ;;  %v1203_v41 = vmul.f32 1.442695, %v1174_v34  ;;  %v1175_v60 = vsub.f32 %v8825_v55, %v1157_v15  ;;  %1222 = vadd.xlane.f32.xlu0 %v1221_v43  ;;  %8150 = vpow2.f32 %v1201_v18 }
 0x278   :  { %v1160_v59 = vpop.xlane.xlu1 %1159  ;;  %v1230_v61 = vsel %vm408_vm1, %v8905_v51, 0.0 }
 0x279   :  { %8152 = vpow2.f32 %v1203_v41  ;;  %v1205_v50 = vmul.f32 1.442695, %v1175_v60  ;;  %v1176_v39 = vsub.f32 %v8831_v58, %v1160_v59  ;;  %1231 = vadd.xlane.f32.xlu1 %v1230_v61  ;;  %v8911_v2 = vpop.eup %8142 }
 0x27a   :  { %v1233_v58 = vsel %vm408_vm1, %v8911_v2, 0.0  ;;  %v8999_v61 = vpop.permute.xlu0 %2111 }
 0x27b   :  { %v8915_v45 = vpop.eup %8144  ;;  %v1207_v9 = vmul.f32 1.442695, %v1176_v39  ;;  %1228 = vadd.xlane.f32.xlu0 %v1227_v62  ;;  %8154 = vpow2.f32 %v1205_v50 }
 0x27c   :  { %v1236_v55 = vsel %vm408_vm1, %v8915_v45, 0.0  ;;  %v8997_v59 = vpop.permute.xlu1 %2113 }
 0x27d   :  { %8156 = vpow2.f32 %v1207_v9  ;;  %1237 = vadd.xlane.f32.xlu1 %v1236_v55  ;;  %v8919_v53 = vpop.eup %8146 }
 0x27e   :  { %v1239_v28 = vsel %vm408_vm1, %v8919_v53, 0.0  ;;  %v9003_v39 = vpop.permute.xlu0 %2198 }
 0x27f   :  { %v8923_v0 = vpop.eup %8148  ;;  %1234 = vadd.xlane.f32.xlu0 %v1233_v58 }
 0x280   :  { %v1242_v8 = vsel %vm408_vm1, %v8923_v0, 0.0  ;;  %v9001_v50 = vpop.permute.xlu1 %2289 }
 0x281   :  { %1243 = vadd.xlane.f32.xlu1 %v1242_v8  ;;  %v8927_v13 = vpop.eup %8150 }
 0x282   :  { %v1245_v15 = vsel %vm408_vm1, %v8927_v13, 0.0  ;;  %v9007_v9 = vpop.permute.xlu0 %2200 }
 0x283   :  { %v8931_v14 = vpop.eup %8152  ;;  %1240 = vadd.xlane.f32.xlu0 %v1239_v28 }
 0x284   :  { %v1248_v18 = vsel %vm408_vm1, %v8931_v14, 0.0  ;;  %v9005_v62 = vpop.permute.xlu1 %2376 }
 0x285   :  { %1249 = vadd.xlane.f32.xlu1 %v1248_v18  ;;  %v8935_v34 = vpop.eup %8154 }
 0x286   :  { %v1251_v60 = vsel %vm408_vm1, %v8935_v34, 0.0 }
 0x287   :  { %v8939_v43 = vpop.eup %8156  ;;  %1246 = vadd.xlane.f32.xlu0 %v1245_v15 }
 0x288   :  { %v1254_v41 = vsel %vm408_vm1, %v8939_v43, 0.0 }
 0x289   :  { %1255 = vadd.xlane.f32.xlu1 %v1254_v41 }
 0x28b   :  { %1252 = vadd.xlane.f32.xlu0 %v1251_v60 }
 0x29a   :  { %2287 = vrot.lane.b32.xlu1 %v8661_v21, %s8382_s4 }
 0x29e   :  { %2374 = vrot.lane.b32.xlu1 %v8682_v24, %s8382_s4 }
 0x2a1   :  { %2285 = vrot.lane.b32.xlu0 %v8642_v17, %s8382_s4 }
 0x2a2   :  { %2550 = vrot.lane.b32.xlu1 %v8663_v22, %s8382_s4 }
 0x2a5   :  { %2372 = vrot.lane.b32.xlu0 %v8652_v19, %s8382_s4 }
 0x2a6   :  { %2461 = vrot.lane.b32.xlu1 %v8697_v26, %s8382_s4 }
 0x2a9   :  { %2463 = vrot.lane.b32.xlu0 %v8654_v20, %s8382_s4 }
 0x2aa   :  { %2548 = vrot.lane.b32.xlu1 %v8707_v27, %s8382_s4 }
 0x2ad   :  { %2459 = vrot.lane.b32.xlu0 %v8670_v23, %s8382_s4 }
 0x2ae   :  { %2927 = vrot.lane.b32.xlu1 %v8722_v36, %s8382_s4 }
 0x2b1   :  { %2546 = vrot.lane.b32.xlu0 %v8690_v25, %s8382_s4 }
 0x2b2   :  { %3012 = vrot.lane.b32.xlu1 %v8716_v31, %s8382_s4 }
 0x2b5   :  { %2842 = vrot.lane.b32.xlu0 %v8718_v32, %s8382_s4 }
 0x2b6   :  { %3097 = vrot.lane.b32.xlu1 %v8720_v35, %s8382_s4 }
 0x2b9   :  { %3182 = vrot.lane.b32.xlu0 %v8732_v40, %s8382_s4 }
 0x2ba   :  { %3267 = vrot.lane.b32.xlu1 %v8736_v44, %s8382_s4 }
 0x2bd   :  { %3352 = vrot.lane.b32.xlu0 %v8730_v38, %s8382_s4 }
 0x2be   :  { %3437 = vrot.lane.b32.xlu1 %v8734_v42, %s8382_s4 }
 0x2c1   :  { %3525 = vrot.lane.b32.xlu0 %v8591_v3, %s8383_s8 }
 0x2c2   :  { %3612 = vrot.lane.b32.xlu1 %v8595_v6, %s8383_s8 }
 0x2c5   :  { %3521 = vrot.lane.b32.xlu0 %v8562_v49, %s8383_s8 }
 0x2c6   :  { %3523 = vrot.lane.b32.xlu1 %v8574_v54, %s8383_s8 }
 0x2c9   :  { %3608 = vrot.lane.b32.xlu0 %v8557_v46, %s8383_s8 }
 0x2ca   :  { %3699 = vrot.lane.b32.xlu1 %v8589_v1, %s8383_s8 }
 0x2cd   :  { %3610 = vrot.lane.b32.xlu0 %v8565_v52, %s8383_s8 }
 0x2ce   :  { %3786 = vrot.lane.b32.xlu1 %v8601_v7, %s8383_s8 }
 0x2f8   :  { %v1214_v55 = vpop.xlane.xlu1 %1213 }
 0x2f9   :  { %8158 = vrcp.f32 %v1214_v55 }
 0x2fc   :  { %v1211_v58 = vpop.xlane.xlu0 %1210  ;;  %v1220_v8 = vpop.xlane.xlu1 %1219 }
 0x2fd   :  { %8160 = vrcp.f32 %v1211_v58 }
 0x2fe   :  { %8162 = vrcp.f32 %v1220_v8 }
 0x300   :  { %v1217_v28 = vpop.xlane.xlu0 %1216 }
 0x301   :  { %8164 = vrcp.f32 %v1217_v28 }
 0x302   :  { %v1226_v18 = vpop.xlane.xlu1 %1225 }
 0x303   :  { %8166 = vrcp.f32 %v1226_v18  ;;  %v8159_v60 = vpop.eup %8158 }
 0x304   :  { %v1223_v15 = vpop.xlane.xlu0 %1222  ;;  %v1274_v55 = vmul.f32 %v8159_v60, %v8872_v56 }
 0x305   :  { %8168 = vrcp.f32 %v1223_v15 }
 0x306   :  { %v1232_v41 = vpop.xlane.xlu1 %1231 }
 0x307   :  { %v8161_v1 = vpop.eup %8160  ;;  %8170 = vrcp.f32 %v1232_v41 }
 0x308   :  { %v1229_v46 = vpop.xlane.xlu0 %1228  ;;  %v1273_v7 = vmul.f32 %v8161_v1, %v8880_v29  ;;  %v8163_v52 = vpop.eup %8162 }
 0x309   :  { %8172 = vrcp.f32 %v1229_v46  ;;  %v1276_v46 = vmul.f32 %v8163_v52, %v8877_v10 }
 0x30a   :  { %v1238_v49 = vpop.xlane.xlu1 %1237  ;;  %7690 = vmatprep.mubr.msk.f32.mxu0 %vm408_vm1, %v1273_v7 }
 0x30b   :  { %v8165_v58 = vpop.eup %8164  ;;  %8174 = vrcp.f32 %v1238_v49  ;;  %7691 = vmatmul.mubr.msk.f32.vlgmr.msra.gmra.mrb[16].mxu0 %vm408_vm1, %v1274_v55 }
 0x30c   :  { %v1235_v8 = vpop.xlane.xlu0 %1234  ;;  %v1275_v28 = vmul.f32 %v8165_v58, %v8887_v57  ;;  %7699 = vmatpush3.msra.mxu0 %v8716_v31 }
 0x30d   :  { %8176 = vrcp.f32 %v1235_v8  ;;  %v8167_v18 = vpop.eup %8166  ;;  %7708 = vmatprep.subr.mxu0 %v8732_v40 }
 0x30e   :  { %v1244_v1 = vpop.xlane.xlu1 %1243  ;;  %7695 = vmatprep.mubr.msk.f32.mxu1 %vm408_vm1, %v1275_v28  ;;  %v1278_v52 = vmul.f32 %v8167_v18, %v8895_v11 }
 0x30f   :  { %v8169_v56 = vpop.eup %8168  ;;  %7696 = vmatmul.mubr.msk.f32.vlgmr.msra.gmra.mrb[32].mxu1 %vm408_vm1, %v1276_v46  ;;  %8178 = vrcp.f32 %v1244_v1 }
 0x310   :  { %7704 = vmatpush3.msra.mxu1 %v8720_v35  ;;  %v1241_v49 = vpop.xlane.xlu0 %1240  ;;  %v1277_v7 = vmul.f32 %v8169_v56, %v8891_v48 }
 0x311   :  { %7713 = vmatprep.subr.mxu1 %v8736_v44  ;;  %8180 = vrcp.f32 %v1241_v49  ;;  %v8171_v10 = vpop.eup %8170 }
 0x312   :  { %v1250_v29 = vpop.xlane.xlu1 %1249  ;;  %7700 = vmatprep.mubr.msk.f32.mxu0 %vm408_vm1, %v1277_v7  ;;  %v1280_v48 = vmul.f32 %v8171_v10, %v8905_v51 }
 0x313   :  { %v8173_v57 = vpop.eup %8172  ;;  %7701 = vmatmul.mubr.msk.f32.vlgmr.msra.gmra.mrb[18].mxu0 %vm408_vm1, %v1278_v52  ;;  %8182 = vrcp.f32 %v1250_v29 }
 0x314   :  { %7709 = vmatpush3.msra.mxu0 %v8732_v40  ;;  %v1247_v15 = vpop.xlane.xlu0 %1246  ;;  %v1279_v41 = vmul.f32 %v8173_v57, %v8901_v47 }
 0x315   :  { %7718 = vmatprep.subr.mxu0 %v8730_v38  ;;  %8184 = vrcp.f32 %v1247_v15  ;;  %v8175_v60 = vpop.eup %8174 }
 0x316   :  { %v1256_v11 = vpop.xlane.xlu1 %1255  ;;  %7705 = vmatprep.mubr.msk.f32.mxu1 %vm408_vm1, %v1279_v41  ;;  %v1282_v47 = vmul.f32 %v8175_v60, %v8915_v45 }
 0x317   :  { %v8177_v55 = vpop.eup %8176  ;;  %7706 = vmatmul.mubr.msk.f32.vlgmr.msra.gmra.mrb[34].mxu1 %vm408_vm1, %v1280_v48  ;;  %8186 = vrcp.f32 %v1256_v11 }
 0x318   :  { %7714 = vmatpush3.msra.mxu1 %v8736_v44  ;;  %v1253_v58 = vpop.xlane.xlu0 %1252  ;;  %v1281_v8 = vmul.f32 %v8177_v55, %v8911_v2 }
 0x319   :  { %7723 = vmatprep.subr.mxu1 %v8734_v42  ;;  %8188 = vrcp.f32 %v1253_v58  ;;  %v8179_v28 = vpop.eup %8178 }
 0x31a   :  { %v2288_v51 = vpop.permute.xlu1 %2287  ;;  %7710 = vmatprep.mubr.msk.f32.mxu0 %vm408_vm1, %v1281_v8  ;;  %v1284_v2 = vmul.f32 %v8179_v28, %v8923_v0 }
 0x31b   :  { %v8181_v46 = vpop.eup %8180  ;;  %7711 = vmatmul.mubr.msk.f32.vlgmr.msra.gmra.mrb[20].mxu0 %vm408_vm1, %v1282_v47 }
 0x31c   :  { %7719 = vmatpush3.msra.mxu0 %v8730_v38  ;;  %v2286_v18 = vpop.permute.xlu0 %2285  ;;  %v1283_v1 = vmul.f32 %v8181_v46, %v8919_v53 }
 0x31d   :  { %7728 = vmatprep.subr.msk.mxu0 %vm408_vm1, %v8861_v33  ;;  %v8183_v56 = vpop.eup %8182 }
 0x31e   :  { %v2375_v49 = vpop.permute.xlu1 %2374  ;;  %7715 = vmatprep.mubr.msk.f32.mxu1 %vm408_vm1, %v1283_v1  ;;  %v1286_v53 = vmul.f32 %v8183_v56, %v8931_v14 }
 0x31f   :  { %v8185_v45 = vpop.eup %8184  ;;  %7716 = vmatmul.mubr.msk.f32.vlgmr.msra.gmra.mrb[36].mxu1 %vm408_vm1, %v1284_v2 }
 0x320   :  { %7724 = vmatpush3.msra.mxu1 %v8734_v42  ;;  %v2373_v7 = vpop.permute.xlu0 %2372  ;;  %v1285_v52 = vmul.f32 %v8185_v45, %v8927_v13 }
 0x321   :  { %7733 = vmatprep.subr.msk.mxu1 %vm408_vm1, %v8863_v37  ;;  %v8187_v10 = vpop.eup %8186 }
 0x322   :  { %v2551_v29 = vpop.permute.xlu1 %2550  ;;  %7720 = vmatprep.mubr.msk.f32.mxu0 %vm408_vm1, %v1285_v52  ;;  %v1288_v14 = vmul.f32 %v8187_v10, %v8939_v43 }
 0x323   :  { %v8189_v0 = vpop.eup %8188  ;;  %7721 = vmatmul.mubr.msk.f32.vlgmr.msra.gmra.mrb[22].mxu0 %vm408_vm1, %v1286_v53 }
 0x324   :  { %7729 = vmatpush3.xpose.msk.msra.mxu0 %vm408_vm1, %v8861_v33  ;;  %7730 = vmatprep.mubr.msk.f32.mxu0 %vm408_vm1, %v8849_v63  ;;  %v2464_v57 = vpop.permute.xlu0 %2463  ;;  %v1287_v13 = vmul.f32 %v8189_v0, %v8935_v34 }
 0x325   :  { %7738 = vmatprep.subr.msk.mxu0 %vm408_vm1, %v8855_v12 }
 0x326   :  { %v2462_v15 = vpop.permute.xlu1 %2461  ;;  %7725 = vmatprep.mubr.msk.f32.mxu1 %vm408_vm1, %v1287_v13 }
 0x327   :  { %7726 = vmatmul.mubr.msk.f32.vlgmr.msra.gmra.mrb[38].mxu1 %vm408_vm1, %v1288_v14  ;;  %7731 = vmatmul.mubr.msk.f32.vlgmr.msra.gmra.mrb[24].mxu0 %vm408_vm1, %v8851_v4 }
 0x328   :  { %7734 = vmatpush3.xpose.msk.msra.mxu1 %vm408_vm1, %v8863_v37  ;;  %7739 = vmatpush3.xpose.msk.msra.mxu0 %vm408_vm1, %v8855_v12  ;;  %v2460_v63 = vpop.permute.xlu0 %2459 }
 0x329   :  { %7735 = vmatprep.mubr.msk.f32.mxu1 %vm408_vm1, %v8853_v5  ;;  %7740 = vmatprep.mubr.msk.f32.mxu0 %vm408_vm1, %v8999_v61 }
 0x32a   :  { %7743 = vmatprep.subr.msk.mxu1 %vm408_vm1, %v8859_v30  ;;  %7748 = vmatprep.subr.msk.mxu0 %vm408_vm1, %v9001_v50  ;;  %v2549_v4 = vpop.permute.xlu1 %2548 }
 0x32b   :  { %7736 = vmatmul.mubr.msk.f32.vlgmr.msra.gmra.mrb[40].mxu1 %vm408_vm1, %v8857_v16  ;;  %7741 = vmatmul.mubr.msk.f32.vlgmr.msra.gmra.mrb[26].mxu0 %vm408_vm1, %v8997_v59 }
 0x32c   :  { %7744 = vmatpush3.xpose.msk.msra.mxu1 %vm408_vm1, %v8859_v30  ;;  %7749 = vmatpush3.xpose.msk.msra.mxu0 %vm408_vm1, %v9001_v50  ;;  %v2547_v5 = vpop.permute.xlu0 %2546 }
 0x32d   :  { %7745 = vmatprep.mubr.msk.f32.mxu1 %vm408_vm1, %v9003_v39  ;;  %7750 = vmatprep.mubr.msk.f32.mxu0 %vm408_vm1, %v2286_v18 }
 0x32e   :  { %7753 = vmatprep.subr.msk.mxu1 %vm408_vm1, %v9005_v62  ;;  %7758 = vmatprep.subr.msk.mxu0 %vm408_vm1, %v2464_v57  ;;  %v2928_v12 = vpop.permute.xlu1 %2927 }
 0x32f   :  { %7746 = vmatmul.mubr.msk.f32.vlgmr.msra.gmra.mrb[42].mxu1 %vm408_vm1, %v9007_v9  ;;  %7751 = vmatmul.mubr.msk.f32.vlgmr.msra.gmra.mrb[28].mxu0 %vm408_vm1, %v2288_v51 }
 0x330   :  { %7754 = vmatpush3.xpose.msk.msra.mxu1 %vm408_vm1, %v9005_v62  ;;  %7759 = vmatpush3.xpose.msk.msra.mxu0 %vm408_vm1, %v2464_v57  ;;  %v2843_v16 = vpop.permute.xlu0 %2842 }
 0x331   :  { %7755 = vmatprep.mubr.msk.f32.mxu1 %vm408_vm1, %v2373_v7  ;;  %7760 = vmatprep.mubr.msk.f32.mxu0 %vm408_vm1, %v2460_v63 }
 0x332   :  { %7763 = vmatprep.subr.msk.mxu1 %vm408_vm1, %v2551_v29  ;;  %7768 = vmatprep.subr.mxu0 %v2843_v16  ;;  %v9098_v30 = vpop.permute.xlu1 %3012 }
 0x333   :  { %7756 = vmatmul.mubr.msk.f32.vlgmr.msra.gmra.mrb[44].mxu1 %vm408_vm1, %v2375_v49  ;;  %7761 = vmatmul.mubr.msk.f32.vlgmr.msra.gmra.mrb[30].mxu0 %vm408_vm1, %v2462_v15 }
 0x334   :  { %7764 = vmatpush3.xpose.msk.msra.mxu1 %vm408_vm1, %v2551_v29  ;;  %7769 = vmatpush3.msra.mxu0 %v2843_v16 }
 0x335   :  { %7765 = vmatprep.mubr.msk.f32.mxu1 %vm408_vm1, %v2547_v5  ;;  %7773 = vmatprep.subr.mxu1 %v2928_v12 }
 0x336   :  { %7778 = vmatprep.subr.mxu0 %v9098_v30  ;;  %v9105_v33 = vpop.permute.xlu1 %3097 }
 0x337   :  { %7766 = vmatmul.mubr.msk.f32.vlgmr.msra.gmra.mrb[46].mxu1 %vm408_vm1, %v2549_v4 }
 0x338   :  { %7774 = vmatpush3.msra.mxu1 %v2928_v12 }
 0x339   :  { %7783 = vmatprep.subr.mxu1 %v9105_v33 }
 0x3de   :  { %v9109_v37 = vpop.f32.mrb[16].mxu0 }
 0x3df   :  { %10454 = vst [vmem:[#allocation14_spill] sm:$0xff] %v9109_v37  ;;  %v9111_v34 = vpop.f32.mrb[17].mxu0 }
 0x3e0   :  { %10455 = vst [vmem:[#allocation15_spill] sm:$0xff] %v9111_v34 }
 0x3e2   :  { %v9113_v43 = vpop.f32.mrb[32].mxu1 }
 0x3e3   :  { %10456 = vst [vmem:[#allocation16_spill] sm:$0xff] %v9113_v43  ;;  %v9115_v59 = vpop.f32.mrb[33].mxu1 }
 0x3e4   :  { %10457 = vst [vmem:[#allocation17_spill] sm:$0xff] %v9115_v59 }
 0x3e6   :  { %v9117_v61 = vpop.f32.mrb[18].mxu0 }
 0x3e7   :  { %10458 = vst [vmem:[#allocation18_spill] sm:$0xff] %v9117_v61  ;;  %v9119_v50 = vpop.f32.mrb[19].mxu0 }
 0x3e8   :  { %10459 = vst [vmem:[#allocation19_spill] sm:$0xff] %v9119_v50 }
 0x3ea   :  { %v9121_v39 = vpop.f32.mrb[34].mxu1 }
 0x3eb   :  { %10460 = vst [vmem:[#allocation20_spill] sm:$0xff] %v9121_v39  ;;  %v9123_v62 = vpop.f32.mrb[35].mxu1 }
 0x3ec   :  { %10461 = vst [vmem:[#allocation21_spill] sm:$0xff] %v9123_v62 }
 0x3ee   :  { %v9125_v9 = vpop.f32.mrb[20].mxu0 }
 0x3ef   :  { %10462 = vst [vmem:[#allocation22_spill] sm:$0xff] %v9125_v9  ;;  %v9127_v41 = vpop.f32.mrb[21].mxu0 }
 0x3f0   :  { %10463 = vst [vmem:[#allocation23_spill] sm:$0xff] %v9127_v41 }
 0x3f2   :  { %v9129_v48 = vpop.f32.mrb[36].mxu1 }
 0x3f3   :  { %10464 = vst [vmem:[#allocation24_spill] sm:$0xff] %v9129_v48  ;;  %v9131_v60 = vpop.f32.mrb[37].mxu1 }
 0x3f4   :  { %10465 = vst [vmem:[#allocation25_spill] sm:$0xff] %v9131_v60 }
 0x3f6   :  { %v9133_v11 = vpop.f32.mrb[22].mxu0 }
 0x3f7   :  { %10466 = vst [vmem:[#allocation26_spill] sm:$0xff] %v9133_v11  ;;  %v9135_v55 = vpop.f32.mrb[23].mxu0 }
 0x3f8   :  { %10467 = vst [vmem:[#allocation27_spill] sm:$0xff] %v9135_v55 }
 0x3fa   :  { %v9137_v58 = vpop.f32.mrb[38].mxu1  ;;  %v7732_v8 = vpop.f32.mrb[24].mxu0 }
 0x3fb   :  { %10468 = vst [vmem:[#allocation28_spill] sm:$0xff] %v9137_v58  ;;  %v2634_v47 = vmul.f32 0.35355338, %v7732_v8  ;;  %v9139_v28 = vpop.f32.mrb[39].mxu1  ;;  %v2015_v51 = vpop.f32.mrb[25].mxu0 }
 0x3fc   :  { %10469 = vst [vmem:[#allocation29_spill] sm:$0xff] %v9139_v28  ;;  %v2633_v46 = vmul.f32 0.35355338, %v2015_v51 }
 0x3fd   :  { %v9143_v1 = vsel %vm407_vm2, %v2634_v47, -1e+30 }
 0x3fe   :  { %v7737_v2 = vpop.f32.mrb[40].mxu1  ;;  %v7742_v56 = vpop.f32.mrb[26].mxu0  ;;  %v2668_v49 = vsel %vm408_vm1, %v9143_v1, -inf  ;;  %v9149_v45 = vsel %vm407_vm2, %v2633_v46, -1e+30 }
 0x3ff   :  { %v2636_v7 = vmul.f32 0.35355338, %v7737_v2  ;;  %v2638_v52 = vmul.f32 0.35355338, %v7742_v56  ;;  %2669 = vmax.xlane.f32.xlu1 %v2668_v49  ;;  %v2102_v53 = vpop.f32.mrb[41].mxu1  ;;  %v2189_v10 = vpop.f32.mrb[27].mxu0 }
 0x400   :  { %v2665_v29 = vsel %vm408_vm1, %v9149_v45, -inf  ;;  %v2635_v0 = vmul.f32 0.35355338, %v2102_v53  ;;  %v2637_v47 = vmul.f32 0.35355338, %v2189_v10 }
 0x401   :  { %2666 = vmax.xlane.f32.xlu0 %v2665_v29  ;;  %v9155_v57 = vsel %vm407_vm2, %v2638_v52, -1e+30  ;;  %v9159_v13 = vsel %vm407_vm2, %v2636_v7, -1e+30 }
 0x402   :  { %v7747_v14 = vpop.f32.mrb[42].mxu1  ;;  %v7752_v15 = vpop.f32.mrb[28].mxu0  ;;  %v2680_v63 = vsel %vm408_vm1, %v9155_v57, -inf  ;;  %v2674_v4 = vsel %vm408_vm1, %v9159_v13, -inf  ;;  %v9171_v46 = vsel %vm407_vm2, %v2635_v0, -1e+30 }
 0x403   :  { %v2640_v5 = vmul.f32 0.35355338, %v7747_v14  ;;  %v2642_v12 = vmul.f32 0.35355338, %v7752_v15  ;;  %2681 = vmax.xlane.f32.xlu1 %v2680_v63  ;;  %v2276_v16 = vpop.f32.mrb[43].mxu1  ;;  %v2363_v8 = vpop.f32.mrb[29].mxu0 }
 0x404   :  { %v2671_v29 = vsel %vm408_vm1, %v9171_v46, -inf  ;;  %v2639_v14 = vmul.f32 0.35355338, %v2276_v16  ;;  %v9183_v0 = vsel %vm407_vm2, %v2637_v47, -1e+30 }
 0x405   :  { %2675 = vmax.xlane.f32.xlu0 %v2674_v4  ;;  %v9167_v51 = vsel %vm407_vm2, %v2640_v5, -1e+30  ;;  %v9177_v10 = vsel %vm407_vm2, %v2642_v12, -1e+30  ;;  %v2641_v16 = vmul.f32 0.35355338, %v2363_v8 }
 0x406   :  { %v7757_v2 = vpop.f32.mrb[44].mxu1  ;;  %v7762_v56 = vpop.f32.mrb[30].mxu0  ;;  %v2686_v49 = vsel %vm408_vm1, %v9167_v51, -inf  ;;  %v2692_v63 = vsel %vm408_vm1, %v9177_v10, -inf  ;;  %v9195_v47 = vsel %vm407_vm2, %v2639_v14, -1e+30 }
 0x407   :  { %v2644_v7 = vmul.f32 0.35355338, %v7757_v2  ;;  %2687 = vmax.xlane.f32.xlu1 %v2686_v49  ;;  %v2450_v52 = vpop.f32.mrb[45].mxu1  ;;  %v2537_v53 = vpop.f32.mrb[31].mxu0  ;;  %v2646_v4 = vmul.f32 0.35355338, %v7762_v56 }
 0x408   :  { %v2677_v2 = vsel %vm408_vm1, %v9183_v0, -inf  ;;  %v9207_v8 = vsel %vm407_vm2, %v2641_v16, -1e+30 }
 0x409   :  { %2672 = vmax.xlane.f32.xlu0 %v2671_v29  ;;  %v9189_v12 = vsel %vm407_vm2, %v2644_v7, -1e+30  ;;  %v9201_v56 = vsel %vm407_vm2, %v2646_v4, -1e+30  ;;  %v2683_v7 = vsel %vm408_vm1, %v9195_v47, -inf  ;;  %v2689_v4 = vsel %vm408_vm1, %v9207_v8, -inf }
 0x40a   :  { %v7767_v15 = vpop.f32.mrb[46].mxu1  ;;  %v2698_v49 = vsel %vm408_vm1, %v9189_v12, -inf  ;;  %v2704_v14 = vsel %vm408_vm1, %v9201_v56, -inf }
 0x40b   :  { %2693 = vmax.xlane.f32.xlu1 %v2692_v63  ;;  %v2624_v5 = vpop.f32.mrb[47].mxu1  ;;  %v2648_v29 = vmul.f32 0.35355338, %v7767_v15  ;;  %v2643_v63 = vmul.f32 0.35355338, %v2450_v52 }
 0x40d   :  { %2678 = vmax.xlane.f32.xlu0 %v2677_v2  ;;  %v9213_v15 = vsel %vm407_vm2, %v2648_v29, -1e+30  ;;  %v2645_v2 = vmul.f32 0.35355338, %v2537_v53  ;;  %v9219_v52 = vsel %vm407_vm2, %v2643_v63, -1e+30 }
 0x40e   :  { %v2710_v16 = vsel %vm408_vm1, %v9213_v15, -inf }
 0x40f   :  { %2699 = vmax.xlane.f32.xlu1 %v2698_v49  ;;  %v2695_v49 = vsel %vm408_vm1, %v9219_v52, -inf  ;;  %v9227_v29 = vsel %vm407_vm2, %v2645_v2, -1e+30  ;;  %v10473_v2 = vld [vmem:[#allocation12_spill] sm:$0xff] }
 0x410   :  { %v2701_v53 = vsel %vm408_vm1, %v9227_v29, -inf }
 0x411   :  { %2684 = vmax.xlane.f32.xlu0 %v2683_v7  ;;  %v2647_v7 = vmul.f32 0.35355338, %v2624_v5  ;;  %v10472_v5 = vld [vmem:[#allocation11_spill] sm:$0xff] }
 0x413   :  { %2705 = vmax.xlane.f32.xlu1 %v2704_v14  ;;  %v9233_v63 = vsel %vm407_vm2, %v2647_v7, -1e+30  ;;  %v10476_v7 = vld [vmem:[#allocation10_spill] sm:$0xff] }
 0x414   :  { %v2707_v14 = vsel %vm408_vm1, %v9233_v63, -inf }
 0x415   :  { %2690 = vmax.xlane.f32.xlu0 %v2689_v4  ;;  %v10471_v4 = vld [vmem:[#allocation8_spill] sm:$0xff] }
 0x417   :  { %2711 = vmax.xlane.f32.xlu1 %v2710_v16  ;;  %v10474_v16 = vld [vmem:[#allocation7_spill] sm:$0xff] }
 0x419   :  { %2696 = vmax.xlane.f32.xlu0 %v2695_v49  ;;  %v10475_v49 = vld [vmem:[#allocation9_spill] sm:$0xff] }
 0x41d   :  { %2702 = vmax.xlane.f32.xlu0 %v2701_v53  ;;  %v9249_v53 = vpop.permute.xlu1 %3267 }
 0x421   :  { %2708 = vmax.xlane.f32.xlu0 %v2707_v14  ;;  %v9251_v14 = vpop.permute.xlu0 %3182  ;;  %v9253_v28 = vpop.permute.xlu1 %3437 }
 0x425   :  { %v9255_v58 = vpop.permute.xlu0 %3352  ;;  %v9257_v55 = vpop.permute.xlu1 %3612 }
 0x428   :  { %3697 = vrot.lane.b32.xlu1 %v10471_v4, %s8383_s8 }
 0x429   :  { %v9259_v11 = vpop.permute.xlu0 %3525  ;;  %v9261_v60 = vpop.permute.xlu1 %3523 }
 0x42c   :  { %3873 = vrot.lane.b32.xlu1 %v10472_v5, %s8383_s8 }
 0x42d   :  { %v9263_v48 = vpop.permute.xlu0 %3521  ;;  %v9265_v41 = vpop.permute.xlu1 %3699 }
 0x430   :  { %3960 = vrot.lane.b32.xlu1 %v10473_v2, %s8383_s8 }
 0x431   :  { %v9267_v9 = vpop.permute.xlu0 %3608  ;;  %v9269_v62 = vpop.permute.xlu1 %3786 }
 0x432   :  { %10477 = vst [vmem:[#allocation30_spill] sm:$0xff] %v9269_v62 }
 0x435   :  { %v9271_v39 = vpop.permute.xlu0 %3610 }
 0x436   :  { %10478 = vst [vmem:[#allocation31_spill] sm:$0xff] %v9271_v39 }
 0x437   :  { %3695 = vrot.lane.b32.xlu0 %v10474_v16, %s8383_s8 }
 0x43b   :  { %3782 = vrot.lane.b32.xlu0 %v10475_v49, %s8383_s8 }
 0x43f   :  { %3784 = vrot.lane.b32.xlu0 %v10476_v7, %s8383_s8 }
 0x48c   :  { %v2670_v50 = vpop.xlane.xlu1 %2669 }
 0x48d   :  { %v2714_v61 = vsub.f32 %v9143_v1, %v2670_v50 }
 0x48e   :  { %v2667_v59 = vpop.xlane.xlu0 %2666 }
 0x48f   :  { %v2731_v43 = vmul.f32 1.442695, %v2714_v61  ;;  %v2713_v34 = vsub.f32 %v9149_v45, %v2667_v59 }
 0x490   :  { %v2682_v37 = vpop.xlane.xlu1 %2681 }
 0x491   :  { %8190 = vpow2.f32 %v2731_v43  ;;  %v2729_v5 = vmul.f32 1.442695, %v2713_v34  ;;  %v2718_v49 = vsub.f32 %v9155_v57, %v2682_v37 }
 0x492   :  { %v2676_v2 = vpop.xlane.xlu0 %2675 }
 0x493   :  { %8192 = vpow2.f32 %v2729_v5  ;;  %v2716_v7 = vsub.f32 %v9159_v13, %v2676_v2  ;;  %v2739_v4 = vmul.f32 1.442695, %v2718_v49 }
 0x494   :  { %v2688_v16 = vpop.xlane.xlu1 %2687 }
 0x495   :  { %v2735_v18 = vmul.f32 1.442695, %v2716_v7  ;;  %v2720_v39 = vsub.f32 %v9167_v51, %v2688_v16 }
 0x496   :  { %v2673_v62 = vpop.xlane.xlu0 %2672 }
 0x497   :  { %8194 = vpow2.f32 %v2735_v18  ;;  %v2715_v61 = vsub.f32 %v9171_v46, %v2673_v62  ;;  %v2743_v59 = vmul.f32 1.442695, %v2720_v39 }
 0x498   :  { %v2694_v50 = vpop.xlane.xlu1 %2693  ;;  %8196 = vpow2.f32 %v2739_v4 }
 0x499   :  { %v2733_v43 = vmul.f32 1.442695, %v2715_v61  ;;  %v2722_v34 = vsub.f32 %v9177_v10, %v2694_v50 }
 0x49a   :  { %v2679_v37 = vpop.xlane.xlu0 %2678 }
 0x49b   :  { %v9280_v1 = vpop.eup %8190  ;;  %8198 = vpow2.f32 %v2733_v43  ;;  %v2717_v45 = vsub.f32 %v9183_v0, %v2679_v37  ;;  %v2747_v62 = vmul.f32 1.442695, %v2722_v34 }
 0x49c   :  { %v2700_v57 = vpop.xlane.xlu1 %2699  ;;  %v2764_v13 = vsel %vm408_vm1, %v9280_v1, 0.0  ;;  %8200 = vpow2.f32 %v2743_v59 }
 0x49d   :  { %v9285_v51 = vpop.eup %8192  ;;  %v2737_v18 = vmul.f32 1.442695, %v2717_v45  ;;  %v2724_v39 = vsub.f32 %v9189_v12, %v2700_v57  ;;  %2765 = vadd.xlane.f32.xlu1 %v2764_v13 }
 0x49e   :  { %v2685_v46 = vpop.xlane.xlu0 %2684  ;;  %v2761_v10 = vsel %vm408_vm1, %v9285_v51, 0.0 }
 0x49f   :  { %8202 = vpow2.f32 %v2737_v18  ;;  %v2719_v4 = vsub.f32 %v9195_v47, %v2685_v46  ;;  %2762 = vadd.xlane.f32.xlu0 %v2761_v10  ;;  %v2751_v2 = vmul.f32 1.442695, %v2724_v39 }
 0x4a0   :  { %v2706_v0 = vpop.xlane.xlu1 %2705  ;;  %8204 = vpow2.f32 %v2747_v62 }
 0x4a1   :  { %v9291_v5 = vpop.eup %8194  ;;  %v2741_v16 = vmul.f32 1.442695, %v2719_v4  ;;  %v2726_v49 = vsub.f32 %v9201_v56, %v2706_v0 }
 0x4a2   :  { %v2691_v7 = vpop.xlane.xlu0 %2690  ;;  %v2770_v12 = vsel %vm408_vm1, %v9291_v5, 0.0  ;;  %v9296_v61 = vpop.eup %8196 }
 0x4a3   :  { %8206 = vpow2.f32 %v2741_v16  ;;  %v2721_v50 = vsub.f32 %v9207_v8, %v2691_v7  ;;  %2771 = vadd.xlane.f32.xlu1 %v2770_v12  ;;  %v2755_v43 = vmul.f32 1.442695, %v2726_v49  ;;  %v2776_v56 = vsel %vm408_vm1, %v9296_v61, 0.0 }
 0x4a4   :  { %v2712_v47 = vpop.xlane.xlu1 %2711  ;;  %8208 = vpow2.f32 %v2751_v2 }
 0x4a5   :  { %v9299_v59 = vpop.eup %8198  ;;  %v2745_v34 = vmul.f32 1.442695, %v2721_v50  ;;  %v2728_v37 = vsub.f32 %v9213_v15, %v2712_v47 }
 0x4a6   :  { %v2697_v45 = vpop.xlane.xlu0 %2696  ;;  %v2767_v57 = vsel %vm408_vm1, %v9299_v59, 0.0  ;;  %v9306_v13 = vpop.eup %8200 }
 0x4a7   :  { %8210 = vpow2.f32 %v2745_v34  ;;  %v2723_v8 = vsub.f32 %v9219_v52, %v2697_v45  ;;  %2777 = vadd.xlane.f32.xlu1 %v2776_v56  ;;  %2768 = vadd.xlane.f32.xlu0 %v2767_v57  ;;  %v2759_v18 = vmul.f32 1.442695, %v2728_v37  ;;  %v2782_v46 = vsel %vm408_vm1, %v9306_v13, 0.0 }
 0x4a8   :  { %8212 = vpow2.f32 %v2755_v43 }
 0x4a9   :  { %v9309_v62 = vpop.eup %8202  ;;  %v2749_v39 = vmul.f32 1.442695, %v2723_v8 }
 0x4aa   :  { %v2703_v15 = vpop.xlane.xlu0 %2702  ;;  %v2773_v10 = vsel %vm408_vm1, %v9309_v62, 0.0  ;;  %v9315_v4 = vpop.eup %8204 }
 0x4ab   :  { %8214 = vpow2.f32 %v2749_v39  ;;  %v2725_v0 = vsub.f32 %v9227_v29, %v2703_v15  ;;  %2783 = vadd.xlane.f32.xlu1 %v2782_v46  ;;  %2774 = vadd.xlane.f32.xlu0 %v2773_v10  ;;  %v2788_v49 = vsel %vm408_vm1, %v9315_v4, 0.0  ;;  %v10479_v10 = vld [vmem:[#allocation3_spill] sm:$0xff] }
 0x4ac   :  { %8216 = vpow2.f32 %v2759_v18 }
 0x4ad   :  { %v9318_v52 = vpop.eup %8206  ;;  %v2753_v2 = vmul.f32 1.442695, %v2725_v0  ;;  %v9397_v0 = vpop.permute.xlu1 %3697 }
 0x4ae   :  { %v2709_v16 = vpop.xlane.xlu0 %2708  ;;  %v2779_v7 = vsel %vm408_vm1, %v9318_v52, 0.0  ;;  %v9324_v12 = vpop.eup %8208 }
 0x4af   :  { %8218 = vpow2.f32 %v2753_v2  ;;  %v2727_v50 = vsub.f32 %v9233_v63, %v2709_v16  ;;  %2789 = vadd.xlane.f32.xlu1 %v2788_v49  ;;  %2780 = vadd.xlane.f32.xlu0 %v2779_v7  ;;  %v2794_v43 = vsel %vm408_vm1, %v9324_v12, 0.0 }
 0x4b1   :  { %v9327_v29 = vpop.eup %8210  ;;  %v2757_v47 = vmul.f32 1.442695, %v2727_v50  ;;  %v9401_v16 = vpop.permute.xlu1 %3873 }
 0x4b2   :  { %v2785_v34 = vsel %vm408_vm1, %v9327_v29, 0.0  ;;  %v9333_v37 = vpop.eup %8212  ;;  %v9399_v2 = vpop.permute.xlu0 %3695 }
 0x4b3   :  { %8220 = vpow2.f32 %v2757_v47  ;;  %2795 = vadd.xlane.f32.xlu1 %v2794_v43  ;;  %2786 = vadd.xlane.f32.xlu0 %v2785_v34  ;;  %v2800_v63 = vsel %vm408_vm1, %v9333_v37, 0.0 }
 0x4b5   :  { %v9335_v45 = vpop.eup %8214  ;;  %v9405_v7 = vpop.permute.xlu1 %3960 }
 0x4b6   :  { %v2791_v56 = vsel %vm408_vm1, %v9335_v45, 0.0  ;;  %v9341_v57 = vpop.eup %8216  ;;  %v9403_v49 = vpop.permute.xlu0 %3782 }
 0x4b7   :  { %2801 = vadd.xlane.f32.xlu1 %v2800_v63  ;;  %2792 = vadd.xlane.f32.xlu0 %v2791_v56  ;;  %v2806_v18 = vsel %vm408_vm1, %v9341_v57, 0.0 }
 0x4b9   :  { %v9343_v8 = vpop.eup %8218 }
 0x4ba   :  { %v2797_v39 = vsel %vm408_vm1, %v9343_v8, 0.0 }
 0x4bb   :  { %2807 = vadd.xlane.f32.xlu1 %v2806_v18  ;;  %2798 = vadd.xlane.f32.xlu0 %v2797_v39 }
 0x4bd   :  { %v9349_v15 = vpop.eup %8220 }
 0x4be   :  { %v2803_v46 = vsel %vm408_vm1, %v9349_v15, 0.0 }
 0x4bf   :  { %2804 = vadd.xlane.f32.xlu0 %v2803_v46 }
 0x4cc   :  { %3871 = vrot.lane.b32.xlu1 %v8661_v21, %s8383_s8 }
 0x4d0   :  { %3958 = vrot.lane.b32.xlu1 %v8682_v24, %s8383_s8 }
 0x4d4   :  { %4134 = vrot.lane.b32.xlu1 %v8663_v22, %s8383_s8 }
 0x4d5   :  { %3869 = vrot.lane.b32.xlu0 %v8642_v17, %s8383_s8 }
 0x4d8   :  { %4045 = vrot.lane.b32.xlu1 %v8697_v26, %s8383_s8 }
 0x4d9   :  { %3956 = vrot.lane.b32.xlu0 %v8652_v19, %s8383_s8 }
 0x4dc   :  { %4132 = vrot.lane.b32.xlu1 %v8707_v27, %s8383_s8 }
 0x4dd   :  { %4047 = vrot.lane.b32.xlu0 %v8654_v20, %s8383_s8 }
 0x4e0   :  { %4509 = vrot.lane.b32.xlu1 %v8722_v36, %s8383_s8 }
 0x4e1   :  { %4043 = vrot.lane.b32.xlu0 %v8670_v23, %s8383_s8 }
 0x4e4   :  { %4593 = vrot.lane.b32.xlu1 %v8716_v31, %s8383_s8 }
 0x4e5   :  { %4130 = vrot.lane.b32.xlu0 %v8690_v25, %s8383_s8 }
 0x4e8   :  { %4677 = vrot.lane.b32.xlu1 %v8720_v35, %s8383_s8 }
 0x4e9   :  { %4425 = vrot.lane.b32.xlu0 %v8718_v32, %s8383_s8 }
 0x4ec   :  { %4845 = vrot.lane.b32.xlu1 %v8736_v44, %s8383_s8 }
 0x4ed   :  { %4761 = vrot.lane.b32.xlu0 %v8732_v40, %s8383_s8 }
 0x4f0   :  { %5013 = vrot.lane.b32.xlu1 %v8734_v42, %s8383_s8 }
 0x4f1   :  { %4929 = vrot.lane.b32.xlu0 %v8730_v38, %s8383_s8 }
 0x4f4   :  { %5188 = vrot.lane.b32.xlu1 %v8595_v6, %s8384_s30  ;;  %v9407_v6 = vpop.permute.xlu0 %3784 }
 0x4f5   :  { %5101 = vrot.lane.b32.xlu0 %v8591_v3, %s8384_s30 }
 0x4f8   :  { %5099 = vrot.lane.b32.xlu1 %v8574_v54, %s8384_s30 }
 0x4f9   :  { %5097 = vrot.lane.b32.xlu0 %v10479_v10, %s8384_s30 }
 0x52a   :  { %v2766_v50 = vpop.xlane.xlu1 %2765 }
 0x52b   :  { %8222 = vrcp.f32 %v2766_v50 }
 0x52c   :  { %v2763_v3 = vpop.xlane.xlu0 %2762 }
 0x52d   :  { %8224 = vrcp.f32 %v2763_v3 }
 0x530   :  { %v2772_v54 = vpop.xlane.xlu1 %2771 }
 0x531   :  { %8226 = vrcp.f32 %v2772_v54 }
 0x534   :  { %v2778_v47 = vpop.xlane.xlu1 %2777  ;;  %v2769_v43 = vpop.xlane.xlu0 %2768 }
 0x535   :  { %v8223_v34 = vpop.eup %8222  ;;  %8228 = vrcp.f32 %v2769_v43 }
 0x536   :  { %8230 = vrcp.f32 %v2778_v47  ;;  %v2826_v46 = vmul.f32 %v8223_v34, %v9280_v1 }
 0x537   :  { %v8225_v63 = vpop.eup %8224 }
 0x538   :  { %v2784_v56 = vpop.xlane.xlu1 %2783  ;;  %v2775_v18 = vpop.xlane.xlu0 %2774  ;;  %v2825_v39 = vmul.f32 %v8225_v63, %v9285_v51 }
 0x539   :  { %8232 = vrcp.f32 %v2775_v18 }
 0x53a   :  { %7770 = vmatprep.mubr.msk.f32.mxu0 %vm408_vm1, %v2825_v39  ;;  %8234 = vrcp.f32 %v2784_v56 }
 0x53b   :  { %7771 = vmatmul.mubr.msk.f32.vlgmr.msra.gmra.mrb[32].mxu0 %vm408_vm1, %v2826_v46  ;;  %v8227_v3 = vpop.eup %8226 }
 0x53c   :  { %7779 = vmatpush3.msra.mxu0 %v9098_v30  ;;  %v2790_v10 = vpop.xlane.xlu1 %2789  ;;  %v2781_v50 = vpop.xlane.xlu0 %2780  ;;  %v2828_v47 = vmul.f32 %v8227_v3, %v9291_v5 }
 0x53d   :  { %7788 = vmatprep.subr.mxu0 %v9251_v14  ;;  %8236 = vrcp.f32 %v2781_v50 }
 0x53e   :  { %8238 = vrcp.f32 %v2790_v10 }
 0x53f   :  { %v8229_v54 = vpop.eup %8228 }
 0x540   :  { %v2796_v43 = vpop.xlane.xlu1 %2795  ;;  %v2787_v51 = vpop.xlane.xlu0 %2786  ;;  %v2827_v1 = vmul.f32 %v8229_v54, %v9299_v59 }
 0x541   :  { %8240 = vrcp.f32 %v2787_v51  ;;  %v8231_v34 = vpop.eup %8230 }
 0x542   :  { %7775 = vmatprep.mubr.msk.f32.mxu1 %vm408_vm1, %v2827_v1  ;;  %8242 = vrcp.f32 %v2796_v43  ;;  %v2830_v59 = vmul.f32 %v8231_v34, %v9296_v61 }
 0x543   :  { %v8233_v30 = vpop.eup %8232  ;;  %7776 = vmatmul.mubr.msk.f32.vlgmr.msra.gmra.mrb[48].mxu1 %vm408_vm1, %v2828_v47 }
 0x544   :  { %v2802_v63 = vpop.xlane.xlu1 %2801  ;;  %v2793_v56 = vpop.xlane.xlu0 %2792  ;;  %7784 = vmatpush3.msra.mxu1 %v9105_v33  ;;  %v2829_v18 = vmul.f32 %v8233_v30, %v9309_v62 }
 0x545   :  { %7793 = vmatprep.subr.mxu1 %v9249_v53  ;;  %8244 = vrcp.f32 %v2793_v56  ;;  %v8235_v39 = vpop.eup %8234 }
 0x546   :  { %7780 = vmatprep.mubr.msk.f32.mxu0 %vm408_vm1, %v2829_v18  ;;  %8246 = vrcp.f32 %v2802_v63  ;;  %v2832_v62 = vmul.f32 %v8235_v39, %v9306_v13 }
 0x547   :  { %v8237_v5 = vpop.eup %8236  ;;  %7781 = vmatmul.mubr.msk.f32.vlgmr.msra.gmra.mrb[34].mxu0 %vm408_vm1, %v2830_v59 }
 0x548   :  { %v2808_v46 = vpop.xlane.xlu1 %2807  ;;  %v2799_v10 = vpop.xlane.xlu0 %2798  ;;  %7789 = vmatpush3.msra.mxu0 %v9251_v14  ;;  %v2831_v33 = vmul.f32 %v8237_v5, %v9318_v52 }
 0x549   :  { %7798 = vmatprep.subr.mxu0 %v9255_v58  ;;  %8248 = vrcp.f32 %v2799_v10  ;;  %v8239_v50 = vpop.eup %8238 }
 0x54a   :  { %7785 = vmatprep.mubr.msk.f32.mxu1 %vm408_vm1, %v2831_v33  ;;  %8250 = vrcp.f32 %v2808_v46  ;;  %v2834_v52 = vmul.f32 %v8239_v50, %v9315_v4 }
 0x54b   :  { %v8241_v61 = vpop.eup %8240  ;;  %7786 = vmatmul.mubr.msk.f32.vlgmr.msra.gmra.mrb[50].mxu1 %vm408_vm1, %v2832_v62 }
 0x54c   :  { %v3872_v3 = vpop.permute.xlu1 %3871  ;;  %v2805_v54 = vpop.xlane.xlu0 %2804  ;;  %7794 = vmatpush3.msra.mxu1 %v9249_v53  ;;  %v2833_v14 = vmul.f32 %v8241_v61, %v9327_v29 }
 0x54d   :  { %8252 = vrcp.f32 %v2805_v54  ;;  %7803 = vmatprep.subr.mxu1 %v9253_v28  ;;  %v8243_v43 = vpop.eup %8242 }
 0x54e   :  { %7790 = vmatprep.mubr.msk.f32.mxu0 %vm408_vm1, %v2833_v14  ;;  %v2836_v53 = vmul.f32 %v8243_v43, %v9324_v12 }
 0x54f   :  { %v8245_v13 = vpop.eup %8244  ;;  %7791 = vmatmul.mubr.msk.f32.vlgmr.msra.gmra.mrb[36].mxu0 %vm408_vm1, %v2834_v52 }
 0x550   :  { %v3959_v51 = vpop.permute.xlu1 %3958  ;;  %v3870_v1 = vpop.permute.xlu0 %3869  ;;  %7799 = vmatpush3.msra.mxu0 %v9255_v58  ;;  %v2835_v47 = vmul.f32 %v8245_v13, %v9335_v45 }
 0x551   :  { %7808 = vmatprep.subr.msk.mxu0 %vm408_vm1, %v9259_v11  ;;  %v8247_v29 = vpop.eup %8246 }
 0x552   :  { %7795 = vmatprep.mubr.msk.f32.mxu1 %vm408_vm1, %v2835_v47  ;;  %v2838_v45 = vmul.f32 %v8247_v29, %v9333_v37 }
 0x553   :  { %v8249_v4 = vpop.eup %8248  ;;  %7796 = vmatmul.mubr.msk.f32.vlgmr.msra.gmra.mrb[52].mxu1 %vm408_vm1, %v2836_v53 }
 0x554   :  { %v4135_v34 = vpop.permute.xlu1 %4134  ;;  %v3957_v30 = vpop.permute.xlu0 %3956  ;;  %7804 = vmatpush3.msra.mxu1 %v9253_v28  ;;  %v2837_v63 = vmul.f32 %v8249_v4, %v9343_v8 }
 0x555   :  { %v8251_v58 = vpop.eup %8250  ;;  %7813 = vmatprep.subr.msk.mxu1 %vm408_vm1, %v9257_v55 }
 0x556   :  { %7800 = vmatprep.mubr.msk.f32.mxu0 %vm408_vm1, %v2837_v63  ;;  %v2840_v28 = vmul.f32 %v8251_v58, %v9341_v57 }
 0x557   :  { %v8253_v56 = vpop.eup %8252  ;;  %7801 = vmatmul.mubr.msk.f32.vlgmr.msra.gmra.mrb[38].mxu0 %vm408_vm1, %v2838_v45 }
 0x558   :  { %v4046_v12 = vpop.permute.xlu1 %4045  ;;  %v4048_v18 = vpop.permute.xlu0 %4047  ;;  %v2839_v59 = vmul.f32 %v8253_v56, %v9349_v15  ;;  %7809 = vmatpush3.xpose.msk.msra.mxu0 %vm408_vm1, %v9259_v11  ;;  %7810 = vmatprep.mubr.msk.f32.mxu0 %vm408_vm1, %v9263_v48  ;;  %v10480_v48 = vld [vmem:[#allocation30_spill] sm:$0xff] }
 0x559   :  { %7818 = vmatprep.subr.msk.mxu0 %vm408_vm1, %v9265_v41 }
 0x55a   :  { %7805 = vmatprep.mubr.msk.f32.mxu1 %vm408_vm1, %v2839_v59 }
 0x55b   :  { %7806 = vmatmul.mubr.msk.f32.vlgmr.msra.gmra.mrb[54].mxu1 %vm408_vm1, %v2840_v28  ;;  %7811 = vmatmul.mubr.msk.f32.vlgmr.msra.gmra.mrb[40].mxu0 %vm408_vm1, %v9261_v60  ;;  %v10481_v60 = vld [vmem:[#allocation31_spill] sm:$0xff] }
 0x55c   :  { %7814 = vmatpush3.xpose.msk.msra.mxu1 %vm408_vm1, %v9257_v55  ;;  %v4133_v37 = vpop.permute.xlu1 %4132  ;;  %v4044_v11 = vpop.permute.xlu0 %4043  ;;  %7819 = vmatpush3.xpose.msk.msra.mxu0 %vm408_vm1, %v9265_v41 }
 0x55d   :  { %7815 = vmatprep.mubr.msk.f32.mxu1 %vm408_vm1, %v9267_v9  ;;  %7820 = vmatprep.mubr.msk.f32.mxu0 %vm408_vm1, %v9399_v2 }
 0x55e   :  { %7823 = vmatprep.subr.msk.mxu1 %vm408_vm1, %v10480_v48  ;;  %7828 = vmatprep.subr.msk.mxu0 %vm408_vm1, %v9401_v16 }
 0x55f   :  { %7816 = vmatmul.mubr.msk.f32.vlgmr.msra.gmra.mrb[56].mxu1 %vm408_vm1, %v10481_v60  ;;  %7821 = vmatmul.mubr.msk.f32.vlgmr.msra.gmra.mrb[42].mxu0 %vm408_vm1, %v9397_v0 }
 0x560   :  { %7824 = vmatpush3.xpose.msk.msra.mxu1 %vm408_vm1, %v10480_v48  ;;  %v4510_v41 = vpop.permute.xlu1 %4509  ;;  %v4131_v9 = vpop.permute.xlu0 %4130  ;;  %7829 = vmatpush3.xpose.msk.msra.mxu0 %vm408_vm1, %v9401_v16 }
 0x561   :  { %7825 = vmatprep.mubr.msk.f32.mxu1 %vm408_vm1, %v9403_v49  ;;  %7830 = vmatprep.mubr.msk.f32.mxu0 %vm408_vm1, %v3870_v1 }
 0x562   :  { %7833 = vmatprep.subr.msk.mxu1 %vm408_vm1, %v9405_v7  ;;  %7838 = vmatprep.subr.msk.mxu0 %vm408_vm1, %v4048_v18 }
 0x563   :  { %7826 = vmatmul.mubr.msk.f32.vlgmr.msra.gmra.mrb[58].mxu1 %vm408_vm1, %v9407_v6  ;;  %7831 = vmatmul.mubr.msk.f32.vlgmr.msra.gmra.mrb[44].mxu0 %vm408_vm1, %v3872_v3 }
 0x564   :  { %7834 = vmatpush3.xpose.msk.msra.mxu1 %vm408_vm1, %v9405_v7  ;;  %v4426_v55 = vpop.permute.xlu0 %4425  ;;  %7839 = vmatpush3.xpose.msk.msra.mxu0 %vm408_vm1, %v4048_v18  ;;  %v9496_v57 = vpop.permute.xlu1 %4593 }
 0x565   :  { %7835 = vmatprep.mubr.msk.f32.mxu1 %vm408_vm1, %v3957_v30  ;;  %7840 = vmatprep.mubr.msk.f32.mxu0 %vm408_vm1, %v4044_v11 }
 0x566   :  { %7843 = vmatprep.subr.msk.mxu1 %vm408_vm1, %v4135_v34  ;;  %7848 = vmatprep.subr.mxu0 %v4426_v55 }
 0x567   :  { %7836 = vmatmul.mubr.msk.f32.vlgmr.msra.gmra.mrb[60].mxu1 %vm408_vm1, %v3959_v51  ;;  %7841 = vmatmul.mubr.msk.f32.vlgmr.msra.gmra.mrb[46].mxu0 %vm408_vm1, %v4046_v12 }
 0x568   :  { %7844 = vmatpush3.xpose.msk.msra.mxu1 %vm408_vm1, %v4135_v34  ;;  %7849 = vmatpush3.msra.mxu0 %v4426_v55  ;;  %v9506_v8 = vpop.permute.xlu1 %4677 }
 0x569   :  { %7845 = vmatprep.mubr.msk.f32.mxu1 %vm408_vm1, %v4131_v9  ;;  %7853 = vmatprep.subr.mxu1 %v4510_v41 }
 0x56a   :  { %7858 = vmatprep.subr.mxu0 %v9496_v57 }
 0x56b   :  { %7846 = vmatmul.mubr.msk.f32.vlgmr.msra.gmra.mrb[62].mxu1 %vm408_vm1, %v4133_v37 }
 0x56c   :  { %7854 = vmatpush3.msra.mxu1 %v4510_v41 }
 0x56d   :  { %7863 = vmatprep.subr.mxu1 %v9506_v8 }
 0x60e   :  { %v9509_v15 = vpop.f32.mrb[32].mxu0 }
 0x60f   :  { %10482 = vst [vmem:[#allocation3_spill] sm:$0xff] %v9509_v15  ;;  %v9511_v0 = vpop.f32.mrb[33].mxu0 }
 0x610   :  { %10483 = vst [vmem:[#allocation30_spill] sm:$0xff] %v9511_v0 }
 0x616   :  { %v9515_v16 = vpop.f32.mrb[48].mxu1 }
 0x617   :  { %v9517_v49 = vpop.f32.mrb[49].mxu1 }
 0x61a   :  { %v9521_v6 = vpop.f32.mrb[34].mxu0 }
 0x61b   :  { %10484 = vst [vmem:[#allocation31_spill] sm:$0xff] %v9521_v6  ;;  %v9523_v39 = vpop.f32.mrb[35].mxu0 }
 0x61c   :  { %10485 = vst [vmem:[#allocation32_spill] sm:$0xff] %v9523_v39 }
 0x61e   :  { %v9527_v46 = vpop.f32.mrb[50].mxu1 }
 0x61f   :  { %v9529_v10 = vpop.f32.mrb[51].mxu1 }
 0x622   :  { %v9533_v62 = vpop.f32.mrb[36].mxu0 }
 0x623   :  { %10486 = vst [vmem:[#allocation33_spill] sm:$0xff] %v9533_v62  ;;  %v9535_v50 = vpop.f32.mrb[37].mxu0 }
 0x624   :  { %10487 = vst [vmem:[#allocation34_spill] sm:$0xff] %v9535_v50 }
 0x626   :  { %v9539_v3 = vpop.f32.mrb[52].mxu1 }
 0x627   :  { %10488 = vst [vmem:[#allocation35_spill] sm:$0xff] %v9539_v3  ;;  %v9541_v54 = vpop.f32.mrb[53].mxu1 }
 0x628   :  { %10489 = vst [vmem:[#allocation36_spill] sm:$0xff] %v9541_v54 }
 0x62a   :  { %v9545_v52 = vpop.f32.mrb[38].mxu0 }
 0x62b   :  { %10490 = vst [vmem:[#allocation37_spill] sm:$0xff] %v9545_v52  ;;  %v9547_v43 = vpop.f32.mrb[39].mxu0 }
 0x62c   :  { %10491 = vst [vmem:[#allocation38_spill] sm:$0xff] %v9547_v43 }
 0x62e   :  { %v9551_v51 = vpop.f32.mrb[54].mxu1  ;;  %v7812_v1 = vpop.f32.mrb[40].mxu0 }
 0x62f   :  { %10492 = vst [vmem:[#allocation39_spill] sm:$0xff] %v9551_v51  ;;  %v9553_v47 = vpop.f32.mrb[55].mxu1  ;;  %v4218_v53 = vmul.f32 0.35355338, %v7812_v1  ;;  %v3599_v4 = vpop.f32.mrb[41].mxu0 }
 0x630   :  { %10493 = vst [vmem:[#allocation40_spill] sm:$0xff] %v9553_v47  ;;  %v4217_v34 = vmul.f32 0.35355338, %v3599_v4 }
 0x631   :  { %v9559_v63 = vsel %vm407_vm2, %v4218_v53, -1e+30 }
 0x632   :  { %v7817_v58 = vpop.f32.mrb[56].mxu1  ;;  %v9563_v45 = vsel %vm407_vm2, %v4217_v34, -1e+30  ;;  %v7822_v12 = vpop.f32.mrb[42].mxu0  ;;  %v4252_v18 = vsel %vm408_vm1, %v9559_v63, -inf }
 0x633   :  { %v4220_v56 = vmul.f32 0.35355338, %v7817_v58  ;;  %v4222_v59 = vmul.f32 0.35355338, %v7822_v12  ;;  %4253 = vmax.xlane.f32.xlu1 %v4252_v18  ;;  %v3686_v28 = vpop.f32.mrb[57].mxu1  ;;  %v3773_v37 = vpop.f32.mrb[43].mxu0 }
 0x634   :  { %v4249_v11 = vsel %vm408_vm1, %v9563_v45, -inf  ;;  %v4219_v60 = vmul.f32 0.35355338, %v3686_v28  ;;  %v4221_v53 = vmul.f32 0.35355338, %v3773_v37 }
 0x635   :  { %v9571_v48 = vsel %vm407_vm2, %v4220_v56, -1e+30  ;;  %4250 = vmax.xlane.f32.xlu0 %v4249_v11  ;;  %v9575_v41 = vsel %vm407_vm2, %v4222_v59, -1e+30 }
 0x636   :  { %v7827_v9 = vpop.f32.mrb[58].mxu1  ;;  %v4258_v55 = vsel %vm408_vm1, %v9571_v48, -inf  ;;  %v7832_v4 = vpop.f32.mrb[44].mxu0  ;;  %v4264_v34 = vsel %vm408_vm1, %v9575_v41, -inf  ;;  %v9583_v56 = vsel %vm407_vm2, %v4219_v60, -1e+30 }
 0x637   :  { %v4224_v1 = vmul.f32 0.35355338, %v7827_v9  ;;  %v3860_v58 = vpop.f32.mrb[59].mxu1  ;;  %v4226_v18 = vmul.f32 0.35355338, %v7832_v4  ;;  %4265 = vmax.xlane.f32.xlu1 %v4264_v34  ;;  %v3947_v59 = vpop.f32.mrb[45].mxu0 }
 0x638   :  { %v9593_v11 = vsel %vm407_vm2, %v4221_v53, -1e+30  ;;  %v4255_v60 = vsel %vm408_vm1, %v9583_v56, -inf  ;;  %v4223_v4 = vmul.f32 0.35355338, %v3860_v58 }
 0x639   :  { %v9587_v12 = vsel %vm407_vm2, %v4224_v1, -1e+30  ;;  %4259 = vmax.xlane.f32.xlu0 %v4258_v55  ;;  %v9599_v1 = vsel %vm407_vm2, %v4226_v18, -1e+30  ;;  %v4225_v61 = vmul.f32 0.35355338, %v3947_v59 }
 0x63a   :  { %v7837_v28 = vpop.f32.mrb[60].mxu1  ;;  %v4270_v37 = vsel %vm408_vm1, %v9587_v12, -inf  ;;  %v7842_v9 = vpop.f32.mrb[46].mxu0  ;;  %v4276_v53 = vsel %vm408_vm1, %v9599_v1, -inf  ;;  %v4261_v14 = vsel %vm408_vm1, %v9593_v11, -inf }
 0x63b   :  { %v4034_v29 = vpop.f32.mrb[61].mxu1  ;;  %v4228_v55 = vmul.f32 0.35355338, %v7837_v28  ;;  %4271 = vmax.xlane.f32.xlu1 %v4270_v37  ;;  %v4121_v34 = vpop.f32.mrb[47].mxu0  ;;  %v9607_v2 = vsel %vm407_vm2, %v4223_v4, -1e+30 }
 0x63c   :  { %v4230_v18 = vmul.f32 0.35355338, %v7842_v9  ;;  %v9615_v59 = vsel %vm407_vm2, %v4225_v61, -1e+30  ;;  %v4267_v37 = vsel %vm408_vm1, %v9607_v2, -inf }
 0x63d   :  { %4256 = vmax.xlane.f32.xlu0 %v4255_v60  ;;  %v9611_v58 = vsel %vm407_vm2, %v4228_v55, -1e+30  ;;  %v4227_v4 = vmul.f32 0.35355338, %v4034_v29  ;;  %v4273_v61 = vsel %vm408_vm1, %v9615_v59, -inf }
 0x63e   :  { %v7847_v13 = vpop.f32.mrb[62].mxu1  ;;  %v4282_v28 = vsel %vm408_vm1, %v9611_v58, -inf  ;;  %v9623_v60 = vsel %vm407_vm2, %v4230_v18, -1e+30 }
 0x63f   :  { %v4208_v5 = vpop.f32.mrb[63].mxu1  ;;  %4277 = vmax.xlane.f32.xlu1 %v4276_v53  ;;  %v4232_v55 = vmul.f32 0.35355338, %v7847_v13  ;;  %v9631_v9 = vsel %vm407_vm2, %v4227_v4, -1e+30 }
 0x640   :  { %v4229_v53 = vmul.f32 0.35355338, %v4121_v34  ;;  %v4279_v29 = vsel %vm408_vm1, %v9631_v9, -inf }
 0x641   :  { %4262 = vmax.xlane.f32.xlu0 %v4261_v14  ;;  %v4288_v14 = vsel %vm408_vm1, %v9623_v60, -inf  ;;  %v9635_v33 = vsel %vm407_vm2, %v4232_v55, -1e+30  ;;  %v10495_v55 = vld [vmem:[#allocation4_spill] sm:$0xff] }
 0x642   :  { %v4294_v13 = vsel %vm408_vm1, %v9635_v33, -inf  ;;  %v9643_v18 = vsel %vm407_vm2, %v4229_v53, -1e+30  ;;  %v10499_v53 = vld [vmem:[#allocation5_spill] sm:$0xff] }
 0x643   :  { %4283 = vmax.xlane.f32.xlu1 %v4282_v28  ;;  %v4231_v28 = vmul.f32 0.35355338, %v4208_v5  ;;  %v4285_v34 = vsel %vm408_vm1, %v9643_v18, -inf  ;;  %v10497_v5 = vld [vmem:[#allocation8_spill] sm:$0xff] }
 0x645   :  { %4268 = vmax.xlane.f32.xlu0 %v4267_v37  ;;  %v9649_v37 = vsel %vm407_vm2, %v4231_v28, -1e+30  ;;  %v9667_v28 = vpop.permute.xlu0 %4761 }
 0x646   :  { %v4291_v4 = vsel %vm408_vm1, %v9649_v37, -inf }
 0x647   :  { %4289 = vmax.xlane.f32.xlu1 %v4288_v14  ;;  %v10496_v14 = vld [vmem:[#allocation6_spill] sm:$0xff] }
 0x649   :  { %4274 = vmax.xlane.f32.xlu0 %v4273_v61  ;;  %v10498_v61 = vld [vmem:[#allocation2_spill] sm:$0xff] }
 0x64b   :  { %4295 = vmax.xlane.f32.xlu1 %v4294_v13  ;;  %v10500_v13 = vld [vmem:[#allocation7_spill] sm:$0xff] }
 0x64d   :  { %4280 = vmax.xlane.f32.xlu0 %v4279_v29  ;;  %v9665_v29 = vpop.permute.xlu1 %4845 }
 0x651   :  { %4286 = vmax.xlane.f32.xlu0 %v4285_v34  ;;  %v9669_v34 = vpop.permute.xlu1 %5013 }
 0x655   :  { %4292 = vmax.xlane.f32.xlu0 %v4291_v4  ;;  %v9671_v4 = vpop.permute.xlu0 %4929 }
 0x65c   :  { %5186 = vrot.lane.b32.xlu1 %v10495_v55, %s8384_s30  ;;  %v9673_v55 = vpop.permute.xlu1 %5188 }
 0x660   :  { %5362 = vrot.lane.b32.xlu1 %v10496_v14, %s8384_s30  ;;  %v9675_v14 = vpop.permute.xlu0 %5101 }
 0x664   :  { %5273 = vrot.lane.b32.xlu1 %v10497_v5, %s8384_s30  ;;  %v9677_v5 = vpop.permute.xlu1 %5099 }
 0x66b   :  { %5184 = vrot.lane.b32.xlu0 %v10498_v61, %s8384_s30  ;;  %v9679_v61 = vpop.permute.xlu0 %5097 }
 0x66f   :  { %5275 = vrot.lane.b32.xlu0 %v10499_v53, %s8384_s30 }
 0x673   :  { %5271 = vrot.lane.b32.xlu0 %v10500_v13, %s8384_s30 }
 0x6c0   :  { %v4254_v53 = vpop.xlane.xlu1 %4253 }
 0x6c1   :  { %v4298_v7 = vsub.f32 %v9559_v63, %v4254_v53 }
 0x6c2   :  { %v4251_v13 = vpop.xlane.xlu0 %4250 }
 0x6c3   :  { %v4297_v47 = vsub.f32 %v9563_v45, %v4251_v13  ;;  %v4315_v51 = vmul.f32 1.442695, %v4298_v7 }
 0x6c4   :  { %v4266_v52 = vpop.xlane.xlu1 %4265 }
 0x6c5   :  { %v4313_v43 = vmul.f32 1.442695, %v4297_v47  ;;  %8254 = vpow2.f32 %v4315_v51  ;;  %v4302_v62 = vsub.f32 %v9575_v41, %v4266_v52 }
 0x6c6   :  { %v4260_v50 = vpop.xlane.xlu0 %4259 }
 0x6c7   :  { %8256 = vpow2.f32 %v4313_v43  ;;  %v4300_v39 = vsub.f32 %v9571_v48, %v4260_v50  ;;  %v4323_v54 = vmul.f32 1.442695, %v4302_v62 }
 0x6c8   :  { %v4272_v3 = vpop.xlane.xlu1 %4271 }
 0x6c9   :  { %v4319_v6 = vmul.f32 1.442695, %v4300_v39  ;;  %v4304_v15 = vsub.f32 %v9587_v12, %v4272_v3 }
 0x6ca   :  { %v4257_v0 = vpop.xlane.xlu0 %4256 }
 0x6cb   :  { %v4299_v63 = vsub.f32 %v9583_v56, %v4257_v0  ;;  %8258 = vpow2.f32 %v4319_v6  ;;  %v4327_v7 = vmul.f32 1.442695, %v4304_v15 }
 0x6cc   :  { %8260 = vpow2.f32 %v4323_v54  ;;  %v4278_v51 = vpop.xlane.xlu1 %4277 }
 0x6cd   :  { %v4317_v45 = vmul.f32 1.442695, %v4299_v63  ;;  %v4306_v43 = vsub.f32 %v9599_v1, %v4278_v51 }
 0x6ce   :  { %v4263_v47 = vpop.xlane.xlu0 %4262 }
 0x6cf   :  { %v4301_v52 = vsub.f32 %v9593_v11, %v4263_v47  ;;  %v9689_v41 = vpop.eup %8254  ;;  %8262 = vpow2.f32 %v4317_v45  ;;  %v4331_v0 = vmul.f32 1.442695, %v4306_v43 }
 0x6d0   :  { %v4348_v50 = vsel %vm408_vm1, %v9689_v41, 0.0  ;;  %8264 = vpow2.f32 %v4327_v7  ;;  %v4284_v6 = vpop.xlane.xlu1 %4283 }
 0x6d1   :  { %v9691_v39 = vpop.eup %8256  ;;  %v4321_v62 = vmul.f32 1.442695, %v4301_v52  ;;  %4349 = vadd.xlane.f32.xlu1 %v4348_v50  ;;  %v4308_v54 = vsub.f32 %v9611_v58, %v4284_v6 }
 0x6d2   :  { %v4269_v15 = vpop.xlane.xlu0 %4268  ;;  %v4345_v3 = vsel %vm408_vm1, %v9691_v39, 0.0 }
 0x6d3   :  { %v4303_v48 = vsub.f32 %v9607_v2, %v4269_v15  ;;  %4346 = vadd.xlane.f32.xlu0 %v4345_v3  ;;  %8266 = vpow2.f32 %v4321_v62  ;;  %v4335_v11 = vmul.f32 1.442695, %v4308_v54 }
 0x6d4   :  { %8268 = vpow2.f32 %v4331_v0  ;;  %v4290_v1 = vpop.xlane.xlu1 %4289 }
 0x6d5   :  { %v4325_v56 = vmul.f32 1.442695, %v4303_v48  ;;  %v9699_v12 = vpop.eup %8258  ;;  %v4310_v13 = vsub.f32 %v9623_v60, %v4290_v1 }
 0x6d6   :  { %v4275_v53 = vpop.xlane.xlu0 %4274  ;;  %v4354_v45 = vsel %vm408_vm1, %v9699_v12, 0.0  ;;  %v9705_v7 = vpop.eup %8260 }
 0x6d7   :  { %v4305_v63 = vsub.f32 %v9615_v59, %v4275_v53  ;;  %8270 = vpow2.f32 %v4325_v56  ;;  %4355 = vadd.xlane.f32.xlu1 %v4354_v45  ;;  %v4339_v51 = vmul.f32 1.442695, %v4310_v13  ;;  %v4360_v59 = vsel %vm408_vm1, %v9705_v7, 0.0 }
 0x6d8   :  { %8272 = vpow2.f32 %v4335_v11  ;;  %v4296_v47 = vpop.xlane.xlu1 %4295 }
 0x6d9   :  { %v4329_v2 = vmul.f32 1.442695, %v4305_v63  ;;  %v9707_v58 = vpop.eup %8262  ;;  %v4312_v52 = vsub.f32 %v9635_v33, %v4296_v47 }
 0x6da   :  { %v4281_v43 = vpop.xlane.xlu0 %4280  ;;  %v4351_v62 = vsel %vm408_vm1, %v9707_v58, 0.0  ;;  %v9715_v50 = vpop.eup %8264 }
 0x6db   :  { %v4307_v60 = vsub.f32 %v9631_v9, %v4281_v43  ;;  %8274 = vpow2.f32 %v4329_v2  ;;  %4361 = vadd.xlane.f32.xlu1 %v4360_v59  ;;  %4352 = vadd.xlane.f32.xlu0 %v4351_v62  ;;  %v4343_v15 = vmul.f32 1.442695, %v4312_v52  ;;  %v4366_v9 = vsel %vm408_vm1, %v9715_v50, 0.0 }
 0x6dc   :  { %8276 = vpow2.f32 %v4339_v51 }
 0x6dd   :  { %v4333_v0 = vmul.f32 1.442695, %v4307_v60  ;;  %v9717_v6 = vpop.eup %8266 }
 0x6de   :  { %v4287_v3 = vpop.xlane.xlu0 %4286  ;;  %v4357_v54 = vsel %vm408_vm1, %v9717_v6, 0.0  ;;  %v9724_v48 = vpop.eup %8268 }
 0x6df   :  { %v4309_v33 = vsub.f32 %v9643_v18, %v4287_v3  ;;  %8278 = vpow2.f32 %v4333_v0  ;;  %4367 = vadd.xlane.f32.xlu1 %v4366_v9  ;;  %4358 = vadd.xlane.f32.xlu0 %v4357_v54  ;;  %v4372_v18 = vsel %vm408_vm1, %v9724_v48, 0.0  ;;  %v10501_v9 = vld [vmem:[#allocation10_spill] sm:$0xff]  ;;  %v10502_v54 = vld [vmem:[#allocation12_spill] sm:$0xff] }
 0x6e0   :  { %8280 = vpow2.f32 %v4343_v15 }
 0x6e1   :  { %v4337_v56 = vmul.f32 1.442695, %v4309_v33  ;;  %v9726_v11 = vpop.eup %8270 }
 0x6e2   :  { %v4293_v1 = vpop.xlane.xlu0 %4292  ;;  %v4363_v13 = vsel %vm408_vm1, %v9726_v11, 0.0  ;;  %v9733_v63 = vpop.eup %8272 }
 0x6e3   :  { %8282 = vpow2.f32 %v4337_v56  ;;  %v4311_v53 = vsub.f32 %v9649_v37, %v4293_v1  ;;  %4373 = vadd.xlane.f32.xlu1 %v4372_v18  ;;  %4364 = vadd.xlane.f32.xlu0 %v4363_v13  ;;  %v4378_v51 = vsel %vm408_vm1, %v9733_v63, 0.0  ;;  %v10503_v56 = vld [vmem:[#allocation9_spill] sm:$0xff]  ;;  %v10504_v1 = vld [vmem:[#allocation11_spill] sm:$0xff] }
 0x6e5   :  { %v4341_v45 = vmul.f32 1.442695, %v4311_v53  ;;  %v9735_v2 = vpop.eup %8274 }
 0x6e6   :  { %v4369_v37 = vsel %vm408_vm1, %v9735_v2, 0.0  ;;  %v9741_v47 = vpop.eup %8276 }
 0x6e7   :  { %8284 = vpow2.f32 %v4341_v45  ;;  %4379 = vadd.xlane.f32.xlu1 %v4378_v51  ;;  %4370 = vadd.xlane.f32.xlu0 %v4369_v37  ;;  %v4384_v52 = vsel %vm408_vm1, %v9741_v47, 0.0 }
 0x6e9   :  { %v9743_v43 = vpop.eup %8278 }
 0x6ea   :  { %v4375_v60 = vsel %vm408_vm1, %v9743_v43, 0.0  ;;  %v9749_v59 = vpop.eup %8280 }
 0x6eb   :  { %4385 = vadd.xlane.f32.xlu1 %v4384_v52  ;;  %4376 = vadd.xlane.f32.xlu0 %v4375_v60  ;;  %v4390_v15 = vsel %vm408_vm1, %v9749_v59, 0.0 }
 0x6ed   :  { %v9751_v62 = vpop.eup %8282 }
 0x6ee   :  { %v4381_v0 = vsel %vm408_vm1, %v9751_v62, 0.0 }
 0x6ef   :  { %4391 = vadd.xlane.f32.xlu1 %v4390_v15  ;;  %4382 = vadd.xlane.f32.xlu0 %v4381_v0 }
 0x6f1   :  { %v9757_v3 = vpop.eup %8284 }
 0x6f2   :  { %v4387_v33 = vsel %vm408_vm1, %v9757_v3, 0.0 }
 0x6f3   :  { %4388 = vadd.xlane.f32.xlu0 %v4387_v33 }
 0x700   :  { %5360 = vrot.lane.b32.xlu1 %v10501_v9, %s8384_s30 }
 0x704   :  { %5536 = vrot.lane.b32.xlu1 %v10502_v54, %s8384_s30 }
 0x708   :  { %5447 = vrot.lane.b32.xlu1 %v8661_v21, %s8384_s30  ;;  %v9789_v21 = vpop.permute.xlu1 %5186 }
 0x709   :  { %5358 = vrot.lane.b32.xlu0 %v10503_v56, %s8384_s30 }
 0x70c   :  { %5534 = vrot.lane.b32.xlu1 %v8682_v24, %s8384_s30 }
 0x70d   :  { %5449 = vrot.lane.b32.xlu0 %v10504_v1, %s8384_s30 }
 0x710   :  { %5710 = vrot.lane.b32.xlu1 %v8663_v22, %s8384_s30  ;;  %v9793_v22 = vpop.permute.xlu1 %5362 }
 0x711   :  { %5445 = vrot.lane.b32.xlu0 %v8642_v17, %s8384_s30  ;;  %v9791_v17 = vpop.permute.xlu0 %5184 }
 0x714   :  { %5621 = vrot.lane.b32.xlu1 %v8697_v26, %s8384_s30 }
 0x715   :  { %5532 = vrot.lane.b32.xlu0 %v8652_v19, %s8384_s30  ;;  %v9795_v24 = vpop.permute.xlu0 %5275  ;;  %v9797_v19 = vpop.permute.xlu1 %5273 }
 0x718   :  { %5708 = vrot.lane.b32.xlu1 %v8707_v27, %s8384_s30 }
 0x719   :  { %5623 = vrot.lane.b32.xlu0 %v8654_v20, %s8384_s30  ;;  %v9799_v26 = vpop.permute.xlu0 %5271 }
 0x71d   :  { %5619 = vrot.lane.b32.xlu0 %v8670_v23, %s8384_s30 }
 0x721   :  { %5706 = vrot.lane.b32.xlu0 %v8690_v25, %s8384_s30 }
 0x75e   :  { %v4350_v27 = vpop.xlane.xlu1 %4349 }
 0x75f   :  { %8286 = vrcp.f32 %v4350_v27 }
 0x760   :  { %v4347_v20 = vpop.xlane.xlu0 %4346 }
 0x761   :  { %8288 = vrcp.f32 %v4347_v20 }
 0x764   :  { %v4356_v23 = vpop.xlane.xlu1 %4355 }
 0x765   :  { %8290 = vrcp.f32 %v4356_v23 }
 0x768   :  { %v4362_v53 = vpop.xlane.xlu1 %4361  ;;  %v4353_v18 = vpop.xlane.xlu0 %4352 }
 0x769   :  { %v8287_v25 = vpop.eup %8286  ;;  %8292 = vrcp.f32 %v4353_v18 }
 0x76a   :  { %v4410_v51 = vmul.f32 %v8287_v25, %v9689_v41  ;;  %8294 = vrcp.f32 %v4362_v53 }
 0x76b   :  { %v8289_v13 = vpop.eup %8288 }
 0x76c   :  { %v4409_v45 = vmul.f32 %v8289_v13, %v9691_v39  ;;  %v4368_v37 = vpop.xlane.xlu1 %4367  ;;  %v4359_v52 = vpop.xlane.xlu0 %4358 }
 0x76d   :  { %8296 = vrcp.f32 %v4359_v52 }
 0x76e   :  { %7850 = vmatprep.mubr.msk.f32.mxu0 %vm408_vm1, %v4409_v45  ;;  %8298 = vrcp.f32 %v4368_v37 }
 0x76f   :  { %7851 = vmatmul.mubr.msk.f32.vlgmr.msra.gmra.mrb[48].mxu0 %vm408_vm1, %v4410_v51  ;;  %v8291_v15 = vpop.eup %8290 }
 0x770   :  { %7859 = vmatpush3.msra.mxu0 %v9496_v57  ;;  %v4374_v60 = vpop.xlane.xlu1 %4373  ;;  %v4365_v0 = vpop.xlane.xlu0 %4364  ;;  %v4412_v54 = vmul.f32 %v8291_v15, %v9699_v12 }
 0x771   :  { %7868 = vmatprep.subr.mxu0 %v9667_v28  ;;  %8300 = vrcp.f32 %v4365_v0 }
 0x772   :  { %8302 = vrcp.f32 %v4374_v60 }
 0x773   :  { %v8293_v39 = vpop.eup %8292 }
 0x774   :  { %v4380_v33 = vpop.xlane.xlu1 %4379  ;;  %v4371_v41 = vpop.xlane.xlu0 %4370  ;;  %v4411_v9 = vmul.f32 %v8293_v39, %v9707_v58 }
 0x775   :  { %8304 = vrcp.f32 %v4371_v41  ;;  %v8295_v56 = vpop.eup %8294 }
 0x776   :  { %7855 = vmatprep.mubr.msk.f32.mxu1 %vm408_vm1, %v4411_v9  ;;  %8306 = vrcp.f32 %v4380_v33  ;;  %v4414_v23 = vmul.f32 %v8295_v56, %v9705_v7 }
 0x777   :  { %v8297_v57 = vpop.eup %8296  ;;  %7856 = vmatmul.mubr.msk.f32.vlgmr.msra.gmra.mrb[64].mxu1 %vm408_vm1, %v4412_v54 }
 0x778   :  { %v4386_v1 = vpop.xlane.xlu1 %4385  ;;  %v4377_v27 = vpop.xlane.xlu0 %4376  ;;  %7864 = vmatpush3.msra.mxu1 %v9506_v8  ;;  %v4413_v20 = vmul.f32 %v8297_v57, %v9717_v6 }
 0x779   :  { %7873 = vmatprep.subr.mxu1 %v9665_v29  ;;  %8308 = vrcp.f32 %v4377_v27  ;;  %v8299_v12 = vpop.eup %8298 }
 0x77a   :  { %7860 = vmatprep.mubr.msk.f32.mxu0 %vm408_vm1, %v4413_v20  ;;  %8310 = vrcp.f32 %v4386_v1  ;;  %v4416_v6 = vmul.f32 %v8299_v12, %v9715_v50 }
 0x77b   :  { %v8301_v58 = vpop.eup %8300  ;;  %7861 = vmatmul.mubr.msk.f32.vlgmr.msra.gmra.mrb[50].mxu0 %vm408_vm1, %v4414_v23 }
 0x77c   :  { %v4392_v53 = vpop.xlane.xlu1 %4391  ;;  %v4383_v18 = vpop.xlane.xlu0 %4382  ;;  %7869 = vmatpush3.msra.mxu0 %v9667_v28  ;;  %v4415_v8 = vmul.f32 %v8301_v58, %v9726_v11 }
 0x77d   :  { %7878 = vmatprep.subr.mxu0 %v9671_v4  ;;  %8312 = vrcp.f32 %v4383_v18  ;;  %v8303_v7 = vpop.eup %8302 }
 0x77e   :  { %7865 = vmatprep.mubr.msk.f32.mxu1 %vm408_vm1, %v4415_v8  ;;  %8314 = vrcp.f32 %v4392_v53  ;;  %v4418_v11 = vmul.f32 %v8303_v7, %v9724_v48 }
 0x77f   :  { %v8305_v25 = vpop.eup %8304  ;;  %7866 = vmatmul.mubr.msk.f32.vlgmr.msra.gmra.mrb[66].mxu1 %vm408_vm1, %v4416_v6 }
 0x780   :  { %v5361_v13 = vpop.permute.xlu1 %5360  ;;  %v4389_v45 = vpop.xlane.xlu0 %4388  ;;  %7874 = vmatpush3.msra.mxu1 %v9665_v29  ;;  %v4417_v28 = vmul.f32 %v8305_v25, %v9735_v2 }
 0x781   :  { %8316 = vrcp.f32 %v4389_v45  ;;  %7883 = vmatprep.subr.mxu1 %v9669_v34  ;;  %v8307_v50 = vpop.eup %8306 }
 0x782   :  { %7870 = vmatprep.mubr.msk.f32.mxu0 %vm408_vm1, %v4417_v28  ;;  %v4420_v29 = vmul.f32 %v8307_v50, %v9733_v63 }
 0x783   :  { %v8309_v51 = vpop.eup %8308  ;;  %7871 = vmatmul.mubr.msk.f32.vlgmr.msra.gmra.mrb[52].mxu0 %vm408_vm1, %v4418_v11 }
 0x784   :  { %v5537_v37 = vpop.permute.xlu1 %5536  ;;  %v5359_v52 = vpop.permute.xlu0 %5358  ;;  %7879 = vmatpush3.msra.mxu0 %v9671_v4  ;;  %v4419_v60 = vmul.f32 %v8309_v51, %v9743_v43 }
 0x785   :  { %7888 = vmatprep.subr.msk.mxu0 %vm408_vm1, %v9675_v14  ;;  %v8311_v48 = vpop.eup %8310 }
 0x786   :  { %7875 = vmatprep.mubr.msk.f32.mxu1 %vm408_vm1, %v4419_v60  ;;  %v4422_v43 = vmul.f32 %v8311_v48, %v9741_v47 }
 0x787   :  { %v8313_v2 = vpop.eup %8312  ;;  %7876 = vmatmul.mubr.msk.f32.vlgmr.msra.gmra.mrb[68].mxu1 %vm408_vm1, %v4420_v29 }
 0x788   :  { %v5448_v0 = vpop.permute.xlu1 %5447  ;;  %v5450_v15 = vpop.permute.xlu0 %5449  ;;  %7884 = vmatpush3.msra.mxu1 %v9669_v34  ;;  %v4421_v39 = vmul.f32 %v8313_v2, %v9751_v62 }
 0x789   :  { %v8315_v4 = vpop.eup %8314  ;;  %7893 = vmatprep.subr.msk.mxu1 %vm408_vm1, %v9673_v55 }
 0x78a   :  { %7880 = vmatprep.mubr.msk.f32.mxu0 %vm408_vm1, %v4421_v39  ;;  %v4424_v54 = vmul.f32 %v8315_v4, %v9749_v59 }
 0x78b   :  { %v8317_v63 = vpop.eup %8316  ;;  %7881 = vmatmul.mubr.msk.f32.vlgmr.msra.gmra.mrb[54].mxu0 %vm408_vm1, %v4422_v43 }
 0x78c   :  { %v5535_v33 = vpop.permute.xlu1 %5534  ;;  %v5446_v41 = vpop.permute.xlu0 %5445  ;;  %v4423_v9 = vmul.f32 %v8317_v63, %v9757_v3  ;;  %7889 = vmatpush3.xpose.msk.msra.mxu0 %vm408_vm1, %v9675_v14  ;;  %7890 = vmatprep.mubr.msk.f32.mxu0 %vm408_vm1, %v9679_v61 }
 0x78d   :  { %7898 = vmatprep.subr.msk.mxu0 %vm408_vm1, %v9795_v24 }
 0x78e   :  { %7885 = vmatprep.mubr.msk.f32.mxu1 %vm408_vm1, %v4423_v9 }
 0x78f   :  { %7886 = vmatmul.mubr.msk.f32.vlgmr.msra.gmra.mrb[70].mxu1 %vm408_vm1, %v4424_v54  ;;  %7891 = vmatmul.mubr.msk.f32.vlgmr.msra.gmra.mrb[56].mxu0 %vm408_vm1, %v9677_v5 }
 0x790   :  { %7894 = vmatpush3.xpose.msk.msra.mxu1 %vm408_vm1, %v9673_v55  ;;  %v5533_v34 = vpop.permute.xlu0 %5532  ;;  %7899 = vmatpush3.xpose.msk.msra.mxu0 %vm408_vm1, %v9795_v24  ;;  %v5711_v14 = vpop.permute.xlu1 %5710 }
 0x791   :  { %7895 = vmatprep.mubr.msk.f32.mxu1 %vm408_vm1, %v9791_v17  ;;  %7900 = vmatprep.mubr.msk.f32.mxu0 %vm408_vm1, %v9799_v26 }
 0x792   :  { %7903 = vmatprep.subr.msk.mxu1 %vm408_vm1, %v9793_v22  ;;  %7908 = vmatprep.subr.msk.mxu0 %vm408_vm1, %v5450_v15 }
 0x793   :  { %7896 = vmatmul.mubr.msk.f32.vlgmr.msra.gmra.mrb[72].mxu1 %vm408_vm1, %v9789_v21  ;;  %7901 = vmatmul.mubr.msk.f32.vlgmr.msra.gmra.mrb[58].mxu0 %vm408_vm1, %v9797_v19 }
 0x794   :  { %7904 = vmatpush3.xpose.msk.msra.mxu1 %vm408_vm1, %v9793_v22  ;;  %v5624_v55 = vpop.permute.xlu0 %5623  ;;  %7909 = vmatpush3.xpose.msk.msra.mxu0 %vm408_vm1, %v5450_v15  ;;  %v5622_v5 = vpop.permute.xlu1 %5621 }
 0x795   :  { %7905 = vmatprep.mubr.msk.f32.mxu1 %vm408_vm1, %v5359_v52  ;;  %7910 = vmatprep.mubr.msk.f32.mxu0 %vm408_vm1, %v5446_v41 }
 0x796   :  { %7913 = vmatprep.subr.msk.mxu1 %vm408_vm1, %v5537_v37  ;;  %7918 = vmatprep.subr.msk.mxu0 %vm408_vm1, %v5624_v55 }
 0x797   :  { %7906 = vmatmul.mubr.msk.f32.vlgmr.msra.gmra.mrb[74].mxu1 %vm408_vm1, %v5361_v13  ;;  %7911 = vmatmul.mubr.msk.f32.vlgmr.msra.gmra.mrb[60].mxu0 %vm408_vm1, %v5448_v0 }
 0x798   :  { %7914 = vmatpush3.xpose.msk.msra.mxu1 %vm408_vm1, %v5537_v37  ;;  %v5620_v61 = vpop.permute.xlu0 %5619  ;;  %7919 = vmatpush3.xpose.msk.msra.mxu0 %vm408_vm1, %v5624_v55  ;;  %v5709_v59 = vpop.permute.xlu1 %5708 }
 0x799   :  { %7915 = vmatprep.mubr.msk.f32.mxu1 %vm408_vm1, %v5533_v34  ;;  %7923 = vmatprep.subr.msk.mxu1 %vm408_vm1, %v5711_v14 }
 0x79a   :  { %7920 = vmatprep.mubr.msk.f32.mxu0 %vm408_vm1, %v5620_v61 }
 0x79b   :  { %7916 = vmatmul.mubr.msk.f32.vlgmr.msra.gmra.mrb[76].mxu1 %vm408_vm1, %v5535_v33  ;;  %7921 = vmatmul.mubr.msk.f32.vlgmr.msra.gmra.mrb[62].mxu0 %vm408_vm1, %v5622_v5 }
 0x79c   :  { %7924 = vmatpush3.xpose.msk.msra.mxu1 %vm408_vm1, %v5711_v14  ;;  %v5707_v47 = vpop.permute.xlu0 %5706 }
 0x79d   :  { %7925 = vmatprep.mubr.msk.f32.mxu1 %vm408_vm1, %v5707_v47 }
 0x79f   :  { %7926 = vmatmul.mubr.msk.f32.vlgmr.msra.gmra.mrb[78].mxu1 %vm408_vm1, %v5709_v59 }
 0x842   :  { %v9889_v62 = vpop.f32.mrb[48].mxu0 }
 0x843   :  { %v9891_v3 = vpop.f32.mrb[49].mxu0 }
 0x844   :  { %v8008_v21 = vpack.i.bf16 %v9889_v62, %v9891_v3 }
 0x84a   :  { %v9895_v17 = vpop.f32.mrb[64].mxu1 }
 0x84b   :  { %v9897_v22 = vpop.f32.mrb[65].mxu1 }
 0x84c   :  { %v8013_v24 = vpack.i.bf16 %v9895_v17, %v9897_v22  ;;  %v10516_v22 = vld [vmem:[#allocation33_spill] sm:$0xff] }
 0x84e   :  { %v9901_v19 = vpop.f32.mrb[50].mxu0 }
 0x84f   :  { %v9903_v26 = vpop.f32.mrb[51].mxu0 }
 0x850   :  { %v8028_v56 = vpack.i.bf16 %v9901_v19, %v9903_v26 }
 0x852   :  { %v9907_v57 = vpop.f32.mrb[66].mxu1 }
 0x853   :  { %v9909_v1 = vpop.f32.mrb[67].mxu1 }
 0x854   :  { %v8033_v27 = vpack.i.bf16 %v9907_v57, %v9909_v1 }
 0x856   :  { %v9913_v20 = vpop.f32.mrb[52].mxu0 }
 0x857   :  { %v9915_v23 = vpop.f32.mrb[53].mxu0 }
 0x858   :  { %v8053_v12 = vpack.i.bf16 %v9913_v20, %v9915_v23  ;;  %v10519_v20 = vld [vmem:[#allocation37_spill] sm:$0xff]  ;;  %v10520_v23 = vld [vmem:[#allocation38_spill] sm:$0xff] }
 0x85a   :  { %v9919_v58 = vpop.f32.mrb[68].mxu1 }
 0x85b   :  { %v9921_v53 = vpop.f32.mrb[69].mxu1 }
 0x85c   :  { %v8063_v18 = vpack.i.bf16 %v9919_v58, %v9921_v53 }
 0x85e   :  { %v9925_v8 = vpop.f32.mrb[54].mxu0 }
 0x85f   :  { %v9927_v6 = vpop.f32.mrb[55].mxu0 }
 0x860   :  { %v8093_v7 = vpack.i.bf16 %v9925_v8, %v9927_v6 }
 0x862   :  { %v9931_v25 = vpop.f32.mrb[70].mxu1  ;;  %v7892_v13 = vpop.f32.mrb[56].mxu0 }
 0x863   :  { %v9933_v45 = vpop.f32.mrb[71].mxu1  ;;  %v5794_v28 = vmul.f32 0.35355338, %v7892_v13  ;;  %v5175_v50 = vpop.f32.mrb[57].mxu0 }
 0x864   :  { %v8103_v11 = vpack.i.bf16 %v9931_v25, %v9933_v45  ;;  %v5793_v51 = vmul.f32 0.35355338, %v5175_v50 }
 0x865   :  { %v9939_v37 = vsel %vm407_vm2, %v5794_v28, -1e+30 }
 0x866   :  { %v7897_v52 = vpop.f32.mrb[72].mxu1  ;;  %v9943_v60 = vsel %vm407_vm2, %v5793_v51, -1e+30  ;;  %v7902_v48 = vpop.f32.mrb[58].mxu0  ;;  %v5828_v2 = vsel %vm408_vm1, %v9939_v37, -inf }
 0x867   :  { %v5796_v29 = vmul.f32 0.35355338, %v7897_v52  ;;  %v5798_v0 = vmul.f32 0.35355338, %v7902_v48  ;;  %5829 = vmax.xlane.f32.xlu1 %v5828_v2  ;;  %v5262_v15 = vpop.f32.mrb[73].mxu1  ;;  %v5349_v39 = vpop.f32.mrb[59].mxu0 }
 0x868   :  { %v5825_v4 = vsel %vm408_vm1, %v9943_v60, -inf  ;;  %v5795_v63 = vmul.f32 0.35355338, %v5262_v15  ;;  %v5797_v34 = vmul.f32 0.35355338, %v5349_v39 }
 0x869   :  { %v9951_v43 = vsel %vm407_vm2, %v5796_v29, -1e+30  ;;  %5826 = vmax.xlane.f32.xlu0 %v5825_v4  ;;  %v9955_v33 = vsel %vm407_vm2, %v5798_v0, -1e+30 }
 0x86a   :  { %v7907_v41 = vpop.f32.mrb[74].mxu1  ;;  %v5834_v9 = vsel %vm408_vm1, %v9951_v43, -inf  ;;  %v7912_v14 = vpop.f32.mrb[60].mxu0  ;;  %v5840_v55 = vsel %vm408_vm1, %v9955_v33, -inf  ;;  %v9963_v61 = vsel %vm407_vm2, %v5795_v63, -1e+30 }
 0x86b   :  { %v5800_v54 = vmul.f32 0.35355338, %v7907_v41  ;;  %v5436_v5 = vpop.f32.mrb[75].mxu1  ;;  %v5802_v59 = vmul.f32 0.35355338, %v7912_v14  ;;  %5841 = vmax.xlane.f32.xlu1 %v5840_v55  ;;  %v5523_v13 = vpop.f32.mrb[61].mxu0 }
 0x86c   :  { %v9973_v51 = vsel %vm407_vm2, %v5797_v34, -1e+30  ;;  %v5831_v48 = vsel %vm408_vm1, %v9963_v61, -inf  ;;  %v5799_v0 = vmul.f32 0.35355338, %v5436_v5 }
 0x86d   :  { %v9967_v47 = vsel %vm407_vm2, %v5800_v54, -1e+30  ;;  %5835 = vmax.xlane.f32.xlu0 %v5834_v9  ;;  %v9979_v2 = vsel %vm407_vm2, %v5802_v59, -1e+30  ;;  %v5801_v63 = vmul.f32 0.35355338, %v5523_v13 }
 0x86e   :  { %v7917_v28 = vpop.f32.mrb[76].mxu1  ;;  %v5846_v50 = vsel %vm408_vm1, %v9967_v47, -inf  ;;  %v7922_v52 = vpop.f32.mrb[62].mxu0  ;;  %v5852_v41 = vsel %vm408_vm1, %v9979_v2, -inf  ;;  %v5837_v54 = vsel %vm408_vm1, %v9973_v51, -inf }
 0x86f   :  { %v5610_v29 = vpop.f32.mrb[77].mxu1  ;;  %v5804_v15 = vmul.f32 0.35355338, %v7917_v28  ;;  %5847 = vmax.xlane.f32.xlu1 %v5846_v50  ;;  %v5697_v39 = vpop.f32.mrb[63].mxu0  ;;  %v9987_v34 = vsel %vm407_vm2, %v5799_v0, -1e+30 }
 0x870   :  { %v5806_v55 = vmul.f32 0.35355338, %v7922_v52  ;;  %v9995_v5 = vsel %vm407_vm2, %v5801_v63, -1e+30  ;;  %v5843_v13 = vsel %vm408_vm1, %v9987_v34, -inf }
 0x871   :  { %5832 = vmax.xlane.f32.xlu0 %v5831_v48  ;;  %v9991_v14 = vsel %vm407_vm2, %v5804_v15, -1e+30  ;;  %v5803_v50 = vmul.f32 0.35355338, %v5610_v29  ;;  %v5849_v0 = vsel %vm408_vm1, %v9995_v5, -inf }
 0x872   :  { %v7927_v4 = vpop.f32.mrb[78].mxu1  ;;  %v5858_v59 = vsel %vm408_vm1, %v9991_v14, -inf  ;;  %v10003_v28 = vsel %vm407_vm2, %v5806_v55, -1e+30  ;;  %v5805_v63 = vmul.f32 0.35355338, %v5697_v39 }
 0x873   :  { %v5784_v9 = vpop.f32.mrb[79].mxu1  ;;  %5853 = vmax.xlane.f32.xlu1 %v5852_v41  ;;  %v5808_v48 = vmul.f32 0.35355338, %v7927_v4  ;;  %v5864_v52 = vsel %vm408_vm1, %v10003_v28, -inf  ;;  %v10011_v15 = vsel %vm407_vm2, %v5803_v50, -1e+30 }
 0x874   :  { %v5855_v4 = vsel %vm408_vm1, %v10011_v15, -inf  ;;  %v5807_v55 = vmul.f32 0.35355338, %v5784_v9 }
 0x875   :  { %5838 = vmax.xlane.f32.xlu0 %v5837_v54  ;;  %v10015_v41 = vsel %vm407_vm2, %v5808_v48, -1e+30  ;;  %v10023_v54 = vsel %vm407_vm2, %v5805_v63, -1e+30 }
 0x876   :  { %v5870_v29 = vsel %vm408_vm1, %v10015_v41, -inf  ;;  %v5861_v39 = vsel %vm408_vm1, %v10023_v54, -inf }
 0x877   :  { %5859 = vmax.xlane.f32.xlu1 %v5858_v59  ;;  %v10029_v59 = vsel %vm407_vm2, %v5807_v55, -1e+30 }
 0x879   :  { %5844 = vmax.xlane.f32.xlu0 %v5843_v13  ;;  %v5867_v13 = vsel %vm408_vm1, %v10029_v59, -inf }
 0x87b   :  { %5865 = vmax.xlane.f32.xlu1 %v5864_v52 }
 0x87d   :  { %5850 = vmax.xlane.f32.xlu0 %v5849_v0 }
 0x87f   :  { %5871 = vmax.xlane.f32.xlu1 %v5870_v29 }
 0x881   :  { %5856 = vmax.xlane.f32.xlu0 %v5855_v4 }
 0x885   :  { %5862 = vmax.xlane.f32.xlu0 %v5861_v39 }
 0x889   :  { %5868 = vmax.xlane.f32.xlu0 %v5867_v13 }
 0x890   :  { %6085 = vrot.lane.b32.xlu1 %v8722_v36, %s8384_s30 }
 0x894   :  { %6169 = vrot.lane.b32.xlu1 %v8716_v31, %s8384_s30 }
 0x898   :  { %6253 = vrot.lane.b32.xlu1 %v8720_v35, %s8384_s30 }
 0x89c   :  { %6421 = vrot.lane.b32.xlu1 %v8736_v44, %s8384_s30 }
 0x89f   :  { %6001 = vrot.lane.b32.xlu0 %v8718_v32, %s8384_s30 }
 0x8a3   :  { %6337 = vrot.lane.b32.xlu0 %v8732_v40, %s8384_s30 }
 0x8f4   :  { %v5830_v30 = vpop.xlane.xlu1 %5829 }
 0x8f5   :  { %v5874_v9 = vsub.f32 %v9939_v37, %v5830_v30 }
 0x8f6   :  { %v5827_v50 = vpop.xlane.xlu0 %5826 }
 0x8f7   :  { %v5873_v36 = vsub.f32 %v9943_v60, %v5827_v50  ;;  %v5891_v48 = vmul.f32 1.442695, %v5874_v9 }
 0x8f8   :  { %v5842_v52 = vpop.xlane.xlu1 %5841 }
 0x8f9   :  { %v5889_v31 = vmul.f32 1.442695, %v5873_v36  ;;  %8318 = vpow2.f32 %v5891_v48  ;;  %v5878_v44 = vsub.f32 %v9955_v33, %v5842_v52 }
 0x8fa   :  { %v5836_v35 = vpop.xlane.xlu0 %5835 }
 0x8fb   :  { %8320 = vpow2.f32 %v5889_v31  ;;  %v5876_v0 = vsub.f32 %v9951_v43, %v5836_v35  ;;  %v5899_v63 = vmul.f32 1.442695, %v5878_v44 }
 0x8fc   :  { %v5848_v29 = vpop.xlane.xlu1 %5847 }
 0x8fd   :  { %v5895_v32 = vmul.f32 1.442695, %v5876_v0  ;;  %v5880_v4 = vsub.f32 %v9967_v47, %v5848_v29 }
 0x8fe   :  { %v5833_v40 = vpop.xlane.xlu0 %5832 }
 0x8ff   :  { %v5875_v37 = vsub.f32 %v9963_v61, %v5833_v40  ;;  %8322 = vpow2.f32 %v5895_v32  ;;  %v5903_v55 = vmul.f32 1.442695, %v5880_v4 }
 0x900   :  { %8324 = vpow2.f32 %v5899_v63  ;;  %v5854_v39 = vpop.xlane.xlu1 %5853 }
 0x901   :  { %v5893_v60 = vmul.f32 1.442695, %v5875_v37  ;;  %v5882_v30 = vsub.f32 %v9979_v2, %v5854_v39 }
 0x902   :  { %v5839_v13 = vpop.xlane.xlu0 %5838 }
 0x903   :  { %v5877_v33 = vsub.f32 %v9973_v51, %v5839_v13  ;;  %v10053_v9 = vpop.eup %8318  ;;  %8326 = vpow2.f32 %v5893_v60  ;;  %v5907_v61 = vmul.f32 1.442695, %v5882_v30 }
 0x904   :  { %v5924_v47 = vsel %vm408_vm1, %v10053_v9, 0.0  ;;  %8328 = vpow2.f32 %v5903_v55  ;;  %v5860_v36 = vpop.xlane.xlu1 %5859 }
 0x905   :  { %v10055_v43 = vpop.eup %8320  ;;  %v5897_v50 = vmul.f32 1.442695, %v5877_v33  ;;  %5925 = vadd.xlane.f32.xlu1 %v5924_v47  ;;  %v5884_v2 = vsub.f32 %v9991_v14, %v5860_v36 }
 0x906   :  { %v5845_v48 = vpop.xlane.xlu0 %5844  ;;  %v5921_v31 = vsel %vm408_vm1, %v10055_v43, 0.0 }
 0x907   :  { %v5879_v51 = vsub.f32 %v9987_v34, %v5845_v48  ;;  %5922 = vadd.xlane.f32.xlu0 %v5921_v31  ;;  %8330 = vpow2.f32 %v5897_v50  ;;  %v5911_v44 = vmul.f32 1.442695, %v5884_v2 }
 0x908   :  { %8332 = vpow2.f32 %v5907_v61  ;;  %v5866_v0 = vpop.xlane.xlu1 %5865 }
 0x909   :  { %v5901_v52 = vmul.f32 1.442695, %v5879_v51  ;;  %v10063_v35 = vpop.eup %8322  ;;  %v5886_v63 = vsub.f32 %v10003_v28, %v5866_v0 }
 0x90a   :  { %v5851_v32 = vpop.xlane.xlu0 %5850  ;;  %v5930_v40 = vsel %vm408_vm1, %v10063_v35, 0.0  ;;  %v10069_v4 = vpop.eup %8324 }
 0x90b   :  { %v5881_v29 = vsub.f32 %v9995_v5, %v5851_v32  ;;  %8334 = vpow2.f32 %v5901_v52  ;;  %5931 = vadd.xlane.f32.xlu1 %v5930_v40  ;;  %v5915_v37 = vmul.f32 1.442695, %v5886_v63  ;;  %v5936_v5 = vsel %vm408_vm1, %v10069_v4, 0.0 }
 0x90c   :  { %8336 = vpow2.f32 %v5911_v44  ;;  %v5872_v60 = vpop.xlane.xlu1 %5871 }
 0x90d   :  { %v5905_v34 = vmul.f32 1.442695, %v5881_v29  ;;  %v10071_v14 = vpop.eup %8326  ;;  %v5888_v39 = vsub.f32 %v10015_v41, %v5872_v60 }
 0x90e   :  { %v5857_v55 = vpop.xlane.xlu0 %5856  ;;  %v5927_v13 = vsel %vm408_vm1, %v10071_v14, 0.0  ;;  %v10079_v30 = vpop.eup %8328 }
 0x90f   :  { %v5883_v28 = vsub.f32 %v10011_v15, %v5857_v55  ;;  %8338 = vpow2.f32 %v5905_v34  ;;  %5937 = vadd.xlane.f32.xlu1 %v5936_v5  ;;  %5928 = vadd.xlane.f32.xlu0 %v5927_v13  ;;  %v5919_v47 = vmul.f32 1.442695, %v5888_v39  ;;  %v5942_v36 = vsel %vm408_vm1, %v10079_v30, 0.0 }
 0x910   :  { %8340 = vpow2.f32 %v5915_v37  ;;  %v6086_v61 = vpop.permute.xlu1 %6085 }
 0x911   :  { %v5909_v33 = vmul.f32 1.442695, %v5883_v28  ;;  %v10081_v50 = vpop.eup %8330  ;;  %7933 = vmatprep.subr.mxu1 %v6086_v61 }
 0x912   :  { %v5863_v41 = vpop.xlane.xlu0 %5862  ;;  %v5933_v48 = vsel %vm408_vm1, %v10081_v50, 0.0  ;;  %v10088_v31 = vpop.eup %8332  ;;  %7934 = vmatpush3.msra.mxu1 %v6086_v61 }
 0x913   :  { %v5885_v15 = vsub.f32 %v10023_v54, %v5863_v41  ;;  %8342 = vpow2.f32 %v5909_v33  ;;  %5943 = vadd.xlane.f32.xlu1 %v5942_v36  ;;  %5934 = vadd.xlane.f32.xlu0 %v5933_v48  ;;  %v5948_v0 = vsel %vm408_vm1, %v10088_v31, 0.0  ;;  %v10505_v36 = vpack.i.bf16 %v9515_v16, %v9517_v49  ;;  %v10511_v16 = vld [vmem:[#allocation36_spill] sm:$0xff] }
 0x914   :  { %8344 = vpow2.f32 %v5919_v47  ;;  %v10092_v52 = vpop.permute.xlu1 %6169  ;;  %v10506_v48 = vpack.i.bf16 %v9527_v46, %v9529_v10  ;;  %v10513_v46 = vld [vmem:[#allocation31_spill] sm:$0xff]  ;;  %v10514_v10 = vld [vmem:[#allocation32_spill] sm:$0xff] }
 0x915   :  { %v5913_v2 = vmul.f32 1.442695, %v5885_v15  ;;  %v10090_v51 = vpop.eup %8334  ;;  %v10515_v17 = vpack.i.bf16 %v10513_v46, %v10514_v10 }
 0x916   :  { %v5869_v44 = vpop.xlane.xlu0 %5868  ;;  %v5939_v32 = vsel %vm408_vm1, %v10090_v51, 0.0  ;;  %v10099_v63 = vpop.eup %8336 }
 0x917   :  { %8346 = vpow2.f32 %v5913_v2  ;;  %v5887_v54 = vsub.f32 %v10029_v59, %v5869_v44  ;;  %5949 = vadd.xlane.f32.xlu1 %v5948_v0  ;;  %5940 = vadd.xlane.f32.xlu0 %v5939_v32  ;;  %v5954_v59 = vsel %vm408_vm1, %v10099_v63, 0.0  ;;  %v10508_v2 = vld [vmem:[#allocation30_spill] sm:$0xff] }
 0x918   :  { %v10103_v34 = vpop.permute.xlu1 %6253 }
 0x919   :  { %v5917_v29 = vmul.f32 1.442695, %v5887_v54  ;;  %v10101_v40 = vpop.eup %8338  ;;  %7943 = vmatprep.subr.mxu1 %v10103_v34 }
 0x91a   :  { %v6002_v37 = vpop.permute.xlu0 %6001  ;;  %v5945_v60 = vsel %vm408_vm1, %v10101_v40, 0.0  ;;  %v10110_v55 = vpop.eup %8340 }
 0x91b   :  { %8348 = vpow2.f32 %v5917_v29  ;;  %7928 = vmatprep.subr.mxu0 %v6002_v37  ;;  %5955 = vadd.xlane.f32.xlu1 %v5954_v59  ;;  %v5960_v28 = vsel %vm408_vm1, %v10110_v55, 0.0 }
 0x91c   :  { %7929 = vmatpush3.msra.mxu0 %v6002_v37  ;;  %5946 = vadd.xlane.f32.xlu0 %v5945_v60  ;;  %v10175_v3 = vpop.permute.xlu1 %6421 }
 0x91d   :  { %7938 = vmatprep.subr.mxu0 %v10092_v52  ;;  %v10113_v39 = vpop.eup %8342 }
 0x91e   :  { %v5951_v5 = vsel %vm408_vm1, %v10113_v39, 0.0  ;;  %v10119_v13 = vpop.eup %8344 }
 0x91f   :  { %5961 = vadd.xlane.f32.xlu1 %v5960_v28  ;;  %v5966_v61 = vsel %vm408_vm1, %v10119_v13, 0.0 }
 0x920   :  { %5952 = vadd.xlane.f32.xlu0 %v5951_v5 }
 0x921   :  { %v10121_v33 = vpop.eup %8346 }
 0x922   :  { %v5957_v47 = vsel %vm408_vm1, %v10121_v33, 0.0 }
 0x923   :  { %5967 = vadd.xlane.f32.xlu1 %v5966_v61 }
 0x924   :  { %5958 = vadd.xlane.f32.xlu0 %v5957_v47 }
 0x925   :  { %v10127_v41 = vpop.eup %8348 }
 0x926   :  { %v5963_v15 = vsel %vm408_vm1, %v10127_v41, 0.0 }
 0x928   :  { %5964 = vadd.xlane.f32.xlu0 %v5963_v15 }
 0x934   :  { %6589 = vrot.lane.b32.xlu1 %v8734_v42, %s8384_s30  ;;  %v10507_v42 = vld [vmem:[#allocation3_spill] sm:$0xff] }
 0x935   :  { %v10509_v44 = vpack.i.bf16 %v10507_v42, %v10508_v2 }
 0x938   :  { %8004 = vrot.lane.b32.xlu1 %v10505_v36, %s8385_s11 }
 0x93c   :  { %8014 = vrot.lane.b32.xlu1 %v8013_v24, %s8386_s12  ;;  %v10517_v24 = vld [vmem:[#allocation34_spill] sm:$0xff] }
 0x93d   :  { %v10518_v62 = vpack.i.bf16 %v10516_v22, %v10517_v24 }
 0x93e   :  { %6505 = vrot.lane.b32.xlu0 %v8730_v38, %s8384_s30  ;;  %v10510_v38 = vld [vmem:[#allocation35_spill] sm:$0xff] }
 0x93f   :  { %v10512_v49 = vpack.i.bf16 %v10510_v38, %v10511_v16 }
 0x940   :  { %8024 = vrot.lane.b32.xlu1 %v10506_v48, %s8385_s11 }
 0x942   :  { %7999 = vrot.lane.b32.xlu0 %v10509_v44, %s8385_s11 }
 0x944   :  { %8034 = vrot.lane.b32.xlu1 %v8033_v27, %s8386_s12 }
 0x946   :  { %8009 = vrot.lane.b32.xlu0 %v8008_v21, %s8386_s12  ;;  %v6338_v21 = vpop.permute.xlu0 %6337 }
 0x948   :  { %8044 = vrot.lane.b32.xlu1 %v10512_v49, %s8385_s11 }
 0x94a   :  { %8019 = vrot.lane.b32.xlu0 %v10515_v17, %s8385_s11 }
 0x94e   :  { %8029 = vrot.lane.b32.xlu0 %v8028_v56, %s8386_s12 }
 0x952   :  { %8039 = vrot.lane.b32.xlu0 %v10518_v62, %s8385_s11 }
 0x992   :  { %v5926_v57 = vpop.xlane.xlu1 %5925 }
 0x993   :  { %8350 = vrcp.f32 %v5926_v57 }
 0x994   :  { %v5923_v1 = vpop.xlane.xlu0 %5922 }
 0x995   :  { %8352 = vrcp.f32 %v5923_v1 }
 0x998   :  { %v5932_v27 = vpop.xlane.xlu1 %5931 }
 0x999   :  { %8354 = vrcp.f32 %v5932_v27 }
 0x99c   :  { %v5938_v54 = vpop.xlane.xlu1 %5937  ;;  %v5929_v0 = vpop.xlane.xlu0 %5928 }
 0x99d   :  { %v8351_v32 = vpop.eup %8350  ;;  %8356 = vrcp.f32 %v5929_v0 }
 0x99e   :  { %v5986_v26 = vmul.f32 %v8351_v32, %v10053_v9  ;;  %8358 = vrcp.f32 %v5938_v54  ;;  %v8125_v54 = vld [vmem:[%s10406_s5 + $0x8] sm:$0xff]  }
 0x99f   :  { %v8353_v29 = vpop.eup %8352 }
 0x9a0   :  { %v5985_v19 = vmul.f32 %v8353_v29, %v10055_v43  ;;  %v5944_v56 = vpop.xlane.xlu1 %5943  ;;  %v5935_v37 = vpop.xlane.xlu0 %5934 }
 0x9a1   :  { %8360 = vrcp.f32 %v5935_v37 }
 0x9a2   :  { %7930 = vmatprep.mubr.msk.f32.mxu0 %vm408_vm1, %v5985_v19  ;;  %8362 = vrcp.f32 %v5944_v56 }
 0x9a3   :  { %7931 = vmatmul.mubr.msk.f32.vlgmr.msra.gmra.mrb[64].mxu0 %vm408_vm1, %v5986_v26  ;;  %v8355_v28 = vpop.eup %8354 }
 0x9a4   :  { %7939 = vmatpush3.msra.mxu0 %v10092_v52  ;;  %v5950_v59 = vpop.xlane.xlu1 %5949  ;;  %v5941_v60 = vpop.xlane.xlu0 %5940  ;;  %v5988_v61 = vmul.f32 %v8355_v28, %v10063_v35 }
 0x9a5   :  { %7948 = vmatprep.subr.mxu0 %v6338_v21  ;;  %8364 = vrcp.f32 %v5941_v60 }
 0x9a6   :  { %8366 = vrcp.f32 %v5950_v59 }
 0x9a7   :  { %v8357_v5 = vpop.eup %8356 }
 0x9a8   :  { %v5956_v43 = vpop.xlane.xlu1 %5955  ;;  %v5987_v47 = vmul.f32 %v8357_v5, %v10071_v14  ;;  %v8359_v15 = vpop.eup %8358 }
 0x9a9   :  { %v5947_v9 = vpop.xlane.xlu0 %5946  ;;  %v5990_v2 = vmul.f32 %v8359_v15, %v10069_v4 }
 0x9aa   :  { %8368 = vrcp.f32 %v5947_v9  ;;  %7935 = vmatprep.mubr.msk.f32.mxu1 %vm408_vm1, %v5987_v47  ;;  %v10523_v9 = vld [vmem:[#allocation40_spill] sm:$0xff] }
 0x9ab   :  { %v8361_v36 = vpop.eup %8360  ;;  %7936 = vmatmul.mubr.msk.f32.vlgmr.msra.gmra.mrb[80].mxu1 %vm408_vm1, %v5988_v61  ;;  %8370 = vrcp.f32 %v5956_v43  ;;  %v10522_v43 = vld [vmem:[#allocation39_spill] sm:$0xff] }
 0x9ac   :  { %v5962_v52 = vpop.xlane.xlu1 %5961  ;;  %7944 = vmatpush3.msra.mxu1 %v10103_v34  ;;  %v5989_v42 = vmul.f32 %v8361_v36, %v10081_v50  ;;  %v8363_v35 = vpop.eup %8362  ;;  %v10524_v58 = vpack.i.bf16 %v10522_v43, %v10523_v9  ;;  %v10530_v9 = vld [vmem:[#allocation19_spill] sm:$0xff] }
 0x9ad   :  { %v5953_v48 = vpop.xlane.xlu0 %5952  ;;  %7953 = vmatprep.subr.mxu1 %v10175_v3  ;;  %v5992_v16 = vmul.f32 %v8363_v35, %v10079_v30 }
 0x9ae   :  { %8372 = vrcp.f32 %v5953_v48  ;;  %7940 = vmatprep.mubr.msk.f32.mxu0 %vm408_vm1, %v5989_v42 }
 0x9af   :  { %v8365_v14 = vpop.eup %8364  ;;  %7941 = vmatmul.mubr.msk.f32.vlgmr.msra.gmra.mrb[66].mxu0 %vm408_vm1, %v5990_v2  ;;  %8374 = vrcp.f32 %v5962_v52 }
 0x9b0   :  { %v5968_v44 = vpop.xlane.xlu1 %5967  ;;  %7949 = vmatpush3.msra.mxu0 %v6338_v21  ;;  %v5991_v34 = vmul.f32 %v8365_v14, %v10090_v51  ;;  %v8367_v50 = vpop.eup %8366 }
 0x9b1   :  { %v5959_v38 = vpop.xlane.xlu0 %5958  ;;  %v5994_v17 = vmul.f32 %v8367_v50, %v10088_v31 }
 0x9b2   :  { %8376 = vrcp.f32 %v5959_v38  ;;  %7945 = vmatprep.mubr.msk.f32.mxu1 %vm408_vm1, %v5991_v34 }
 0x9b3   :  { %7946 = vmatmul.mubr.msk.f32.vlgmr.msra.gmra.mrb[82].mxu1 %vm408_vm1, %v5992_v16  ;;  %8378 = vrcp.f32 %v5968_v44 }
 0x9b4   :  { %v8369_v4 = vpop.eup %8368  ;;  %v6590_v49 = vpop.permute.xlu1 %6589  ;;  %7954 = vmatpush3.msra.mxu1 %v10175_v3 }
 0x9b5   :  { %v5965_v46 = vpop.xlane.xlu0 %5964  ;;  %v5993_v10 = vmul.f32 %v8369_v4, %v10101_v40  ;;  %7963 = vmatprep.subr.mxu1 %v6590_v49  ;;  %v8371_v51 = vpop.eup %8370  ;;  %v10525_v4 = vld [vmem:[#allocation14_spill] sm:$0xff] }
 0x9b6   :  { %8380 = vrcp.f32 %v5965_v46  ;;  %v5996_v62 = vmul.f32 %v8371_v51, %v10099_v63  ;;  %v10526_v46 = vld [vmem:[#allocation15_spill] sm:$0xff] }
 0x9b7   :  { %7950 = vmatprep.mubr.msk.f32.mxu0 %vm408_vm1, %v5993_v10 }
 0x9b8   :  { %v8373_v30 = vpop.eup %8372  ;;  %7951 = vmatmul.mubr.msk.f32.vlgmr.msra.gmra.mrb[68].mxu0 %vm408_vm1, %v5994_v17  ;;  %v8005_v6 = vpop.permute.xlu1 %8004 }
 0x9b9   :  { %v6506_v22 = vpop.permute.xlu0 %6505  ;;  %v5995_v24 = vmul.f32 %v8373_v30, %v10113_v39  ;;  %v8375_v3 = vpop.eup %8374 }
 0x9ba   :  { %7958 = vmatprep.subr.mxu0 %v6506_v22  ;;  %v5998_v21 = vmul.f32 %v8375_v3, %v10110_v55 }
 0x9bb   :  { %7955 = vmatprep.mubr.msk.f32.mxu1 %vm408_vm1, %v5995_v24  ;;  %7959 = vmatpush3.msra.mxu0 %v6506_v22 }
 0x9bc   :  { %v8377_v40 = vpop.eup %8376  ;;  %7956 = vmatmul.mubr.msk.f32.vlgmr.msra.gmra.mrb[84].mxu1 %vm408_vm1, %v5996_v62  ;;  %v8015_v35 = vpop.permute.xlu1 %8014 }
 0x9bd   :  { %7964 = vmatpush3.msra.mxu1 %v6590_v49  ;;  %v5997_v31 = vmul.f32 %v8377_v40, %v10121_v33  ;;  %v8379_v57 = vpop.eup %8378  ;;  %v8124_v33 = vld [vmem:[%s10406_s5] sm:$0xff]   ;;  %v8000_v2 = vpop.permute.xlu0 %7999  ;;  %v8007_v40 = vunpack.i.h.bf16 %v8005_v6 }
 0x9be   :  { %v6000_v39 = vmul.f32 %v8379_v57, %v10119_v13  ;;  %7968 = vmatprep.subr.bf16.mxu0 %v8124_v33  ;;  %v8002_v34 = vunpack.i.h.bf16 %v8000_v2  ;;  %v8001_v16 = vunpack.i.l.bf16 %v8000_v2  ;;  %v8017_v57 = vunpack.i.h.bf16 %v8015_v35 }
 0x9bf   :  { %7960 = vmatprep.mubr.msk.f32.mxu0 %vm408_vm1, %v5997_v31  ;;  %v8006_v31 = vunpack.i.l.bf16 %v8005_v6 }
 0x9c0   :  { %v8381_v1 = vpop.eup %8380  ;;  %7961 = vmatmul.mubr.msk.f32.vlgmr.msra.gmra.mrb[70].mxu0 %vm408_vm1, %v5998_v21  ;;  %v8025_v44 = vpop.permute.xlu1 %8024  ;;  %v6866_v49 = vsel %vm408_vm1, %v10525_v4, %v8002_v34  ;;  %v6865_v10 = vsel %vm408_vm1, %v10526_v46, %v8001_v16 }
 0x9c1   :  { %v5999_v63 = vmul.f32 %v8381_v1, %v10127_v41  ;;  %7969 = vmatpush3.bf16.msra.mxu0 %v8124_v33  ;;  %v8010_v8 = vpop.permute.xlu0 %8009  ;;  %v8016_v1 = vunpack.i.l.bf16 %v8015_v35  ;;  %v10528_v33 = vld [vmem:[#allocation17_spill] sm:$0xff] }
 0x9c2   :  { %7970 = vmatprep.subr.bf16.mxu0 %v8125_v54  ;;  %v8012_v25 = vunpack.i.h.bf16 %v8010_v8  ;;  %v8011_v45 = vunpack.i.l.bf16 %v8010_v8  ;;  %v10532_v8 = vld [vmem:[#allocation21_spill] sm:$0xff] }
 0x9c3   :  { %7965 = vmatprep.mubr.msk.f32.mxu1 %vm408_vm1, %v5999_v63  ;;  %v10527_v63 = vld [vmem:[#allocation16_spill] sm:$0xff] }
 0x9c4   :  { %7966 = vmatmul.mubr.msk.f32.vlgmr.msra.gmra.mrb[86].mxu1 %vm408_vm1, %v6000_v39  ;;  %v6882_v30 = vsel %vm6881_vm3, %v6865_v10, %v8011_v45  ;;  %v6883_v22 = vsel %vm6881_vm3, %v6866_v49, %v8012_v25  ;;  %v6868_v39 = vsel %vm408_vm1, %v10527_v63, %v8007_v40 }
 0x9c5   :  { %7971 = vmatpush3.bf16.msra.mxu0 %v8125_v54 }
 0xa76   :  { %v7932_v55 = vpop.f32.mrb[64].mxu0 }
 0xa77   :  { %v6076_v27 = vpop.f32.mrb[65].mxu0 }
 0xa78   :  { %v8048_v0 = vpack.i.bf16 %v7932_v55, %v6076_v27  ;;  %v6867_v55 = vsel %vm408_vm1, %v10528_v33, %v8006_v31 }
 0xa7a   :  { %8049 = vrot.lane.b32.xlu0 %v8048_v0, %s8387_s16 }
 0xa7e   :  { %8054 = vrot.lane.b32.xlu0 %v8053_v12, %s8386_s12  ;;  %v7937_v13 = vpop.f32.mrb[80].mxu1  ;;  %v10521_v12 = vpack.i.bf16 %v10519_v20, %v10520_v23  ;;  %v8027_v20 = vunpack.i.h.bf16 %v8025_v44  ;;  %v8026_v23 = vunpack.i.l.bf16 %v8025_v44 }
 0xa7f   :  { %v6160_v41 = vpop.f32.mrb[81].mxu1 }
 0xa80   :  { %v8058_v32 = vpack.i.bf16 %v7937_v13, %v6160_v41  ;;  %v6871_v6 = vsel %vm408_vm1, %v10532_v8, %v8026_v23 }
 0xa82   :  { %8059 = vrot.lane.b32.xlu1 %v8058_v32, %s8387_s16  ;;  %v7942_v29 = vpop.f32.mrb[66].mxu0 }
 0xa83   :  { %v6244_v19 = vpop.f32.mrb[67].mxu0 }
 0xa84   :  { %v8068_v26 = vpack.i.bf16 %v7942_v29, %v6244_v19  ;;  %v6884_v29 = vsel %vm6881_vm3, %v6867_v55, %v8016_v1  ;;  %v6885_v19 = vsel %vm6881_vm3, %v6868_v39, %v8017_v57 }
 0xa86   :  { %8064 = vrot.lane.b32.xlu1 %v8063_v18, %s8386_s12  ;;  %8069 = vrot.lane.b32.xlu0 %v8068_v26, %s8387_s16  ;;  %v7947_v56 = vpop.f32.mrb[82].mxu1 }
 0xa87   :  { %v6328_v37 = vpop.f32.mrb[83].mxu1 }
 0xa88   :  { %v8078_v59 = vpack.i.bf16 %v7947_v56, %v6328_v37 }
 0xa8a   :  { %8074 = vrot.lane.b32.xlu0 %v10521_v12, %s8385_s11  ;;  %8079 = vrot.lane.b32.xlu1 %v8078_v59, %s8387_s16 }
 0xa8b   :  { %v7952_v60 = vpop.f32.mrb[68].mxu0 }
 0xa8c   :  { %v6412_v28 = vpop.f32.mrb[69].mxu0 }
 0xa8d   :  { %v8088_v5 = vpack.i.bf16 %v7952_v60, %v6412_v28 }
 0xa8e   :  { %8084 = vrot.lane.b32.xlu1 %v10524_v58, %s8385_s11 }
 0xa8f   :  { %8089 = vrot.lane.b32.xlu0 %v8088_v5, %s8387_s16  ;;  %v7957_v53 = vpop.f32.mrb[84].mxu1  ;;  %v10529_v5 = vld [vmem:[#allocation18_spill] sm:$0xff] }
 0xa90   :  { %v6496_v18 = vpop.f32.mrb[85].mxu1 }
 0xa91   :  { %v8098_v47 = vpack.i.bf16 %v7957_v53, %v6496_v18 }
 0xa93   :  { %8094 = vrot.lane.b32.xlu0 %v8093_v7, %s8386_s12  ;;  %8099 = vrot.lane.b32.xlu1 %v8098_v47, %s8387_s16  ;;  %v7962_v61 = vpop.f32.mrb[70].mxu0  ;;  %v8020_v7 = vpop.permute.xlu0 %8019 }
 0xa94   :  { %v6580_v15 = vpop.f32.mrb[71].mxu0  ;;  %v8022_v0 = vunpack.i.h.bf16 %v8020_v7  ;;  %v8021_v13 = vunpack.i.l.bf16 %v8020_v7 }
 0xa95   :  { %v8108_v36 = vpack.i.bf16 %v7962_v61, %v6580_v15 }
 0xa96   :  { %v6870_v43 = vsel %vm408_vm1, %v10529_v5, %v8022_v0  ;;  %v6869_v58 = vsel %vm408_vm1, %v10530_v9, %v8021_v13 }
 0xa97   :  { %8104 = vrot.lane.b32.xlu1 %v8103_v11, %s8386_s12  ;;  %v7967_v52 = vpop.f32.mrb[86].mxu1  ;;  %8109 = vrot.lane.b32.xlu0 %v8108_v36, %s8387_s16  ;;  %v8030_v14 = vpop.permute.xlu0 %8029 }
 0xa98   :  { %v6664_v48 = vpop.f32.mrb[87].mxu1  ;;  %v8035_v11 = vpop.permute.xlu1 %8034  ;;  %v8032_v26 = vunpack.i.h.bf16 %v8030_v14  ;;  %v8031_v56 = vunpack.i.l.bf16 %v8030_v14 }
 0xa99   :  { %v8113_v42 = vpack.i.bf16 %v7967_v52, %v6664_v48  ;;  %v8037_v47 = vunpack.i.h.bf16 %v8035_v11  ;;  %v8036_v61 = vunpack.i.l.bf16 %v8035_v11 }
 0xa9a   :  { %v6886_v15 = vsel %vm6881_vm3, %v6869_v58, %v8031_v56  ;;  %v6887_v36 = vsel %vm6881_vm3, %v6870_v43, %v8032_v26  ;;  %v10538_v43 = vld [vmem:[#allocation27_spill] sm:$0xff] }
 0xa9b   :  { %8114 = vrot.lane.b32.xlu1 %v8113_v42, %s8387_s16  ;;  %v10251_v38 = vpop.permute.xlu0 %8039  ;;  %v10531_v42 = vld [vmem:[#allocation20_spill] sm:$0xff]  ;;  %v6888_v45 = vsel %vm6881_vm3, %v6871_v6, %v8036_v61 }
 0xa9c   :  { %v10261_v21 = vpop.permute.xlu1 %8044  ;;  %v6872_v2 = vsel %vm408_vm1, %v10531_v42, %v8027_v20  ;;  %v8042_v44 = vunpack.i.h.bf16 %v10251_v38  ;;  %v8041_v34 = vunpack.i.l.bf16 %v10251_v38 }
 0xa9d   :  { %v6889_v11 = vsel %vm6881_vm3, %v6872_v2, %v8037_v47  ;;  %v8047_v10 = vunpack.i.h.bf16 %v10261_v21 }
 0xaec   :  { %v8050_v50 = vpop.permute.xlu0 %8049 }
 0xaed   :  { %v8052_v17 = vunpack.i.h.bf16 %v8050_v50  ;;  %v8051_v51 = vunpack.i.l.bf16 %v8050_v50 }
 0xaef   :  { %v6899_v24 = vsel %vm6898_vm4, %v6882_v30, %v8051_v51  ;;  %v6900_v62 = vsel %vm6898_vm4, %v6883_v22, %v8052_v17  ;;  %v8046_v17 = vunpack.i.l.bf16 %v10261_v21  ;;  %v10533_v22 = vld [vmem:[#allocation22_spill] sm:$0xff] }
 0xaf0   :  { %v6915_v3 = vpack.c.bf16 %v6900_v62, %v6899_v24  ;;  %v8055_v27 = vpop.permute.xlu0 %8054  ;;  %v6874_v24 = vsel %vm408_vm1, %v10533_v22, %v8042_v44  ;;  %v10534_v62 = vld [vmem:[#allocation23_spill] sm:$0xff] }
 0xaf1   :  { %v8057_v50 = vunpack.i.h.bf16 %v8055_v27  ;;  %v8056_v4 = vunpack.i.l.bf16 %v8055_v27 }
 0xaf2   :  { %7972 = vmatprep.mubr.msk.bf16.mxu0 %vm95_vm0, %v6915_v3  ;;  %v6873_v3 = vsel %vm408_vm1, %v10534_v62, %v8041_v34  ;;  %v10540_v34 = vld [vmem:[#allocation29_spill] sm:$0xff] }
 0xaf3   :  { %v6890_v57 = vsel %vm6881_vm3, %v6873_v3, %v8056_v4  ;;  %v6891_v1 = vsel %vm6881_vm3, %v6874_v24, %v8057_v50 }
 0xaf4   :  { %v8060_v54 = vpop.permute.xlu1 %8059 }
 0xaf5   :  { %v8062_v41 = vunpack.i.h.bf16 %v8060_v54  ;;  %v8061_v32 = vunpack.i.l.bf16 %v8060_v54 }
 0xaf7   :  { %v6902_v37 = vsel %vm6898_vm4, %v6885_v19, %v8062_v41  ;;  %v6901_v59 = vsel %vm6898_vm4, %v6884_v29, %v8061_v32  ;;  %v10535_v41 = vld [vmem:[#allocation24_spill] sm:$0xff]  ;;  %v10536_v29 = vld [vmem:[#allocation25_spill] sm:$0xff] }
 0xaf8   :  { %v6916_v12 = vpack.c.bf16 %v6902_v37, %v6901_v59  ;;  %v8065_v60 = vpop.permute.xlu1 %8064  ;;  %v8070_v28 = vpop.permute.xlu0 %8069  ;;  %v6876_v32 = vsel %vm408_vm1, %v10535_v41, %v8047_v10  ;;  %v6875_v19 = vsel %vm408_vm1, %v10536_v29, %v8046_v17  ;;  %v7337_v10 = vld [vmem:[%s10407_s9] ss:$0 sm:$0xff] }
 0xaf9   :  { %v8072_v53 = vunpack.i.h.bf16 %v8070_v28  ;;  %v8071_v18 = vunpack.i.l.bf16 %v8070_v28  ;;  %v8067_v63 = vunpack.i.h.bf16 %v8065_v60  ;;  %v8066_v39 = vunpack.i.l.bf16 %v8065_v60  ;;  %v10537_v28 = vld [vmem:[#allocation26_spill] sm:$0xff] }
 0xafa   :  { %7973 = vmatmul.mubr.msk.bf16.vlgmr.msra.gmra.mrb[72].mxu0 %vm95_vm0, %v6916_v12 }
 0xafb   :  { %v6903_v52 = vsel %vm6898_vm4, %v6886_v15, %v8071_v18  ;;  %v6904_v48 = vsel %vm6898_vm4, %v6887_v36, %v8072_v53  ;;  %v6893_v37 = vsel %vm6881_vm3, %v6876_v32, %v8067_v63  ;;  %v6892_v59 = vsel %vm6881_vm3, %v6875_v19, %v8066_v39 }
 0xafc   :  { %v6917_v7 = vpack.c.bf16 %v6904_v48, %v6903_v52  ;;  %v8080_v35 = vpop.permute.xlu1 %8079  ;;  %v8075_v14 = vpop.permute.xlu0 %8074 }
 0xafd   :  { %v8082_v16 = vunpack.i.h.bf16 %v8080_v35  ;;  %v8081_v25 = vunpack.i.l.bf16 %v8080_v35  ;;  %v8077_v55 = vunpack.i.h.bf16 %v8075_v14  ;;  %v8076_v27 = vunpack.i.l.bf16 %v8075_v14  ;;  %v10539_v14 = vld [vmem:[#allocation28_spill] sm:$0xff] }
 0xafe   :  { %7976 = vmatprep.mubr.msk.bf16.mxu0 %vm95_vm0, %v6917_v7 }
 0xaff   :  { %v6906_v49 = vsel %vm6898_vm4, %v6889_v11, %v8082_v16  ;;  %v6905_v46 = vsel %vm6898_vm4, %v6888_v45, %v8081_v25  ;;  %v6878_v5 = vsel %vm408_vm1, %v10537_v28, %v8077_v55  ;;  %v6877_v9 = vsel %vm408_vm1, %v10538_v43, %v8076_v27 }
 0xb00   :  { %v6918_v51 = vpack.c.bf16 %v6906_v49, %v6905_v46  ;;  %v8085_v38 = vpop.permute.xlu1 %8084 }
 0xb01   :  { %v8090_v30 = vpop.permute.xlu0 %8089  ;;  %v8087_v47 = vunpack.i.h.bf16 %v8085_v38  ;;  %v8086_v61 = vunpack.i.l.bf16 %v8085_v38 }
 0xb02   :  { %v8092_v40 = vunpack.i.h.bf16 %v8090_v30  ;;  %v8091_v31 = vunpack.i.l.bf16 %v8090_v30  ;;  %7977 = vmatmul.mubr.msk.bf16.gmra.mrb[76].mxu0 %vm95_vm0, %v6918_v51 }
 0xb03   :  { %v6880_v44 = vsel %vm408_vm1, %v10539_v14, %v8087_v47  ;;  %v6879_v16 = vsel %vm408_vm1, %v10540_v34, %v8086_v61 }
 0xb04   :  { %v6907_v21 = vsel %vm6898_vm4, %v6890_v57, %v8091_v31  ;;  %v6908_v33 = vsel %vm6898_vm4, %v6891_v1, %v8092_v40 }
 0xb05   :  { %v6919_v54 = vpack.c.bf16 %v6908_v33, %v6907_v21  ;;  %v8100_v0 = vpop.permute.xlu1 %8099  ;;  %v8095_v13 = vpop.permute.xlu0 %8094 }
 0xb06   :  { %v8102_v26 = vunpack.i.h.bf16 %v8100_v0  ;;  %v8101_v56 = vunpack.i.l.bf16 %v8100_v0  ;;  %v8097_v20 = vunpack.i.h.bf16 %v8095_v13  ;;  %v8096_v23 = vunpack.i.l.bf16 %v8095_v13 }
 0xb07   :  { %7980 = vmatprep.mubr.msk.bf16.mxu0 %vm95_vm0, %v6919_v54 }
 0xb08   :  { %v6910_v12 = vsel %vm6898_vm4, %v6893_v37, %v8102_v26  ;;  %v6909_v60 = vsel %vm6898_vm4, %v6892_v59, %v8101_v56  ;;  %v6894_v52 = vsel %vm6881_vm3, %v6877_v9, %v8096_v23  ;;  %v6895_v48 = vsel %vm6881_vm3, %v6878_v5, %v8097_v20 }
 0xb09   :  { %v6920_v58 = vpack.c.bf16 %v6910_v12, %v6909_v60  ;;  %v8105_v53 = vpop.permute.xlu1 %8104  ;;  %v8110_v18 = vpop.permute.xlu0 %8109 }
 0xb0a   :  { %v8112_v15 = vunpack.i.h.bf16 %v8110_v18  ;;  %v8111_v36 = vunpack.i.l.bf16 %v8110_v18  ;;  %v8107_v42 = vunpack.i.h.bf16 %v8105_v53  ;;  %v8106_v2 = vunpack.i.l.bf16 %v8105_v53 }
 0xb0b   :  { %7981 = vmatmul.mubr.msk.bf16.gmra.mrb[80].mxu0 %vm95_vm0, %v6920_v58 }
 0xb0c   :  { %v6911_v8 = vsel %vm6898_vm4, %v6894_v52, %v8111_v36  ;;  %v6912_v6 = vsel %vm6898_vm4, %v6895_v48, %v8112_v15  ;;  %v6897_v11 = vsel %vm6881_vm3, %v6880_v44, %v8107_v42  ;;  %v6896_v50 = vsel %vm6881_vm3, %v6879_v16, %v8106_v2 }
 0xb0d   :  { %v6921_v7 = vpack.c.bf16 %v6912_v6, %v6911_v8  ;;  %v8115_v35 = vpop.permute.xlu1 %8114 }
 0xb0e   :  { %v8117_v25 = vunpack.i.h.bf16 %v8115_v35  ;;  %v8116_v45 = vunpack.i.l.bf16 %v8115_v35 }
 0xb0f   :  { %7984 = vmatprep.mubr.msk.bf16.mxu0 %vm95_vm0, %v6921_v7 }
 0xb10   :  { %v6914_v4 = vsel %vm6898_vm4, %v6897_v11, %v8117_v25  ;;  %v6913_v49 = vsel %vm6898_vm4, %v6896_v50, %v8116_v45 }
 0xb11   :  { %v6922_v46 = vpack.c.bf16 %v6914_v4, %v6913_v49 }
 0xb13   :  { %7985 = vmatmul.mubr.msk.bf16.gmra.mrb[84].mxu0 %vm95_vm0, %v6922_v46 }
 0xbcd   :  { %v7974_v17 = vpop.f32.mrb[72].mxu0 }
 0xbce   :  { %v7013_v51 = vadd.f32 %v7974_v17, %v7337_v10  ;;  %v7004_v38 = vpop.f32.mrb[73].mxu0 }
 0xbcf   :  { %v7005_v30 = vadd.f32 %v7337_v10, %v7004_v38  ;;  %v7975_v22 = vpop.f32.mrb[74].mxu0 }
 0xbd0   :  { %v7366_v24 = vpack.c.bf16 %v7013_v51, %v7013_v51  ;;  %v7016_v62 = vadd.f32 %v7975_v22, %v7337_v10  ;;  %v7007_v3 = vpop.f32.mrb[75].mxu0 }
 0xbd1   :  { %v7364_v40 = vpack.c.bf16 %v7005_v30, %v7005_v30  ;;  %v7008_v31 = vadd.f32 %v7337_v10, %v7007_v3 }
 0xbd2   :  { %7134 = vst.msk [vmem:[%s10408_s10 + $0x8] sm:$0xf] %vm7131_vm5, %v7366_v24  ;;  %v7367_v57 = vpack.c.bf16 %v7016_v62, %v7016_v62 }
 0xbd3   :  { %7132 = vst.msk [vmem:[%s10408_s10] sm:$0xf] %vm7131_vm5, %v7364_v40  ;;  %v7365_v1 = vpack.c.bf16 %v7008_v31, %v7008_v31 }
 0xbd4   :  { %7135 = vst.msk [vmem:[%s10408_s10 + $0xc] sm:$0xf] %vm7131_vm5, %v7367_v57 }
 0xbd5   :  { %7133 = vst.msk [vmem:[%s10408_s10 + $0x4] sm:$0xf] %vm7131_vm5, %v7365_v1  ;;  %v7978_v63 = vpop.f32.mrb[76].mxu0 }
 0xbd6   :  { %v7029_v39 = vadd.f32 %v7978_v63, %v7337_v10  ;;  %v7020_v21 = vpop.f32.mrb[77].mxu0 }
 0xbd7   :  { %v7021_v33 = vadd.f32 %v7337_v10, %v7020_v21  ;;  %v7979_v55 = vpop.f32.mrb[78].mxu0 }
 0xbd8   :  { %v7370_v27 = vpack.c.bf16 %v7029_v39, %v7029_v39  ;;  %v7032_v54 = vadd.f32 %v7979_v55, %v7337_v10  ;;  %v7023_v0 = vpop.f32.mrb[79].mxu0 }
 0xbd9   :  { %v7368_v13 = vpack.c.bf16 %v7021_v33, %v7021_v33  ;;  %v7024_v41 = vadd.f32 %v7337_v10, %v7023_v0 }
 0xbda   :  { %7138 = vst.msk [vmem:[%s10408_s10 + $0x18] sm:$0xf] %vm7131_vm5, %v7370_v27  ;;  %v7371_v32 = vpack.c.bf16 %v7032_v54, %v7032_v54 }
 0xbdb   :  { %7136 = vst.msk [vmem:[%s10408_s10 + $0x10] sm:$0xf] %vm7131_vm5, %v7368_v13  ;;  %v7369_v29 = vpack.c.bf16 %v7024_v41, %v7024_v41 }
 0xbdc   :  { %7139 = vst.msk [vmem:[%s10408_s10 + $0x1c] sm:$0xf] %vm7131_vm5, %v7371_v32 }
 0xbdd   :  { %7137 = vst.msk [vmem:[%s10408_s10 + $0x14] sm:$0xf] %vm7131_vm5, %v7369_v29 }
 0xbde   :  { %v7982_v19 = vpop.f32.mrb[80].mxu0 }
 0xbdf   :  { %v7045_v26 = vadd.f32 %v7982_v19, %v7337_v10  ;;  %v7036_v56 = vpop.f32.mrb[81].mxu0 }
 0xbe0   :  { %v7037_v37 = vadd.f32 %v7337_v10, %v7036_v56  ;;  %v7983_v59 = vpop.f32.mrb[82].mxu0 }
 0xbe1   :  { %v7374_v20 = vpack.c.bf16 %v7045_v26, %v7045_v26  ;;  %v7048_v23 = vadd.f32 %v7983_v59, %v7337_v10  ;;  %v7039_v12 = vpop.f32.mrb[83].mxu0 }
 0xbe2   :  { %v7372_v60 = vpack.c.bf16 %v7037_v37, %v7037_v37  ;;  %v7040_v28 = vadd.f32 %v7337_v10, %v7039_v12 }
 0xbe3   :  { %7142 = vst.msk [vmem:[%s10408_s10 + $0x28] sm:$0xf] %vm7131_vm5, %v7374_v20  ;;  %v7375_v5 = vpack.c.bf16 %v7048_v23, %v7048_v23 }
 0xbe4   :  { %7140 = vst.msk [vmem:[%s10408_s10 + $0x20] sm:$0xf] %vm7131_vm5, %v7372_v60  ;;  %v7373_v43 = vpack.c.bf16 %v7040_v28, %v7040_v28 }
 0xbe5   :  { %7143 = vst.msk [vmem:[%s10408_s10 + $0x2c] sm:$0xf] %vm7131_vm5, %v7375_v5 }
 0xbe6   :  { %7141 = vst.msk [vmem:[%s10408_s10 + $0x24] sm:$0xf] %vm7131_vm5, %v7373_v43  ;;  %v7986_v9 = vpop.f32.mrb[84].mxu0 }
 0xbe7   :  { %v7061_v58 = vadd.f32 %v7986_v9, %v7337_v10  ;;  %v7052_v53 = vpop.f32.mrb[85].mxu0 }
 0xbe8   :  { %v7053_v18 = vadd.f32 %v7337_v10, %v7052_v53  ;;  %v7987_v47 = vpop.f32.mrb[86].mxu0 }
 0xbe9   :  { %v7378_v61 = vpack.c.bf16 %v7061_v58, %v7061_v58  ;;  %v7064_v15 = vadd.f32 %v7987_v47, %v7337_v10  ;;  %v7055_v36 = vpop.f32.mrb[87].mxu0 }
 0xbea   :  { %v7376_v52 = vpack.c.bf16 %v7053_v18, %v7053_v18  ;;  %v7056_v48 = vadd.f32 %v7337_v10, %v7055_v36 }
 0xbeb   :  { %7146 = vst.msk [vmem:[%s10408_s10 + $0x38] sm:$0xf] %vm7131_vm5, %v7378_v61  ;;  %v7379_v42 = vpack.c.bf16 %v7064_v15, %v7064_v15 }
 0xbec   :  { %7144 = vst.msk [vmem:[%s10408_s10 + $0x30] sm:$0xf] %vm7131_vm5, %v7376_v52  ;;  %v7377_v2 = vpack.c.bf16 %v7056_v48, %v7056_v48 }
 0xbed   :  { %7147 = vst.msk [vmem:[%s10408_s10 + $0x3c] sm:$0xf] %vm7131_vm5, %v7379_v42 }
 0xbee   :  { %7145 = vst.msk [vmem:[%s10408_s10 + $0x34] sm:$0xf] %vm7131_vm5, %v7377_v2 }

</bundles_post_ra>
